<compile_context>
chip_gen: v7x
topology: tpu7x:2x2x1
jax: 0.10.0
libtpu: 0.0.40
codegen_flags: <defaults>
</compile_context>

<pallas_src>
import jax
import jax.numpy as jnp
from jax.experimental import pallas as pl
from jax.experimental.pallas import tpu as pltpu

# ----------------------------- synthetic cfg --------------------------------
# (mirrors the cfg fields consumed by MultiPerceiverWav2Vec2.__init__ /
#  build_multi_perceiver; teacher='none' so no wav2vec2 checkpoint is loaded)
B, T            = 2, 8            # batch, time steps
FEAT_SIZE       = 24              # incoming feature size (!= prc_input_channels -> feat_proj active)
IN_CH           = 32              # cfg.prc_input_channels
INPUT_AXIS      = 1               # cfg.prc_input_axis
NUM_FREQ_BANDS  = 4               # cfg.prc_num_freq_bands
MAX_FREQ        = 10.0            # cfg.prc_max_freq
DEPTHS          = [1, 1]          # cfg.prc_depth = "1,1" -> 2 perceiver blocks
NUM_LATENTS     = 16              # cfg.prc_num_latents
LATENT_DIM      = 32              # cfg.prc_latent_dim
CROSS_HEADS     = 1               # cfg.prc_cross_heads
LATENT_HEADS    = 4               # cfg.prc_latent_heads
CROSS_DIM_HEAD  = 16              # cfg.prc_cross_dim_head
LATENT_DIM_HEAD = 8               # cfg.prc_latent_dim_head
SELF_PER_CROSS  = 1               # cfg.prc_self_per_cross_attn
NUM_LABELS      = 5
CLASS_MODE      = "mean"          # cfg.prc_classification
FOURIER_DIM     = INPUT_AXIS * (2 * NUM_FREQ_BANDS + 1)   # 9
CTX_DIM         = IN_CH + FOURIER_DIM                     # 41 (fourier_encode_data=1)
FF_MULT         = 4
LN_EPS          = 1e-5

N_BLOCKS = len(DEPTHS)
# parameter stacking across blocks requires uniform per-block config
# (holds for this synthetic cfg; heterogeneous blocks would need separate
#  parameter stacks / one pallas_call per block).
assert all(d == DEPTHS[0] for d in DEPTHS)
DEPTH    = DEPTHS[0]
L_CROSS  = N_BLOCKS * DEPTH                       # stacked cross-attn / cross-ff layers
L_SELF   = N_BLOCKS * DEPTH * SELF_PER_CROSS      # stacked self-attn / self-ff layers
HIDDEN   = LATENT_DIM * FF_MULT                   # 128
INNER_C  = CROSS_HEADS * CROSS_DIM_HEAD           # 16
INNER_S  = LATENT_HEADS * LATENT_DIM_HEAD         # 32

CROSS_KEYS = ["ca_wq", "ca_wkv", "ca_wo", "cf_w1", "cf_w2", "ca_vec", "ca_lnc", "cf_b1"]
SELF_KEYS  = ["sa_wqkv", "sa_wo", "sf_w1", "sf_w2", "sa_vec", "sf_b1"]

# packed per-layer vector slab rows (all (1, LATENT_DIM)):
#   0: attn PreNorm gamma   1: attn PreNorm beta   2: attn to_out bias
#   3: FF   PreNorm gamma   4: FF   PreNorm beta   5: FF   out bias


def _blocks_per_step():
    """v7x (2 TensorCores/chip): keep one block per grid step and shard blocks
    across the cores.  Single-TC v5e/v6e: unroll all blocks in one grid step
    so the scheduler can interleave their serial LN/softmax/matmul chains."""
    try:
        kind = jax.devices()[0].device_kind.lower()
    except Exception:  # pragma: no cover - defensive; default = safe everywhere
        kind = ""
    return 1 if "v7" in kind else N_BLOCKS


BLOCKS_PER_STEP = _blocks_per_step()


# =============================================================================
# in-kernel helpers (operate on loaded values; traced inside the kernel)
# =============================================================================
def _ln(x, g, b):
    # torch nn.LayerNorm over last dim, eps=1e-5, biased variance
    mu = jnp.mean(x, axis=-1, keepdims=True)
    var = jnp.mean((x - mu) ** 2, axis=-1, keepdims=True)
    return (x - mu) * jax.lax.rsqrt(var + LN_EPS) * g + b


def _mha_out(q3, k3, v3, wo, bo, heads, dim_head):
    """Multi-head softmax attention + output projection.

    q3: (B, N, heads*dh)   k3, v3: (B, M, heads*dh)
    wo: (heads, dh, D) bf16 -- per-head slices of to_out.weight.T, so the
    head merge is folded into the output projection (sum of per-head matmuls)
    and no lane-concatenate / packed-weight sublane slice is needed.
    Returns (B*N, D) in f32.
    """
    bsz, n, _ = q3.shape
    scale = dim_head ** -0.5
    acc = None
    for h in range(heads):
        sl = slice(h * dim_head, (h + 1) * dim_head)
        qh, kh, vh = q3[..., sl], k3[..., sl], v3[..., sl]
        s = jnp.einsum("bnd,bmd->bnm", qh, kh,
                       preferred_element_type=jnp.float32) * scale
        s = s - jnp.max(s, axis=-1, keepdims=True)
        p = jnp.exp(s)
        # approx reciprocal -> EUP slot (rows sum to ~1, not exactly 1)
        p = p * pl.reciprocal(jnp.sum(p, axis=-1, keepdims=True), approx=True)
        oh = jnp.einsum("bnm,bmd->bnd", p, vh,
                        preferred_element_type=jnp.float32)          # (B, N, dh)
        contrib = jnp.dot(oh.reshape(bsz * n, dim_head).astype(wo.dtype), wo[h],
                          preferred_element_type=jnp.float32)
        acc = contrib if acc is None else acc + contrib
    return acc + bo


def _ffn(x2, g, b, w1, b1, w2, b2):
    # PreNorm + FeedForward(dim, mult=4) with GEGLU: Linear -> GEGLU -> Linear
    xn = _ln(x2, g, b)
    h = jnp.dot(xn.astype(w1.dtype), w1, preferred_element_type=jnp.float32) + b1
    hidden = w2.shape[0]
    a, gates = h[:, :hidden], h[:, hidden:]
    # TODO(synk): torch F.gelu defaults to exact erf-GELU; tanh approximation
    # is used here (erf has no guaranteed Mosaic lowering) -> ~1e-3 scale diff.
    act = a * jax.nn.gelu(gates, approximate=True)
    return jnp.dot(act.astype(w2.dtype), w2, preferred_element_type=jnp.float32) + b2


# =============================================================================
# fused kernel: feat_proj + fourier context + N perceiver blocks per grid step
# emits the per-block latent sum over the latent axis (B, LATENT_DIM)
# =============================================================================
def perceiver_blocks_kernel(
        x_ref, fpw_ref, fpb_ref, enc_ref, lat_ref,
        ca_wq_ref, ca_wkv_ref, ca_wo_ref, cf_w1_ref, cf_w2_ref,
        ca_vec_ref, ca_lnc_ref, cf_b1_ref,
        sa_wqkv_ref, sa_wo_ref, sf_w1_ref, sf_w2_ref, sa_vec_ref, sf_b1_ref,
        out_ref):
    bsz, t, feat = x_ref.shape

    # ---- shared input prep (once per grid step, shared by all local blocks) --
    xin = x_ref[...].astype(jnp.bfloat16).reshape(bsz * t, feat)
    proj = (jnp.dot(xin, fpw_ref[...], preferred_element_type=jnp.float32)
            + fpb_ref[...])                                            # (B*T, IN_CH)
    enc = jnp.broadcast_to(enc_ref[...], (bsz, t, FOURIER_DIM))
    enc = enc.reshape(bsz * t, FOURIER_DIM).astype(jnp.float32)        # (B*T, FOURIER)

    # context LayerNorm statistics over the virtual concat [proj | enc]:
    # layer/block independent (only gamma/beta vary) -> hoisted out of all loops
    mu = (jnp.sum(proj, axis=-1, keepdims=True)
          + jnp.sum(enc, axis=-1, keepdims=True)) / CTX_DIM
    var = (jnp.sum((proj - mu) ** 2, axis=-1, keepdims=True)
           + jnp.sum((enc - mu) ** 2, axis=-1, keepdims=True)) / CTX_DIM
    inv = jax.lax.rsqrt(var + LN_EPS)
    norm_p = (proj - mu) * inv
    norm_e = (enc - mu) * inv

    blocks_per_step = lat_ref.shape[0]
    for bi in range(blocks_per_step):                # unrolled -> free interleave
        # this block's latents, broadcast over batch
        x2 = jnp.broadcast_to(lat_ref[bi], (bsz, NUM_LATENTS, LATENT_DIM))
        x2 = x2.reshape(bsz * NUM_LATENTS, LATENT_DIM).astype(jnp.float32)

        for l in range(DEPTH):
            li = bi * DEPTH + l
            vec = ca_vec_ref[li]                     # (6, LATENT_DIM) packed vectors
            lnc = ca_lnc_ref[li]                     # (2, CTX_DIM) context LN gamma/beta

            # ================= cross attention (+ residual) =================
            xn = _ln(x2, vec[0:1, :], vec[1:2, :])
            cn_p = norm_p * lnc[0:1, :IN_CH] + lnc[1:2, :IN_CH]
            cn_e = norm_e * lnc[0:1, IN_CH:] + lnc[1:2, IN_CH:]
            q = jnp.dot(xn.astype(jnp.bfloat16), ca_wq_ref[li],
                        preferred_element_type=jnp.float32)            # (B*NL, INNER_C)
            wkv = ca_wkv_ref[li]
            kv = (jnp.dot(cn_p.astype(jnp.bfloat16), wkv[:IN_CH, :],
                          preferred_element_type=jnp.float32)
                  + jnp.dot(cn_e.astype(jnp.bfloat16), wkv[IN_CH:, :],
                            preferred_element_type=jnp.float32))       # (B*T, 2*INNER_C)
            q3 = q.reshape(bsz, NUM_LATENTS, INNER_C)
            kv3 = kv.reshape(bsz, t, 2 * INNER_C)
            k3, v3 = kv3[..., :INNER_C], kv3[..., INNER_C:]
            x2 = x2 + _mha_out(q3, k3, v3, ca_wo_ref[li], vec[2:3, :],
                               CROSS_HEADS, CROSS_DIM_HEAD)
            # ================= cross feed-forward (+ residual) ==============
            x2 = x2 + _ffn(x2, vec[3:4, :], vec[4:5, :],
                           cf_w1_ref[li], cf_b1_ref[li], cf_w2_ref[li], vec[5:6, :])

            # ================= latent self-attention stack ===================
            for s in range(SELF_PER_CROSS):
                si = li * SELF_PER_CROSS + s
                svec = sa_vec_ref[si]                # (6, LATENT_DIM)
                xn = _ln(x2, svec[0:1, :], svec[1:2, :])
                qkv = jnp.dot(xn.astype(jnp.bfloat16), sa_wqkv_ref[si],
                              preferred_element_type=jnp.float32)      # (B*NL, 3*INNER_S)
                q3 = qkv[:, :INNER_S].reshape(bsz, NUM_LATENTS, INNER_S)
                k3 = qkv[:, INNER_S:2 * INNER_S].reshape(bsz, NUM_LATENTS, INNER_S)
                v3 = qkv[:, 2 * INNER_S:].reshape(bsz, NUM_LATENTS, INNER_S)
                x2 = x2 + _mha_out(q3, k3, v3, sa_wo_ref[si], svec[2:3, :],
                                   LATENT_HEADS, LATENT_DIM_HEAD)
                x2 = x2 + _ffn(x2, svec[3:4, :], svec[4:5, :],
                               sf_w1_ref[si], sf_b1_ref[si], sf_w2_ref[si],
                               svec[5:6, :])

        # per-block partial sum over latents (class head only needs the mean)
        x3 = x2.reshape(bsz, NUM_LATENTS, LATENT_DIM)
        out_ref[bi] = jnp.sum(x3, axis=1).astype(out_ref.dtype)        # (B, LATENT_DIM)


# =============================================================================
# host-side glue
# =============================================================================
def fourier_positions(t):
    """perceiver-pytorch fourier_encode for input_axis=1 -> (T, 2*bands+1).
    Constant-folded by XLA under jit (shape-only dependence)."""
    pos = jnp.linspace(-1.0, 1.0, t, dtype=jnp.float32)[:, None]        # (T, 1)
    x = pos[..., None]                                                   # (T, 1, 1)
    scales = jnp.linspace(1.0, MAX_FREQ / 2.0, NUM_FREQ_BANDS, dtype=jnp.float32)
    xs = x * scales * jnp.pi                                             # (T, 1, bands)
    enc = jnp.concatenate([jnp.sin(xs), jnp.cos(xs), x], axis=-1)        # (T, 1, 2b+1)
    return enc.reshape(t, -1)


def _shared_spec(arr):
    """Whole array every grid step (shared across blocks)."""
    n = arr.ndim
    return pl.BlockSpec(arr.shape, lambda g, _n=n: (0,) * _n)


def _stacked_spec(arr, lead):
    """Select this grid step's slice along the stacked leading (block) axis."""
    block = (lead,) + arr.shape[1:]
    n = arr.ndim - 1
    return pl.BlockSpec(block, lambda g, _n=n: (g,) + (0,) * _n)


def multi_perceiver_forward(params, x):
    bsz, t, _ = x.shape
    enc = fourier_positions(t)                                    # (T, FOURIER_DIM)

    shared = [x, params["feat_proj_w"], params["feat_proj_b"], enc]
    in_specs = ([_shared_spec(a) for a in shared]
                + [_stacked_spec(params["latents"], BLOCKS_PER_STEP)]
                + [_stacked_spec(params[k], BLOCKS_PER_STEP * DEPTH)
                   for k in CROSS_KEYS]
                + [_stacked_spec(params[k], BLOCKS_PER_STEP * DEPTH * SELF_PER_CROSS)
                   for k in SELF_KEYS])

    grid = (N_BLOCKS // BLOCKS_PER_STEP,)
    semantics = ("parallel",) if BLOCKS_PER_STEP == 1 else ("arbitrary",)

    grid_spec = pltpu.PrefetchScalarGridSpec(
        num_scalar_prefetch=0,
        grid=grid,
        in_specs=in_specs,
        out_specs=pl.BlockSpec((BLOCKS_PER_STEP, bsz, LATENT_DIM),
                               lambda g: (g, 0, 0)),
    )

    # per-block latent sums over the latent axis: (N_BLOCKS, B, LATENT_DIM)
    block_sums = pl.pallas_call(
        perceiver_blocks_kernel,
        out_shape=jax.ShapeDtypeStruct((N_BLOCKS, bsz, LATENT_DIM), jnp.float32),
        grid_spec=grid_spec,
        compiler_params=pltpu.CompilerParams(dimension_semantics=semantics),
    )(x, params["feat_proj_w"], params["feat_proj_b"], enc, params["latents"],
      *[params[k] for k in CROSS_KEYS], *[params[k] for k in SELF_KEYS])

    # class_mode == 'mean': Reduce('b n d -> b d','mean') -> LayerNorm -> Linear.
    # Sub-microsecond math at this size -> plain XLA (no second pallas_call).
    m = jnp.sum(block_sums, axis=0) / float(N_BLOCKS * NUM_LATENTS)   # (B, LATENT_DIM)
    mu = jnp.mean(m, axis=-1, keepdims=True)
    var = jnp.mean((m - mu) ** 2, axis=-1, keepdims=True)
    xn = (m - mu) * jax.lax.rsqrt(var + LN_EPS) * params["head_ln_g"] + params["head_ln_b"]
    logits = jnp.dot(xn, params["head_w"]) + params["head_b"]
    return logits.astype(x.dtype)


# =============================================================================
# deterministic parameter init (synthetic; teacher='none', no checkpoint load)
# weights stored in bf16 (MXU operands); LN gammas/betas + biases packed into
# f32 slabs; everything stacked over blocks/layers for the BlockSpec index_map.
# =============================================================================
def init_params(key):
    keys = iter(jax.random.split(key, 16))
    f32 = jnp.float32

    def w(shape, scale=0.02):
        return (jax.random.normal(next(keys), shape, f32) * scale).astype(jnp.bfloat16)

    def vec_slab(n_layers):
        # rows: [attn ln_g, attn ln_b, attn out bias, ff ln_g, ff ln_b, ff out bias]
        g = jnp.ones((n_layers, 1, LATENT_DIM), f32)
        z = jnp.zeros((n_layers, 1, LATENT_DIM), f32)
        return jnp.concatenate([g, z, z, g, z, z], axis=1)          # (L, 6, LATENT_DIM)

    return {
        "feat_proj_w": w((FEAT_SIZE, IN_CH)),
        "feat_proj_b": jnp.zeros((1, IN_CH), f32),
        "latents": jax.random.normal(next(keys), (N_BLOCKS, NUM_LATENTS, LATENT_DIM), f32),
        # ---- cross attention (stacked over blocks * depth) ----
        "ca_wq":  w((L_CROSS, LATENT_DIM, INNER_C)),                            # bias=False
        "ca_wkv": w((L_CROSS, CTX_DIM, 2 * INNER_C)),                           # bias=False
        "ca_wo":  w((L_CROSS, CROSS_HEADS, CROSS_DIM_HEAD, LATENT_DIM)),        # per-head wo
        "cf_w1":  w((L_CROSS, LATENT_DIM, 2 * HIDDEN)),
        "cf_w2":  w((L_CROSS, HIDDEN, LATENT_DIM)),
        "ca_vec": vec_slab(L_CROSS),                                            # packed vectors
        "ca_lnc": jnp.concatenate([jnp.ones((L_CROSS, 1, CTX_DIM), f32),
                                   jnp.zeros((L_CROSS, 1, CTX_DIM), f32)], axis=1),
        "cf_b1":  jnp.zeros((L_CROSS, 1, 2 * HIDDEN), f32),
        # ---- latent self attention (stacked over blocks * depth * self_per_cross) ----
        "sa_wqkv": w((L_SELF, LATENT_DIM, 3 * INNER_S)),                        # cat(to_q,to_kv)
        "sa_wo":   w((L_SELF, LATENT_HEADS, LATENT_DIM_HEAD, LATENT_DIM)),      # per-head wo
        "sf_w1":   w((L_SELF, LATENT_DIM, 2 * HIDDEN)),
        "sf_w2":   w((L_SELF, HIDDEN, LATENT_DIM)),
        "sa_vec":  vec_slab(L_SELF),
        "sf_b1":   jnp.zeros((L_SELF, 1, 2 * HIDDEN), f32),
        # ---- classification head (class_mode == 'mean', runs in XLA) ----
        "head_ln_g": jnp.ones((1, LATENT_DIM), f32),
        "head_ln_b": jnp.zeros((1, LATENT_DIM), f32),
        "head_w": jax.random.normal(next(keys), (LATENT_DIM, NUM_LABELS), f32) * 0.02,
        "head_b": jnp.zeros((1, NUM_LABELS), f32),
    }


if __name__ == "__main__":
    x = jax.random.normal(jax.random.PRNGKey(0), (B, T, FEAT_SIZE), jnp.float32)
    params = init_params(jax.random.PRNGKey(42))

    logits = jax.jit(multi_perceiver_forward)(params, x)
    logits = jax.block_until_ready(logits)

    assert logits.shape == (B, NUM_LABELS), logits.shape
    assert bool(jnp.all(jnp.isfinite(logits)))
    print("KERNEL_OK")
</pallas_src>

<mosaic_0001>
module attributes {stable_mosaic.version = 11 : i64} {
  func.func @perceiver_blocks_kernel(%arg0: i32, %arg1: memref<2x8x24xf32, #tpu.memory_space<vmem>>, %arg2: memref<24x32xbf16, #tpu.memory_space<vmem>>, %arg3: memref<1x32xf32, #tpu.memory_space<vmem>>, %arg4: memref<8x9xf32, #tpu.memory_space<vmem>>, %arg5: memref<2x16x32xf32, #tpu.memory_space<vmem>>, %arg6: memref<2x32x16xbf16, #tpu.memory_space<vmem>>, %arg7: memref<2x41x32xbf16, #tpu.memory_space<vmem>>, %arg8: memref<2x1x16x32xbf16, #tpu.memory_space<vmem>>, %arg9: memref<2x32x256xbf16, #tpu.memory_space<vmem>>, %arg10: memref<2x128x32xbf16, #tpu.memory_space<vmem>>, %arg11: memref<2x6x32xf32, #tpu.memory_space<vmem>>, %arg12: memref<2x2x41xf32, #tpu.memory_space<vmem>>, %arg13: memref<2x1x256xf32, #tpu.memory_space<vmem>>, %arg14: memref<2x32x96xbf16, #tpu.memory_space<vmem>>, %arg15: memref<2x4x8x32xbf16, #tpu.memory_space<vmem>>, %arg16: memref<2x32x256xbf16, #tpu.memory_space<vmem>>, %arg17: memref<2x128x32xbf16, #tpu.memory_space<vmem>>, %arg18: memref<2x6x32xf32, #tpu.memory_space<vmem>>, %arg19: memref<2x1x256xf32, #tpu.memory_space<vmem>>, %arg20: memref<2x2x32xf32, #tpu.memory_space<vmem>>) attributes {dimension_semantics = [#tpu.dimension_semantics<arbitrary>], iteration_bounds = array<i64: 1>, scalar_prefetch = 0 : i64, scratch_operands = 0 : i64, tpu.core_type = #tpu.core_type<tc>, window_params = [{pipeline_mode = #tpu.pipeline_mode<synchronous>, transform_indices = @transform_0, window_bounds = array<i64: 2, 8, 24>}, {pipeline_mode = #tpu.pipeline_mode<synchronous>, transform_indices = @transform_1, window_bounds = array<i64: 24, 32>}, {pipeline_mode = #tpu.pipeline_mode<synchronous>, transform_indices = @transform_2, window_bounds = array<i64: 1, 32>}, {pipeline_mode = #tpu.pipeline_mode<synchronous>, transform_indices = @transform_3, window_bounds = array<i64: 8, 9>}, {transform_indices = @transform_4, window_bounds = array<i64: 2, 16, 32>}, {transform_indices = @transform_5, window_bounds = array<i64: 2, 32, 16>}, {transform_indices = @transform_6, window_bounds = array<i64: 2, 41, 32>}, {transform_indices = @transform_7, window_bounds = array<i64: 2, 1, 16, 32>}, {transform_indices = @transform_8, window_bounds = array<i64: 2, 32, 256>}, {transform_indices = @transform_9, window_bounds = array<i64: 2, 128, 32>}, {transform_indices = @transform_10, window_bounds = array<i64: 2, 6, 32>}, {transform_indices = @transform_11, window_bounds = array<i64: 2, 2, 41>}, {transform_indices = @transform_12, window_bounds = array<i64: 2, 1, 256>}, {transform_indices = @transform_13, window_bounds = array<i64: 2, 32, 96>}, {transform_indices = @transform_14, window_bounds = array<i64: 2, 4, 8, 32>}, {transform_indices = @transform_15, window_bounds = array<i64: 2, 32, 256>}, {transform_indices = @transform_16, window_bounds = array<i64: 2, 128, 32>}, {transform_indices = @transform_17, window_bounds = array<i64: 2, 6, 32>}, {transform_indices = @transform_18, window_bounds = array<i64: 2, 1, 256>}, {transform_indices = @transform_19, window_bounds = array<i64: 2, 2, 32>}]} {
    %c0 = arith.constant 0 : index
    %c0_0 = arith.constant 0 : index
    %c0_1 = arith.constant 0 : index
    %0 = vector.load %arg1[%c0, %c0_0, %c0_1] : memref<2x8x24xf32, #tpu.memory_space<vmem>>, vector<2x8x24xf32>
    %1 = arith.truncf %0 : vector<2x8x24xf32> to vector<2x8x24xbf16>
    %2 = vector.shape_cast %1 : vector<2x8x24xbf16> to vector<16x24xbf16>
    %c0_2 = arith.constant 0 : index
    %c0_3 = arith.constant 0 : index
    %3 = vector.load %arg2[%c0_2, %c0_3] : memref<24x32xbf16, #tpu.memory_space<vmem>>, vector<24x32xbf16>
    %cst = arith.constant dense<0.000000e+00> : vector<16x32xf32>
    %4 = tpu.matmul %2, %3, %cst {dimension_numbers = #tpu.dot_dimension_numbers<[1], [0], [0], [1], [0, 0, 1, 1], [], []>} : vector<16x24xbf16>, vector<24x32xbf16>, vector<16x32xf32> -> vector<16x32xf32>
    %c0_4 = arith.constant 0 : index
    %c0_5 = arith.constant 0 : index
    %5 = vector.load %arg3[%c0_4, %c0_5] : memref<1x32xf32, #tpu.memory_space<vmem>>, vector<1x32xf32>
    %6 = vector.broadcast %5 : vector<1x32xf32> to vector<16x32xf32>
    %7 = arith.addf %4, %6 : vector<16x32xf32>
    %c0_6 = arith.constant 0 : index
    %c0_7 = arith.constant 0 : index
    %8 = vector.load %arg4[%c0_6, %c0_7] : memref<8x9xf32, #tpu.memory_space<vmem>>, vector<8x9xf32>
    %9 = vector.shape_cast %8 : vector<8x9xf32> to vector<1x8x9xf32>
    %10 = vector.broadcast %9 : vector<1x8x9xf32> to vector<2x8x9xf32>
    %11 = vector.shape_cast %10 : vector<2x8x9xf32> to vector<16x9xf32>
    %cst_8 = arith.constant dense<0.000000e+00> : vector<16xf32>
    %12 = vector.multi_reduction <add>, %7, %cst_8 [1] : vector<16x32xf32> to vector<16xf32>
    %13 = vector.shape_cast %12 : vector<16xf32> to vector<16x1xf32>
    %cst_9 = arith.constant dense<0.000000e+00> : vector<16xf32>
    %14 = vector.multi_reduction <add>, %11, %cst_9 [1] : vector<16x9xf32> to vector<16xf32>
    %15 = vector.shape_cast %14 : vector<16xf32> to vector<16x1xf32>
    %16 = arith.addf %13, %15 : vector<16x1xf32>
    %cst_10 = arith.constant 4.100000e+01 : f32
    %17 = vector.broadcast %cst_10 : f32 to vector<16x1xf32>
    %18 = arith.divf %16, %17 : vector<16x1xf32>
    %19 = vector.broadcast %18 : vector<16x1xf32> to vector<16x32xf32>
    %20 = arith.subf %7, %19 : vector<16x32xf32>
    %21 = arith.mulf %20, %20 : vector<16x32xf32>
    %cst_11 = arith.constant dense<0.000000e+00> : vector<16xf32>
    %22 = vector.multi_reduction <add>, %21, %cst_11 [1] : vector<16x32xf32> to vector<16xf32>
    %23 = vector.shape_cast %22 : vector<16xf32> to vector<16x1xf32>
    %24 = vector.broadcast %18 : vector<16x1xf32> to vector<16x9xf32>
    %25 = arith.subf %11, %24 : vector<16x9xf32>
    %26 = arith.mulf %25, %25 : vector<16x9xf32>
    %cst_12 = arith.constant dense<0.000000e+00> : vector<16xf32>
    %27 = vector.multi_reduction <add>, %26, %cst_12 [1] : vector<16x9xf32> to vector<16xf32>
    %28 = vector.shape_cast %27 : vector<16xf32> to vector<16x1xf32>
    %29 = arith.addf %23, %28 : vector<16x1xf32>
    %cst_13 = arith.constant 4.100000e+01 : f32
    %30 = vector.broadcast %cst_13 : f32 to vector<16x1xf32>
    %31 = arith.divf %29, %30 : vector<16x1xf32>
    %cst_14 = arith.constant 9.99999974E-6 : f32
    %32 = vector.broadcast %cst_14 : f32 to vector<16x1xf32>
    %33 = arith.addf %31, %32 : vector<16x1xf32>
    %34 = math.rsqrt %33 : vector<16x1xf32>
    %35 = vector.broadcast %18 : vector<16x1xf32> to vector<16x32xf32>
    %36 = arith.subf %7, %35 : vector<16x32xf32>
    %37 = vector.broadcast %34 : vector<16x1xf32> to vector<16x32xf32>
    %38 = arith.mulf %36, %37 : vector<16x32xf32>
    %39 = vector.broadcast %18 : vector<16x1xf32> to vector<16x9xf32>
    %40 = arith.subf %11, %39 : vector<16x9xf32>
    %41 = vector.broadcast %34 : vector<16x1xf32> to vector<16x9xf32>
    %42 = arith.mulf %40, %41 : vector<16x9xf32>
    %c0_15 = arith.constant 0 : index
    %c0_16 = arith.constant 0 : index
    %c0_17 = arith.constant 0 : index
    %43 = vector.load %arg5[%c0_15, %c0_16, %c0_17] : memref<2x16x32xf32, #tpu.memory_space<vmem>>, vector<1x16x32xf32>
    %44 = vector.shape_cast %43 : vector<1x16x32xf32> to vector<16x32xf32>
    %45 = vector.shape_cast %44 : vector<16x32xf32> to vector<1x16x32xf32>
    %46 = vector.broadcast %45 : vector<1x16x32xf32> to vector<2x16x32xf32>
    %47 = vector.shape_cast %46 : vector<2x16x32xf32> to vector<32x32xf32>
    %c0_18 = arith.constant 0 : index
    %c0_19 = arith.constant 0 : index
    %c0_20 = arith.constant 0 : index
    %48 = vector.load %arg11[%c0_18, %c0_19, %c0_20] : memref<2x6x32xf32, #tpu.memory_space<vmem>>, vector<1x6x32xf32>
    %49 = vector.shape_cast %48 : vector<1x6x32xf32> to vector<6x32xf32>
    %c0_21 = arith.constant 0 : index
    %c0_22 = arith.constant 0 : index
    %c0_23 = arith.constant 0 : index
    %50 = vector.load %arg12[%c0_21, %c0_22, %c0_23] : memref<2x2x41xf32, #tpu.memory_space<vmem>>, vector<1x2x41xf32>
    %51 = vector.shape_cast %50 : vector<1x2x41xf32> to vector<2x41xf32>
    %52 = vector.extract_strided_slice %49 {offsets = [0, 0], sizes = [1, 32], strides = [1, 1]} : vector<6x32xf32> to vector<1x32xf32>
    %53 = vector.extract_strided_slice %49 {offsets = [1, 0], sizes = [1, 32], strides = [1, 1]} : vector<6x32xf32> to vector<1x32xf32>
    %cst_24 = arith.constant dense<0.000000e+00> : vector<32xf32>
    %54 = vector.multi_reduction <add>, %47, %cst_24 [1] : vector<32x32xf32> to vector<32xf32>
    %55 = vector.shape_cast %54 : vector<32xf32> to vector<32x1xf32>
    %cst_25 = arith.constant 3.200000e+01 : f32
    %56 = vector.broadcast %cst_25 : f32 to vector<32x1xf32>
    %57 = arith.divf %55, %56 : vector<32x1xf32>
    %58 = vector.broadcast %57 : vector<32x1xf32> to vector<32x32xf32>
    %59 = arith.subf %47, %58 : vector<32x32xf32>
    %60 = arith.mulf %59, %59 : vector<32x32xf32>
    %cst_26 = arith.constant dense<0.000000e+00> : vector<32xf32>
    %61 = vector.multi_reduction <add>, %60, %cst_26 [1] : vector<32x32xf32> to vector<32xf32>
    %62 = vector.shape_cast %61 : vector<32xf32> to vector<32x1xf32>
    %cst_27 = arith.constant 3.200000e+01 : f32
    %63 = vector.broadcast %cst_27 : f32 to vector<32x1xf32>
    %64 = arith.divf %62, %63 : vector<32x1xf32>
    %65 = vector.broadcast %57 : vector<32x1xf32> to vector<32x32xf32>
    %66 = arith.subf %47, %65 : vector<32x32xf32>
    %cst_28 = arith.constant 9.99999974E-6 : f32
    %67 = vector.broadcast %cst_28 : f32 to vector<32x1xf32>
    %68 = arith.addf %64, %67 : vector<32x1xf32>
    %69 = math.rsqrt %68 : vector<32x1xf32>
    %70 = vector.broadcast %69 : vector<32x1xf32> to vector<32x32xf32>
    %71 = arith.mulf %66, %70 : vector<32x32xf32>
    %72 = vector.broadcast %52 : vector<1x32xf32> to vector<32x32xf32>
    %73 = arith.mulf %71, %72 : vector<32x32xf32>
    %74 = vector.broadcast %53 : vector<1x32xf32> to vector<32x32xf32>
    %75 = arith.addf %73, %74 : vector<32x32xf32>
    %76 = vector.extract_strided_slice %51 {offsets = [0, 0], sizes = [1, 32], strides = [1, 1]} : vector<2x41xf32> to vector<1x32xf32>
    %77 = vector.broadcast %76 : vector<1x32xf32> to vector<16x32xf32>
    %78 = arith.mulf %38, %77 : vector<16x32xf32>
    %79 = vector.extract_strided_slice %51 {offsets = [1, 0], sizes = [1, 32], strides = [1, 1]} : vector<2x41xf32> to vector<1x32xf32>
    %80 = vector.broadcast %79 : vector<1x32xf32> to vector<16x32xf32>
    %81 = arith.addf %78, %80 : vector<16x32xf32>
    %82 = vector.extract_strided_slice %51 {offsets = [0, 32], sizes = [1, 9], strides = [1, 1]} : vector<2x41xf32> to vector<1x9xf32>
    %83 = vector.broadcast %82 : vector<1x9xf32> to vector<16x9xf32>
    %84 = arith.mulf %42, %83 : vector<16x9xf32>
    %85 = vector.extract_strided_slice %51 {offsets = [1, 32], sizes = [1, 9], strides = [1, 1]} : vector<2x41xf32> to vector<1x9xf32>
    %86 = vector.broadcast %85 : vector<1x9xf32> to vector<16x9xf32>
    %87 = arith.addf %84, %86 : vector<16x9xf32>
    %88 = arith.truncf %75 : vector<32x32xf32> to vector<32x32xbf16>
    %c0_29 = arith.constant 0 : index
    %c0_30 = arith.constant 0 : index
    %c0_31 = arith.constant 0 : index
    %89 = vector.load %arg6[%c0_29, %c0_30, %c0_31] : memref<2x32x16xbf16, #tpu.memory_space<vmem>>, vector<1x32x16xbf16>
    %90 = vector.shape_cast %89 : vector<1x32x16xbf16> to vector<32x16xbf16>
    %cst_32 = arith.constant dense<0.000000e+00> : vector<32x16xf32>
    %91 = tpu.matmul %88, %90, %cst_32 {dimension_numbers = #tpu.dot_dimension_numbers<[1], [0], [0], [1], [0, 0, 1, 1], [], []>} : vector<32x32xbf16>, vector<32x16xbf16>, vector<32x16xf32> -> vector<32x16xf32>
    %c0_33 = arith.constant 0 : index
    %c0_34 = arith.constant 0 : index
    %c0_35 = arith.constant 0 : index
    %92 = vector.load %arg7[%c0_33, %c0_34, %c0_35] : memref<2x41x32xbf16, #tpu.memory_space<vmem>>, vector<1x41x32xbf16>
    %93 = vector.shape_cast %92 : vector<1x41x32xbf16> to vector<41x32xbf16>
    %94 = arith.truncf %81 : vector<16x32xf32> to vector<16x32xbf16>
    %95 = vector.extract_strided_slice %93 {offsets = [0, 0], sizes = [32, 32], strides = [1, 1]} : vector<41x32xbf16> to vector<32x32xbf16>
    %cst_36 = arith.constant dense<0.000000e+00> : vector<16x32xf32>
    %96 = tpu.matmul %94, %95, %cst_36 {dimension_numbers = #tpu.dot_dimension_numbers<[1], [0], [0], [1], [0, 0, 1, 1], [], []>} : vector<16x32xbf16>, vector<32x32xbf16>, vector<16x32xf32> -> vector<16x32xf32>
    %97 = arith.truncf %87 : vector<16x9xf32> to vector<16x9xbf16>
    %98 = vector.extract_strided_slice %93 {offsets = [32, 0], sizes = [9, 32], strides = [1, 1]} : vector<41x32xbf16> to vector<9x32xbf16>
    %cst_37 = arith.constant dense<0.000000e+00> : vector<16x32xf32>
    %99 = tpu.matmul %97, %98, %cst_37 {dimension_numbers = #tpu.dot_dimension_numbers<[1], [0], [0], [1], [0, 0, 1, 1], [], []>} : vector<16x9xbf16>, vector<9x32xbf16>, vector<16x32xf32> -> vector<16x32xf32>
    %100 = arith.addf %96, %99 : vector<16x32xf32>
    %101 = vector.shape_cast %91 : vector<32x16xf32> to vector<2x16x16xf32>
    %102 = vector.shape_cast %100 : vector<16x32xf32> to vector<2x8x32xf32>
    %103 = vector.extract_strided_slice %102 {offsets = [0, 0, 0], sizes = [2, 8, 16], strides = [1, 1, 1]} : vector<2x8x32xf32> to vector<2x8x16xf32>
    %104 = vector.extract_strided_slice %102 {offsets = [0, 0, 16], sizes = [2, 8, 16], strides = [1, 1, 1]} : vector<2x8x32xf32> to vector<2x8x16xf32>
    %c0_38 = arith.constant 0 : index
    %c0_39 = arith.constant 0 : index
    %c0_40 = arith.constant 0 : index
    %c0_41 = arith.constant 0 : index
    %105 = vector.load %arg8[%c0_38, %c0_39, %c0_40, %c0_41] : memref<2x1x16x32xbf16, #tpu.memory_space<vmem>>, vector<1x1x16x32xbf16>
    %106 = vector.shape_cast %105 : vector<1x1x16x32xbf16> to vector<1x16x32xbf16>
    %107 = vector.extract_strided_slice %49 {offsets = [2, 0], sizes = [1, 32], strides = [1, 1]} : vector<6x32xf32> to vector<1x32xf32>
    "tpu.trace_start"() <{level = 10 : i32, message = "bnd,bmd->bnm"}> : () -> ()
    %cst_42 = arith.constant dense<0.000000e+00> : vector<2x16x8xf32>
    %108 = tpu.matmul %101, %103, %cst_42 {dimension_numbers = #tpu.dot_dimension_numbers<[2], [2], [1], [1], [0, 0, 0, 1, 1, 1], [0], [0]>} : vector<2x16x16xf32>, vector<2x8x16xf32>, vector<2x16x8xf32> -> vector<2x16x8xf32>
    "tpu.trace_stop"() : () -> ()
    %cst_43 = arith.constant 2.500000e-01 : f32
    %109 = vector.broadcast %cst_43 : f32 to vector<2x16x8xf32>
    %110 = arith.mulf %108, %109 : vector<2x16x8xf32>
    %cst_44 = arith.constant dense<0xFF800000> : vector<2x16xf32>
    %111 = vector.multi_reduction <maximumf>, %110, %cst_44 [2] : vector<2x16x8xf32> to vector<2x16xf32>
    %112 = vector.shape_cast %111 : vector<2x16xf32> to vector<2x16x1xf32>
    %113 = vector.broadcast %112 : vector<2x16x1xf32> to vector<2x16x8xf32>
    %114 = arith.subf %110, %113 : vector<2x16x8xf32>
    %115 = math.exp %114 : vector<2x16x8xf32>
    %cst_45 = arith.constant dense<0.000000e+00> : vector<2x16xf32>
    %116 = vector.multi_reduction <add>, %115, %cst_45 [2] : vector<2x16x8xf32> to vector<2x16xf32>
    %117 = vector.shape_cast %116 : vector<2x16xf32> to vector<2x16x1xf32>
    %118 = tpu.reciprocal %117 {approx = true} : vector<2x16x1xf32> -> vector<2x16x1xf32>
    %119 = vector.broadcast %118 : vector<2x16x1xf32> to vector<2x16x8xf32>
    %120 = arith.mulf %115, %119 : vector<2x16x8xf32>
    "tpu.trace_start"() <{level = 10 : i32, message = "bnm,bmd->bnd"}> : () -> ()
    %cst_46 = arith.constant dense<0.000000e+00> : vector<2x16x16xf32>
    %121 = tpu.matmul %120, %104, %cst_46 {dimension_numbers = #tpu.dot_dimension_numbers<[2], [1], [1], [2], [0, 0, 0, 1, 1, 2], [0], [0]>} : vector<2x16x8xf32>, vector<2x8x16xf32>, vector<2x16x16xf32> -> vector<2x16x16xf32>
    "tpu.trace_stop"() : () -> ()
    %122 = vector.shape_cast %121 : vector<2x16x16xf32> to vector<32x16xf32>
    %123 = arith.truncf %122 : vector<32x16xf32> to vector<32x16xbf16>
    %124 = vector.shape_cast %106 : vector<1x16x32xbf16> to vector<16x32xbf16>
    %cst_47 = arith.constant dense<0.000000e+00> : vector<32x32xf32>
    %125 = tpu.matmul %123, %124, %cst_47 {dimension_numbers = #tpu.dot_dimension_numbers<[1], [0], [0], [1], [0, 0, 1, 1], [], []>} : vector<32x16xbf16>, vector<16x32xbf16>, vector<32x32xf32> -> vector<32x32xf32>
    %126 = vector.broadcast %107 : vector<1x32xf32> to vector<32x32xf32>
    %127 = arith.addf %125, %126 : vector<32x32xf32>
    %128 = arith.addf %47, %127 : vector<32x32xf32>
    %129 = vector.extract_strided_slice %49 {offsets = [3, 0], sizes = [1, 32], strides = [1, 1]} : vector<6x32xf32> to vector<1x32xf32>
    %130 = vector.extract_strided_slice %49 {offsets = [4, 0], sizes = [1, 32], strides = [1, 1]} : vector<6x32xf32> to vector<1x32xf32>
    %c0_48 = arith.constant 0 : index
    %c0_49 = arith.constant 0 : index
    %c0_50 = arith.constant 0 : index
    %131 = vector.load %arg9[%c0_48, %c0_49, %c0_50] : memref<2x32x256xbf16, #tpu.memory_space<vmem>>, vector<1x32x256xbf16>
    %132 = vector.shape_cast %131 : vector<1x32x256xbf16> to vector<32x256xbf16>
    %c0_51 = arith.constant 0 : index
    %c0_52 = arith.constant 0 : index
    %c0_53 = arith.constant 0 : index
    %133 = vector.load %arg13[%c0_51, %c0_52, %c0_53] : memref<2x1x256xf32, #tpu.memory_space<vmem>>, vector<1x1x256xf32>
    %134 = vector.shape_cast %133 : vector<1x1x256xf32> to vector<1x256xf32>
    %c0_54 = arith.constant 0 : index
    %c0_55 = arith.constant 0 : index
    %c0_56 = arith.constant 0 : index
    %135 = vector.load %arg10[%c0_54, %c0_55, %c0_56] : memref<2x128x32xbf16, #tpu.memory_space<vmem>>, vector<1x128x32xbf16>
    %136 = vector.shape_cast %135 : vector<1x128x32xbf16> to vector<128x32xbf16>
    %137 = vector.extract_strided_slice %49 {offsets = [5, 0], sizes = [1, 32], strides = [1, 1]} : vector<6x32xf32> to vector<1x32xf32>
    %cst_57 = arith.constant dense<0.000000e+00> : vector<32xf32>
    %138 = vector.multi_reduction <add>, %128, %cst_57 [1] : vector<32x32xf32> to vector<32xf32>
    %139 = vector.shape_cast %138 : vector<32xf32> to vector<32x1xf32>
    %cst_58 = arith.constant 3.200000e+01 : f32
    %140 = vector.broadcast %cst_58 : f32 to vector<32x1xf32>
    %141 = arith.divf %139, %140 : vector<32x1xf32>
    %142 = vector.broadcast %141 : vector<32x1xf32> to vector<32x32xf32>
    %143 = arith.subf %128, %142 : vector<32x32xf32>
    %144 = arith.mulf %143, %143 : vector<32x32xf32>
    %cst_59 = arith.constant dense<0.000000e+00> : vector<32xf32>
    %145 = vector.multi_reduction <add>, %144, %cst_59 [1] : vector<32x32xf32> to vector<32xf32>
    %146 = vector.shape_cast %145 : vector<32xf32> to vector<32x1xf32>
    %cst_60 = arith.constant 3.200000e+01 : f32
    %147 = vector.broadcast %cst_60 : f32 to vector<32x1xf32>
    %148 = arith.divf %146, %147 : vector<32x1xf32>
    %149 = vector.broadcast %141 : vector<32x1xf32> to vector<32x32xf32>
    %150 = arith.subf %128, %149 : vector<32x32xf32>
    %cst_61 = arith.constant 9.99999974E-6 : f32
    %151 = vector.broadcast %cst_61 : f32 to vector<32x1xf32>
    %152 = arith.addf %148, %151 : vector<32x1xf32>
    %153 = math.rsqrt %152 : vector<32x1xf32>
    %154 = vector.broadcast %153 : vector<32x1xf32> to vector<32x32xf32>
    %155 = arith.mulf %150, %154 : vector<32x32xf32>
    %156 = vector.broadcast %129 : vector<1x32xf32> to vector<32x32xf32>
    %157 = arith.mulf %155, %156 : vector<32x32xf32>
    %158 = vector.broadcast %130 : vector<1x32xf32> to vector<32x32xf32>
    %159 = arith.addf %157, %158 : vector<32x32xf32>
    %160 = arith.truncf %159 : vector<32x32xf32> to vector<32x32xbf16>
    %cst_62 = arith.constant dense<0.000000e+00> : vector<32x256xf32>
    %161 = tpu.matmul %160, %132, %cst_62 {dimension_numbers = #tpu.dot_dimension_numbers<[1], [0], [0], [1], [0, 0, 1, 1], [], []>} : vector<32x32xbf16>, vector<32x256xbf16>, vector<32x256xf32> -> vector<32x256xf32>
    %162 = vector.broadcast %134 : vector<1x256xf32> to vector<32x256xf32>
    %163 = arith.addf %161, %162 : vector<32x256xf32>
    %164 = vector.extract_strided_slice %163 {offsets = [0, 0], sizes = [32, 128], strides = [1, 1]} : vector<32x256xf32> to vector<32x128xf32>
    %165 = vector.extract_strided_slice %163 {offsets = [0, 128], sizes = [32, 128], strides = [1, 1]} : vector<32x256xf32> to vector<32x128xf32>
    %166 = arith.mulf %165, %165 : vector<32x128xf32>
    %167 = arith.mulf %165, %166 : vector<32x128xf32>
    %cst_63 = arith.constant 4.471500e-02 : f32
    %168 = vector.broadcast %cst_63 : f32 to vector<32x128xf32>
    %169 = arith.mulf %168, %167 : vector<32x128xf32>
    %170 = arith.addf %165, %169 : vector<32x128xf32>
    %cst_64 = arith.constant 0.797884583 : f32
    %171 = vector.broadcast %cst_64 : f32 to vector<32x128xf32>
    %172 = arith.mulf %171, %170 : vector<32x128xf32>
    %173 = math.tanh %172 : vector<32x128xf32>
    %cst_65 = arith.constant 1.000000e+00 : f32
    %174 = vector.broadcast %cst_65 : f32 to vector<32x128xf32>
    %175 = arith.addf %174, %173 : vector<32x128xf32>
    %cst_66 = arith.constant 5.000000e-01 : f32
    %176 = vector.broadcast %cst_66 : f32 to vector<32x128xf32>
    %177 = arith.mulf %176, %175 : vector<32x128xf32>
    %178 = arith.mulf %165, %177 : vector<32x128xf32>
    %179 = arith.mulf %164, %178 : vector<32x128xf32>
    %180 = arith.truncf %179 : vector<32x128xf32> to vector<32x128xbf16>
    %cst_67 = arith.constant dense<0.000000e+00> : vector<32x32xf32>
    %181 = tpu.matmul %180, %136, %cst_67 {dimension_numbers = #tpu.dot_dimension_numbers<[1], [0], [0], [1], [0, 0, 1, 1], [], []>} : vector<32x128xbf16>, vector<128x32xbf16>, vector<32x32xf32> -> vector<32x32xf32>
    %182 = vector.broadcast %137 : vector<1x32xf32> to vector<32x32xf32>
    %183 = arith.addf %181, %182 : vector<32x32xf32>
    %184 = arith.addf %128, %183 : vector<32x32xf32>
    %c0_68 = arith.constant 0 : index
    %c0_69 = arith.constant 0 : index
    %c0_70 = arith.constant 0 : index
    %185 = vector.load %arg18[%c0_68, %c0_69, %c0_70] : memref<2x6x32xf32, #tpu.memory_space<vmem>>, vector<1x6x32xf32>
    %186 = vector.shape_cast %185 : vector<1x6x32xf32> to vector<6x32xf32>
    %187 = vector.extract_strided_slice %186 {offsets = [0, 0], sizes = [1, 32], strides = [1, 1]} : vector<6x32xf32> to vector<1x32xf32>
    %188 = vector.extract_strided_slice %186 {offsets = [1, 0], sizes = [1, 32], strides = [1, 1]} : vector<6x32xf32> to vector<1x32xf32>
    %cst_71 = arith.constant dense<0.000000e+00> : vector<32xf32>
    %189 = vector.multi_reduction <add>, %184, %cst_71 [1] : vector<32x32xf32> to vector<32xf32>
    %190 = vector.shape_cast %189 : vector<32xf32> to vector<32x1xf32>
    %cst_72 = arith.constant 3.200000e+01 : f32
    %191 = vector.broadcast %cst_72 : f32 to vector<32x1xf32>
    %192 = arith.divf %190, %191 : vector<32x1xf32>
    %193 = vector.broadcast %192 : vector<32x1xf32> to vector<32x32xf32>
    %194 = arith.subf %184, %193 : vector<32x32xf32>
    %195 = arith.mulf %194, %194 : vector<32x32xf32>
    %cst_73 = arith.constant dense<0.000000e+00> : vector<32xf32>
    %196 = vector.multi_reduction <add>, %195, %cst_73 [1] : vector<32x32xf32> to vector<32xf32>
    %197 = vector.shape_cast %196 : vector<32xf32> to vector<32x1xf32>
    %cst_74 = arith.constant 3.200000e+01 : f32
    %198 = vector.broadcast %cst_74 : f32 to vector<32x1xf32>
    %199 = arith.divf %197, %198 : vector<32x1xf32>
    %200 = vector.broadcast %192 : vector<32x1xf32> to vector<32x32xf32>
    %201 = arith.subf %184, %200 : vector<32x32xf32>
    %cst_75 = arith.constant 9.99999974E-6 : f32
    %202 = vector.broadcast %cst_75 : f32 to vector<32x1xf32>
    %203 = arith.addf %199, %202 : vector<32x1xf32>
    %204 = math.rsqrt %203 : vector<32x1xf32>
    %205 = vector.broadcast %204 : vector<32x1xf32> to vector<32x32xf32>
    %206 = arith.mulf %201, %205 : vector<32x32xf32>
    %207 = vector.broadcast %187 : vector<1x32xf32> to vector<32x32xf32>
    %208 = arith.mulf %206, %207 : vector<32x32xf32>
    %209 = vector.broadcast %188 : vector<1x32xf32> to vector<32x32xf32>
    %210 = arith.addf %208, %209 : vector<32x32xf32>
    %211 = arith.truncf %210 : vector<32x32xf32> to vector<32x32xbf16>
    %c0_76 = arith.constant 0 : index
    %c0_77 = arith.constant 0 : index
    %c0_78 = arith.constant 0 : index
    %212 = vector.load %arg14[%c0_76, %c0_77, %c0_78] : memref<2x32x96xbf16, #tpu.memory_space<vmem>>, vector<1x32x96xbf16>
    %213 = vector.shape_cast %212 : vector<1x32x96xbf16> to vector<32x96xbf16>
    %cst_79 = arith.constant dense<0.000000e+00> : vector<32x96xf32>
    %214 = tpu.matmul %211, %213, %cst_79 {dimension_numbers = #tpu.dot_dimension_numbers<[1], [0], [0], [1], [0, 0, 1, 1], [], []>} : vector<32x32xbf16>, vector<32x96xbf16>, vector<32x96xf32> -> vector<32x96xf32>
    %215 = vector.extract_strided_slice %214 {offsets = [0, 0], sizes = [32, 32], strides = [1, 1]} : vector<32x96xf32> to vector<32x32xf32>
    %216 = vector.shape_cast %215 : vector<32x32xf32> to vector<2x16x32xf32>
    %217 = vector.extract_strided_slice %214 {offsets = [0, 32], sizes = [32, 32], strides = [1, 1]} : vector<32x96xf32> to vector<32x32xf32>
    %218 = vector.shape_cast %217 : vector<32x32xf32> to vector<2x16x32xf32>
    %219 = vector.extract_strided_slice %214 {offsets = [0, 64], sizes = [32, 32], strides = [1, 1]} : vector<32x96xf32> to vector<32x32xf32>
    %220 = vector.shape_cast %219 : vector<32x32xf32> to vector<2x16x32xf32>
    %c0_80 = arith.constant 0 : index
    %c0_81 = arith.constant 0 : index
    %c0_82 = arith.constant 0 : index
    %c0_83 = arith.constant 0 : index
    %221 = vector.load %arg15[%c0_80, %c0_81, %c0_82, %c0_83] : memref<2x4x8x32xbf16, #tpu.memory_space<vmem>>, vector<1x4x8x32xbf16>
    %222 = vector.shape_cast %221 : vector<1x4x8x32xbf16> to vector<4x8x32xbf16>
    %223 = vector.extract_strided_slice %186 {offsets = [2, 0], sizes = [1, 32], strides = [1, 1]} : vector<6x32xf32> to vector<1x32xf32>
    %224 = vector.extract_strided_slice %216 {offsets = [0, 0, 0], sizes = [2, 16, 8], strides = [1, 1, 1]} : vector<2x16x32xf32> to vector<2x16x8xf32>
    %225 = vector.extract_strided_slice %218 {offsets = [0, 0, 0], sizes = [2, 16, 8], strides = [1, 1, 1]} : vector<2x16x32xf32> to vector<2x16x8xf32>
    %226 = vector.extract_strided_slice %220 {offsets = [0, 0, 0], sizes = [2, 16, 8], strides = [1, 1, 1]} : vector<2x16x32xf32> to vector<2x16x8xf32>
    "tpu.trace_start"() <{level = 10 : i32, message = "bnd,bmd->bnm"}> : () -> ()
    %cst_84 = arith.constant dense<0.000000e+00> : vector<2x16x16xf32>
    %227 = tpu.matmul %224, %225, %cst_84 {dimension_numbers = #tpu.dot_dimension_numbers<[2], [2], [1], [1], [0, 0, 0, 1, 1, 1], [0], [0]>} : vector<2x16x8xf32>, vector<2x16x8xf32>, vector<2x16x16xf32> -> vector<2x16x16xf32>
    "tpu.trace_stop"() : () -> ()
    %cst_85 = arith.constant 0.353553385 : f32
    %228 = vector.broadcast %cst_85 : f32 to vector<2x16x16xf32>
    %229 = arith.mulf %227, %228 : vector<2x16x16xf32>
    %cst_86 = arith.constant dense<0xFF800000> : vector<2x16xf32>
    %230 = vector.multi_reduction <maximumf>, %229, %cst_86 [2] : vector<2x16x16xf32> to vector<2x16xf32>
    %231 = vector.shape_cast %230 : vector<2x16xf32> to vector<2x16x1xf32>
    %232 = vector.broadcast %231 : vector<2x16x1xf32> to vector<2x16x16xf32>
    %233 = arith.subf %229, %232 : vector<2x16x16xf32>
    %234 = math.exp %233 : vector<2x16x16xf32>
    %cst_87 = arith.constant dense<0.000000e+00> : vector<2x16xf32>
    %235 = vector.multi_reduction <add>, %234, %cst_87 [2] : vector<2x16x16xf32> to vector<2x16xf32>
    %236 = vector.shape_cast %235 : vector<2x16xf32> to vector<2x16x1xf32>
    %237 = tpu.reciprocal %236 {approx = true} : vector<2x16x1xf32> -> vector<2x16x1xf32>
    %238 = vector.broadcast %237 : vector<2x16x1xf32> to vector<2x16x16xf32>
    %239 = arith.mulf %234, %238 : vector<2x16x16xf32>
    "tpu.trace_start"() <{level = 10 : i32, message = "bnm,bmd->bnd"}> : () -> ()
    %cst_88 = arith.constant dense<0.000000e+00> : vector<2x16x8xf32>
    %240 = tpu.matmul %239, %226, %cst_88 {dimension_numbers = #tpu.dot_dimension_numbers<[2], [1], [1], [2], [0, 0, 0, 1, 1, 2], [0], [0]>} : vector<2x16x16xf32>, vector<2x16x8xf32>, vector<2x16x8xf32> -> vector<2x16x8xf32>
    "tpu.trace_stop"() : () -> ()
    %241 = vector.shape_cast %240 : vector<2x16x8xf32> to vector<32x8xf32>
    %242 = arith.truncf %241 : vector<32x8xf32> to vector<32x8xbf16>
    %243 = vector.extract_strided_slice %222 {offsets = [0, 0, 0], sizes = [1, 8, 32], strides = [1, 1, 1]} : vector<4x8x32xbf16> to vector<1x8x32xbf16>
    %244 = vector.shape_cast %243 : vector<1x8x32xbf16> to vector<8x32xbf16>
    %cst_89 = arith.constant dense<0.000000e+00> : vector<32x32xf32>
    %245 = tpu.matmul %242, %244, %cst_89 {dimension_numbers = #tpu.dot_dimension_numbers<[1], [0], [0], [1], [0, 0, 1, 1], [], []>} : vector<32x8xbf16>, vector<8x32xbf16>, vector<32x32xf32> -> vector<32x32xf32>
    %246 = vector.extract_strided_slice %216 {offsets = [0, 0, 8], sizes = [2, 16, 8], strides = [1, 1, 1]} : vector<2x16x32xf32> to vector<2x16x8xf32>
    %247 = vector.extract_strided_slice %218 {offsets = [0, 0, 8], sizes = [2, 16, 8], strides = [1, 1, 1]} : vector<2x16x32xf32> to vector<2x16x8xf32>
    %248 = vector.extract_strided_slice %220 {offsets = [0, 0, 8], sizes = [2, 16, 8], strides = [1, 1, 1]} : vector<2x16x32xf32> to vector<2x16x8xf32>
    "tpu.trace_start"() <{level = 10 : i32, message = "bnd,bmd->bnm"}> : () -> ()
    %cst_90 = arith.constant dense<0.000000e+00> : vector<2x16x16xf32>
    %249 = tpu.matmul %246, %247, %cst_90 {dimension_numbers = #tpu.dot_dimension_numbers<[2], [2], [1], [1], [0, 0, 0, 1, 1, 1], [0], [0]>} : vector<2x16x8xf32>, vector<2x16x8xf32>, vector<2x16x16xf32> -> vector<2x16x16xf32>
    "tpu.trace_stop"() : () -> ()
    %cst_91 = arith.constant 0.353553385 : f32
    %250 = vector.broadcast %cst_91 : f32 to vector<2x16x16xf32>
    %251 = arith.mulf %249, %250 : vector<2x16x16xf32>
    %cst_92 = arith.constant dense<0xFF800000> : vector<2x16xf32>
    %252 = vector.multi_reduction <maximumf>, %251, %cst_92 [2] : vector<2x16x16xf32> to vector<2x16xf32>
    %253 = vector.shape_cast %252 : vector<2x16xf32> to vector<2x16x1xf32>
    %254 = vector.broadcast %253 : vector<2x16x1xf32> to vector<2x16x16xf32>
    %255 = arith.subf %251, %254 : vector<2x16x16xf32>
    %256 = math.exp %255 : vector<2x16x16xf32>
    %cst_93 = arith.constant dense<0.000000e+00> : vector<2x16xf32>
    %257 = vector.multi_reduction <add>, %256, %cst_93 [2] : vector<2x16x16xf32> to vector<2x16xf32>
    %258 = vector.shape_cast %257 : vector<2x16xf32> to vector<2x16x1xf32>
    %259 = tpu.reciprocal %258 {approx = true} : vector<2x16x1xf32> -> vector<2x16x1xf32>
    %260 = vector.broadcast %259 : vector<2x16x1xf32> to vector<2x16x16xf32>
    %261 = arith.mulf %256, %260 : vector<2x16x16xf32>
    "tpu.trace_start"() <{level = 10 : i32, message = "bnm,bmd->bnd"}> : () -> ()
    %cst_94 = arith.constant dense<0.000000e+00> : vector<2x16x8xf32>
    %262 = tpu.matmul %261, %248, %cst_94 {dimension_numbers = #tpu.dot_dimension_numbers<[2], [1], [1], [2], [0, 0, 0, 1, 1, 2], [0], [0]>} : vector<2x16x16xf32>, vector<2x16x8xf32>, vector<2x16x8xf32> -> vector<2x16x8xf32>
    "tpu.trace_stop"() : () -> ()
    %263 = vector.shape_cast %262 : vector<2x16x8xf32> to vector<32x8xf32>
    %264 = arith.truncf %263 : vector<32x8xf32> to vector<32x8xbf16>
    %265 = vector.extract_strided_slice %222 {offsets = [1, 0, 0], sizes = [1, 8, 32], strides = [1, 1, 1]} : vector<4x8x32xbf16> to vector<1x8x32xbf16>
    %266 = vector.shape_cast %265 : vector<1x8x32xbf16> to vector<8x32xbf16>
    %cst_95 = arith.constant dense<0.000000e+00> : vector<32x32xf32>
    %267 = tpu.matmul %264, %266, %cst_95 {dimension_numbers = #tpu.dot_dimension_numbers<[1], [0], [0], [1], [0, 0, 1, 1], [], []>} : vector<32x8xbf16>, vector<8x32xbf16>, vector<32x32xf32> -> vector<32x32xf32>
    %268 = arith.addf %245, %267 : vector<32x32xf32>
    %269 = vector.extract_strided_slice %216 {offsets = [0, 0, 16], sizes = [2, 16, 8], strides = [1, 1, 1]} : vector<2x16x32xf32> to vector<2x16x8xf32>
    %270 = vector.extract_strided_slice %218 {offsets = [0, 0, 16], sizes = [2, 16, 8], strides = [1, 1, 1]} : vector<2x16x32xf32> to vector<2x16x8xf32>
    %271 = vector.extract_strided_slice %220 {offsets = [0, 0, 16], sizes = [2, 16, 8], strides = [1, 1, 1]} : vector<2x16x32xf32> to vector<2x16x8xf32>
    "tpu.trace_start"() <{level = 10 : i32, message = "bnd,bmd->bnm"}> : () -> ()
    %cst_96 = arith.constant dense<0.000000e+00> : vector<2x16x16xf32>
    %272 = tpu.matmul %269, %270, %cst_96 {dimension_numbers = #tpu.dot_dimension_numbers<[2], [2], [1], [1], [0, 0, 0, 1, 1, 1], [0], [0]>} : vector<2x16x8xf32>, vector<2x16x8xf32>, vector<2x16x16xf32> -> vector<2x16x16xf32>
    "tpu.trace_stop"() : () -> ()
    %cst_97 = arith.constant 0.353553385 : f32
    %273 = vector.broadcast %cst_97 : f32 to vector<2x16x16xf32>
    %274 = arith.mulf %272, %273 : vector<2x16x16xf32>
    %cst_98 = arith.constant dense<0xFF800000> : vector<2x16xf32>
    %275 = vector.multi_reduction <maximumf>, %274, %cst_98 [2] : vector<2x16x16xf32> to vector<2x16xf32>
    %276 = vector.shape_cast %275 : vector<2x16xf32> to vector<2x16x1xf32>
    %277 = vector.broadcast %276 : vector<2x16x1xf32> to vector<2x16x16xf32>
    %278 = arith.subf %274, %277 : vector<2x16x16xf32>
    %279 = math.exp %278 : vector<2x16x16xf32>
    %cst_99 = arith.constant dense<0.000000e+00> : vector<2x16xf32>
    %280 = vector.multi_reduction <add>, %279, %cst_99 [2] : vector<2x16x16xf32> to vector<2x16xf32>
    %281 = vector.shape_cast %280 : vector<2x16xf32> to vector<2x16x1xf32>
    %282 = tpu.reciprocal %281 {approx = true} : vector<2x16x1xf32> -> vector<2x16x1xf32>
    %283 = vector.broadcast %282 : vector<2x16x1xf32> to vector<2x16x16xf32>
    %284 = arith.mulf %279, %283 : vector<2x16x16xf32>
    "tpu.trace_start"() <{level = 10 : i32, message = "bnm,bmd->bnd"}> : () -> ()
    %cst_100 = arith.constant dense<0.000000e+00> : vector<2x16x8xf32>
    %285 = tpu.matmul %284, %271, %cst_100 {dimension_numbers = #tpu.dot_dimension_numbers<[2], [1], [1], [2], [0, 0, 0, 1, 1, 2], [0], [0]>} : vector<2x16x16xf32>, vector<2x16x8xf32>, vector<2x16x8xf32> -> vector<2x16x8xf32>
    "tpu.trace_stop"() : () -> ()
    %286 = vector.shape_cast %285 : vector<2x16x8xf32> to vector<32x8xf32>
    %287 = arith.truncf %286 : vector<32x8xf32> to vector<32x8xbf16>
    %288 = vector.extract_strided_slice %222 {offsets = [2, 0, 0], sizes = [1, 8, 32], strides = [1, 1, 1]} : vector<4x8x32xbf16> to vector<1x8x32xbf16>
    %289 = vector.shape_cast %288 : vector<1x8x32xbf16> to vector<8x32xbf16>
    %cst_101 = arith.constant dense<0.000000e+00> : vector<32x32xf32>
    %290 = tpu.matmul %287, %289, %cst_101 {dimension_numbers = #tpu.dot_dimension_numbers<[1], [0], [0], [1], [0, 0, 1, 1], [], []>} : vector<32x8xbf16>, vector<8x32xbf16>, vector<32x32xf32> -> vector<32x32xf32>
    %291 = arith.addf %268, %290 : vector<32x32xf32>
    %292 = vector.extract_strided_slice %216 {offsets = [0, 0, 24], sizes = [2, 16, 8], strides = [1, 1, 1]} : vector<2x16x32xf32> to vector<2x16x8xf32>
    %293 = vector.extract_strided_slice %218 {offsets = [0, 0, 24], sizes = [2, 16, 8], strides = [1, 1, 1]} : vector<2x16x32xf32> to vector<2x16x8xf32>
    %294 = vector.extract_strided_slice %220 {offsets = [0, 0, 24], sizes = [2, 16, 8], strides = [1, 1, 1]} : vector<2x16x32xf32> to vector<2x16x8xf32>
    "tpu.trace_start"() <{level = 10 : i32, message = "bnd,bmd->bnm"}> : () -> ()
    %cst_102 = arith.constant dense<0.000000e+00> : vector<2x16x16xf32>
    %295 = tpu.matmul %292, %293, %cst_102 {dimension_numbers = #tpu.dot_dimension_numbers<[2], [2], [1], [1], [0, 0, 0, 1, 1, 1], [0], [0]>} : vector<2x16x8xf32>, vector<2x16x8xf32>, vector<2x16x16xf32> -> vector<2x16x16xf32>
    "tpu.trace_stop"() : () -> ()
    %cst_103 = arith.constant 0.353553385 : f32
    %296 = vector.broadcast %cst_103 : f32 to vector<2x16x16xf32>
    %297 = arith.mulf %295, %296 : vector<2x16x16xf32>
    %cst_104 = arith.constant dense<0xFF800000> : vector<2x16xf32>
    %298 = vector.multi_reduction <maximumf>, %297, %cst_104 [2] : vector<2x16x16xf32> to vector<2x16xf32>
    %299 = vector.shape_cast %298 : vector<2x16xf32> to vector<2x16x1xf32>
    %300 = vector.broadcast %299 : vector<2x16x1xf32> to vector<2x16x16xf32>
    %301 = arith.subf %297, %300 : vector<2x16x16xf32>
    %302 = math.exp %301 : vector<2x16x16xf32>
    %cst_105 = arith.constant dense<0.000000e+00> : vector<2x16xf32>
    %303 = vector.multi_reduction <add>, %302, %cst_105 [2] : vector<2x16x16xf32> to vector<2x16xf32>
    %304 = vector.shape_cast %303 : vector<2x16xf32> to vector<2x16x1xf32>
    %305 = tpu.reciprocal %304 {approx = true} : vector<2x16x1xf32> -> vector<2x16x1xf32>
    %306 = vector.broadcast %305 : vector<2x16x1xf32> to vector<2x16x16xf32>
    %307 = arith.mulf %302, %306 : vector<2x16x16xf32>
    "tpu.trace_start"() <{level = 10 : i32, message = "bnm,bmd->bnd"}> : () -> ()
    %cst_106 = arith.constant dense<0.000000e+00> : vector<2x16x8xf32>
    %308 = tpu.matmul %307, %294, %cst_106 {dimension_numbers = #tpu.dot_dimension_numbers<[2], [1], [1], [2], [0, 0, 0, 1, 1, 2], [0], [0]>} : vector<2x16x16xf32>, vector<2x16x8xf32>, vector<2x16x8xf32> -> vector<2x16x8xf32>
    "tpu.trace_stop"() : () -> ()
    %309 = vector.shape_cast %308 : vector<2x16x8xf32> to vector<32x8xf32>
    %310 = arith.truncf %309 : vector<32x8xf32> to vector<32x8xbf16>
    %311 = vector.extract_strided_slice %222 {offsets = [3, 0, 0], sizes = [1, 8, 32], strides = [1, 1, 1]} : vector<4x8x32xbf16> to vector<1x8x32xbf16>
    %312 = vector.shape_cast %311 : vector<1x8x32xbf16> to vector<8x32xbf16>
    %cst_107 = arith.constant dense<0.000000e+00> : vector<32x32xf32>
    %313 = tpu.matmul %310, %312, %cst_107 {dimension_numbers = #tpu.dot_dimension_numbers<[1], [0], [0], [1], [0, 0, 1, 1], [], []>} : vector<32x8xbf16>, vector<8x32xbf16>, vector<32x32xf32> -> vector<32x32xf32>
    %314 = arith.addf %291, %313 : vector<32x32xf32>
    %315 = vector.broadcast %223 : vector<1x32xf32> to vector<32x32xf32>
    %316 = arith.addf %314, %315 : vector<32x32xf32>
    %317 = arith.addf %184, %316 : vector<32x32xf32>
    %318 = vector.extract_strided_slice %186 {offsets = [3, 0], sizes = [1, 32], strides = [1, 1]} : vector<6x32xf32> to vector<1x32xf32>
    %319 = vector.extract_strided_slice %186 {offsets = [4, 0], sizes = [1, 32], strides = [1, 1]} : vector<6x32xf32> to vector<1x32xf32>
    %c0_108 = arith.constant 0 : index
    %c0_109 = arith.constant 0 : index
    %c0_110 = arith.constant 0 : index
    %320 = vector.load %arg16[%c0_108, %c0_109, %c0_110] : memref<2x32x256xbf16, #tpu.memory_space<vmem>>, vector<1x32x256xbf16>
    %321 = vector.shape_cast %320 : vector<1x32x256xbf16> to vector<32x256xbf16>
    %c0_111 = arith.constant 0 : index
    %c0_112 = arith.constant 0 : index
    %c0_113 = arith.constant 0 : index
    %322 = vector.load %arg19[%c0_111, %c0_112, %c0_113] : memref<2x1x256xf32, #tpu.memory_space<vmem>>, vector<1x1x256xf32>
    %323 = vector.shape_cast %322 : vector<1x1x256xf32> to vector<1x256xf32>
    %c0_114 = arith.constant 0 : index
    %c0_115 = arith.constant 0 : index
    %c0_116 = arith.constant 0 : index
    %324 = vector.load %arg17[%c0_114, %c0_115, %c0_116] : memref<2x128x32xbf16, #tpu.memory_space<vmem>>, vector<1x128x32xbf16>
    %325 = vector.shape_cast %324 : vector<1x128x32xbf16> to vector<128x32xbf16>
    %326 = vector.extract_strided_slice %186 {offsets = [5, 0], sizes = [1, 32], strides = [1, 1]} : vector<6x32xf32> to vector<1x32xf32>
    %cst_117 = arith.constant dense<0.000000e+00> : vector<32xf32>
    %327 = vector.multi_reduction <add>, %317, %cst_117 [1] : vector<32x32xf32> to vector<32xf32>
    %328 = vector.shape_cast %327 : vector<32xf32> to vector<32x1xf32>
    %cst_118 = arith.constant 3.200000e+01 : f32
    %329 = vector.broadcast %cst_118 : f32 to vector<32x1xf32>
    %330 = arith.divf %328, %329 : vector<32x1xf32>
    %331 = vector.broadcast %330 : vector<32x1xf32> to vector<32x32xf32>
    %332 = arith.subf %317, %331 : vector<32x32xf32>
    %333 = arith.mulf %332, %332 : vector<32x32xf32>
    %cst_119 = arith.constant dense<0.000000e+00> : vector<32xf32>
    %334 = vector.multi_reduction <add>, %333, %cst_119 [1] : vector<32x32xf32> to vector<32xf32>
    %335 = vector.shape_cast %334 : vector<32xf32> to vector<32x1xf32>
    %cst_120 = arith.constant 3.200000e+01 : f32
    %336 = vector.broadcast %cst_120 : f32 to vector<32x1xf32>
    %337 = arith.divf %335, %336 : vector<32x1xf32>
    %338 = vector.broadcast %330 : vector<32x1xf32> to vector<32x32xf32>
    %339 = arith.subf %317, %338 : vector<32x32xf32>
    %cst_121 = arith.constant 9.99999974E-6 : f32
    %340 = vector.broadcast %cst_121 : f32 to vector<32x1xf32>
    %341 = arith.addf %337, %340 : vector<32x1xf32>
    %342 = math.rsqrt %341 : vector<32x1xf32>
    %343 = vector.broadcast %342 : vector<32x1xf32> to vector<32x32xf32>
    %344 = arith.mulf %339, %343 : vector<32x32xf32>
    %345 = vector.broadcast %318 : vector<1x32xf32> to vector<32x32xf32>
    %346 = arith.mulf %344, %345 : vector<32x32xf32>
    %347 = vector.broadcast %319 : vector<1x32xf32> to vector<32x32xf32>
    %348 = arith.addf %346, %347 : vector<32x32xf32>
    %349 = arith.truncf %348 : vector<32x32xf32> to vector<32x32xbf16>
    %cst_122 = arith.constant dense<0.000000e+00> : vector<32x256xf32>
    %350 = tpu.matmul %349, %321, %cst_122 {dimension_numbers = #tpu.dot_dimension_numbers<[1], [0], [0], [1], [0, 0, 1, 1], [], []>} : vector<32x32xbf16>, vector<32x256xbf16>, vector<32x256xf32> -> vector<32x256xf32>
    %351 = vector.broadcast %323 : vector<1x256xf32> to vector<32x256xf32>
    %352 = arith.addf %350, %351 : vector<32x256xf32>
    %353 = vector.extract_strided_slice %352 {offsets = [0, 0], sizes = [32, 128], strides = [1, 1]} : vector<32x256xf32> to vector<32x128xf32>
    %354 = vector.extract_strided_slice %352 {offsets = [0, 128], sizes = [32, 128], strides = [1, 1]} : vector<32x256xf32> to vector<32x128xf32>
    %355 = arith.mulf %354, %354 : vector<32x128xf32>
    %356 = arith.mulf %354, %355 : vector<32x128xf32>
    %cst_123 = arith.constant 4.471500e-02 : f32
    %357 = vector.broadcast %cst_123 : f32 to vector<32x128xf32>
    %358 = arith.mulf %357, %356 : vector<32x128xf32>
    %359 = arith.addf %354, %358 : vector<32x128xf32>
    %cst_124 = arith.constant 0.797884583 : f32
    %360 = vector.broadcast %cst_124 : f32 to vector<32x128xf32>
    %361 = arith.mulf %360, %359 : vector<32x128xf32>
    %362 = math.tanh %361 : vector<32x128xf32>
    %cst_125 = arith.constant 1.000000e+00 : f32
    %363 = vector.broadcast %cst_125 : f32 to vector<32x128xf32>
    %364 = arith.addf %363, %362 : vector<32x128xf32>
    %cst_126 = arith.constant 5.000000e-01 : f32
    %365 = vector.broadcast %cst_126 : f32 to vector<32x128xf32>
    %366 = arith.mulf %365, %364 : vector<32x128xf32>
    %367 = arith.mulf %354, %366 : vector<32x128xf32>
    %368 = arith.mulf %353, %367 : vector<32x128xf32>
    %369 = arith.truncf %368 : vector<32x128xf32> to vector<32x128xbf16>
    %cst_127 = arith.constant dense<0.000000e+00> : vector<32x32xf32>
    %370 = tpu.matmul %369, %325, %cst_127 {dimension_numbers = #tpu.dot_dimension_numbers<[1], [0], [0], [1], [0, 0, 1, 1], [], []>} : vector<32x128xbf16>, vector<128x32xbf16>, vector<32x32xf32> -> vector<32x32xf32>
    %371 = vector.broadcast %326 : vector<1x32xf32> to vector<32x32xf32>
    %372 = arith.addf %370, %371 : vector<32x32xf32>
    %373 = arith.addf %317, %372 : vector<32x32xf32>
    %374 = vector.shape_cast %373 : vector<32x32xf32> to vector<2x16x32xf32>
    %cst_128 = arith.constant dense<0.000000e+00> : vector<2x32xf32>
    %375 = vector.multi_reduction <add>, %374, %cst_128 [1] : vector<2x16x32xf32> to vector<2x32xf32>
    %c0_129 = arith.constant 0 : index
    %c0_130 = arith.constant 0 : index
    %c0_131 = arith.constant 0 : index
    %376 = vector.load %arg20[%c0_129, %c0_130, %c0_131] : memref<2x2x32xf32, #tpu.memory_space<vmem>>, vector<1x2x32xf32>
    %377 = vector.shape_cast %376 : vector<1x2x32xf32> to vector<2x32xf32>
    %378 = vector.shape_cast %375 : vector<2x32xf32> to vector<1x2x32xf32>
    tpu.vector_store %arg20[%c0_129, %c0_130, %c0_131], %378 {strides = array<i32>} : memref<2x2x32xf32, #tpu.memory_space<vmem>>, vector<1x2x32xf32>,
    %c1 = arith.constant 1 : index
    %c0_132 = arith.constant 0 : index
    %c0_133 = arith.constant 0 : index
    %379 = vector.load %arg5[%c1, %c0_132, %c0_133] : memref<2x16x32xf32, #tpu.memory_space<vmem>>, vector<1x16x32xf32>
    %380 = vector.shape_cast %379 : vector<1x16x32xf32> to vector<16x32xf32>
    %381 = vector.shape_cast %380 : vector<16x32xf32> to vector<1x16x32xf32>
    %382 = vector.broadcast %381 : vector<1x16x32xf32> to vector<2x16x32xf32>
    %383 = vector.shape_cast %382 : vector<2x16x32xf32> to vector<32x32xf32>
    %c1_134 = arith.constant 1 : index
    %c0_135 = arith.constant 0 : index
    %c0_136 = arith.constant 0 : index
    %384 = vector.load %arg11[%c1_134, %c0_135, %c0_136] : memref<2x6x32xf32, #tpu.memory_space<vmem>>, vector<1x6x32xf32>
    %385 = vector.shape_cast %384 : vector<1x6x32xf32> to vector<6x32xf32>
    %c1_137 = arith.constant 1 : index
    %c0_138 = arith.constant 0 : index
    %c0_139 = arith.constant 0 : index
    %386 = vector.load %arg12[%c1_137, %c0_138, %c0_139] : memref<2x2x41xf32, #tpu.memory_space<vmem>>, vector<1x2x41xf32>
    %387 = vector.shape_cast %386 : vector<1x2x41xf32> to vector<2x41xf32>
    %388 = vector.extract_strided_slice %385 {offsets = [0, 0], sizes = [1, 32], strides = [1, 1]} : vector<6x32xf32> to vector<1x32xf32>
    %389 = vector.extract_strided_slice %385 {offsets = [1, 0], sizes = [1, 32], strides = [1, 1]} : vector<6x32xf32> to vector<1x32xf32>
    %cst_140 = arith.constant dense<0.000000e+00> : vector<32xf32>
    %390 = vector.multi_reduction <add>, %383, %cst_140 [1] : vector<32x32xf32> to vector<32xf32>
    %391 = vector.shape_cast %390 : vector<32xf32> to vector<32x1xf32>
    %cst_141 = arith.constant 3.200000e+01 : f32
    %392 = vector.broadcast %cst_141 : f32 to vector<32x1xf32>
    %393 = arith.divf %391, %392 : vector<32x1xf32>
    %394 = vector.broadcast %393 : vector<32x1xf32> to vector<32x32xf32>
    %395 = arith.subf %383, %394 : vector<32x32xf32>
    %396 = arith.mulf %395, %395 : vector<32x32xf32>
    %cst_142 = arith.constant dense<0.000000e+00> : vector<32xf32>
    %397 = vector.multi_reduction <add>, %396, %cst_142 [1] : vector<32x32xf32> to vector<32xf32>
    %398 = vector.shape_cast %397 : vector<32xf32> to vector<32x1xf32>
    %cst_143 = arith.constant 3.200000e+01 : f32
    %399 = vector.broadcast %cst_143 : f32 to vector<32x1xf32>
    %400 = arith.divf %398, %399 : vector<32x1xf32>
    %401 = vector.broadcast %393 : vector<32x1xf32> to vector<32x32xf32>
    %402 = arith.subf %383, %401 : vector<32x32xf32>
    %cst_144 = arith.constant 9.99999974E-6 : f32
    %403 = vector.broadcast %cst_144 : f32 to vector<32x1xf32>
    %404 = arith.addf %400, %403 : vector<32x1xf32>
    %405 = math.rsqrt %404 : vector<32x1xf32>
    %406 = vector.broadcast %405 : vector<32x1xf32> to vector<32x32xf32>
    %407 = arith.mulf %402, %406 : vector<32x32xf32>
    %408 = vector.broadcast %388 : vector<1x32xf32> to vector<32x32xf32>
    %409 = arith.mulf %407, %408 : vector<32x32xf32>
    %410 = vector.broadcast %389 : vector<1x32xf32> to vector<32x32xf32>
    %411 = arith.addf %409, %410 : vector<32x32xf32>
    %412 = vector.extract_strided_slice %387 {offsets = [0, 0], sizes = [1, 32], strides = [1, 1]} : vector<2x41xf32> to vector<1x32xf32>
    %413 = vector.broadcast %412 : vector<1x32xf32> to vector<16x32xf32>
    %414 = arith.mulf %38, %413 : vector<16x32xf32>
    %415 = vector.extract_strided_slice %387 {offsets = [1, 0], sizes = [1, 32], strides = [1, 1]} : vector<2x41xf32> to vector<1x32xf32>
    %416 = vector.broadcast %415 : vector<1x32xf32> to vector<16x32xf32>
    %417 = arith.addf %414, %416 : vector<16x32xf32>
    %418 = vector.extract_strided_slice %387 {offsets = [0, 32], sizes = [1, 9], strides = [1, 1]} : vector<2x41xf32> to vector<1x9xf32>
    %419 = vector.broadcast %418 : vector<1x9xf32> to vector<16x9xf32>
    %420 = arith.mulf %42, %419 : vector<16x9xf32>
    %421 = vector.extract_strided_slice %387 {offsets = [1, 32], sizes = [1, 9], strides = [1, 1]} : vector<2x41xf32> to vector<1x9xf32>
    %422 = vector.broadcast %421 : vector<1x9xf32> to vector<16x9xf32>
    %423 = arith.addf %420, %422 : vector<16x9xf32>
    %424 = arith.truncf %411 : vector<32x32xf32> to vector<32x32xbf16>
    %c1_145 = arith.constant 1 : index
    %c0_146 = arith.constant 0 : index
    %c0_147 = arith.constant 0 : index
    %425 = vector.load %arg6[%c1_145, %c0_146, %c0_147] : memref<2x32x16xbf16, #tpu.memory_space<vmem>>, vector<1x32x16xbf16>
    %426 = vector.shape_cast %425 : vector<1x32x16xbf16> to vector<32x16xbf16>
    %cst_148 = arith.constant dense<0.000000e+00> : vector<32x16xf32>
    %427 = tpu.matmul %424, %426, %cst_148 {dimension_numbers = #tpu.dot_dimension_numbers<[1], [0], [0], [1], [0, 0, 1, 1], [], []>} : vector<32x32xbf16>, vector<32x16xbf16>, vector<32x16xf32> -> vector<32x16xf32>
    %c1_149 = arith.constant 1 : index
    %c0_150 = arith.constant 0 : index
    %c0_151 = arith.constant 0 : index
    %428 = vector.load %arg7[%c1_149, %c0_150, %c0_151] : memref<2x41x32xbf16, #tpu.memory_space<vmem>>, vector<1x41x32xbf16>
    %429 = vector.shape_cast %428 : vector<1x41x32xbf16> to vector<41x32xbf16>
    %430 = arith.truncf %417 : vector<16x32xf32> to vector<16x32xbf16>
    %431 = vector.extract_strided_slice %429 {offsets = [0, 0], sizes = [32, 32], strides = [1, 1]} : vector<41x32xbf16> to vector<32x32xbf16>
    %cst_152 = arith.constant dense<0.000000e+00> : vector<16x32xf32>
    %432 = tpu.matmul %430, %431, %cst_152 {dimension_numbers = #tpu.dot_dimension_numbers<[1], [0], [0], [1], [0, 0, 1, 1], [], []>} : vector<16x32xbf16>, vector<32x32xbf16>, vector<16x32xf32> -> vector<16x32xf32>
    %433 = arith.truncf %423 : vector<16x9xf32> to vector<16x9xbf16>
    %434 = vector.extract_strided_slice %429 {offsets = [32, 0], sizes = [9, 32], strides = [1, 1]} : vector<41x32xbf16> to vector<9x32xbf16>
    %cst_153 = arith.constant dense<0.000000e+00> : vector<16x32xf32>
    %435 = tpu.matmul %433, %434, %cst_153 {dimension_numbers = #tpu.dot_dimension_numbers<[1], [0], [0], [1], [0, 0, 1, 1], [], []>} : vector<16x9xbf16>, vector<9x32xbf16>, vector<16x32xf32> -> vector<16x32xf32>
    %436 = arith.addf %432, %435 : vector<16x32xf32>
    %437 = vector.shape_cast %427 : vector<32x16xf32> to vector<2x16x16xf32>
    %438 = vector.shape_cast %436 : vector<16x32xf32> to vector<2x8x32xf32>
    %439 = vector.extract_strided_slice %438 {offsets = [0, 0, 0], sizes = [2, 8, 16], strides = [1, 1, 1]} : vector<2x8x32xf32> to vector<2x8x16xf32>
    %440 = vector.extract_strided_slice %438 {offsets = [0, 0, 16], sizes = [2, 8, 16], strides = [1, 1, 1]} : vector<2x8x32xf32> to vector<2x8x16xf32>
    %c1_154 = arith.constant 1 : index
    %c0_155 = arith.constant 0 : index
    %c0_156 = arith.constant 0 : index
    %c0_157 = arith.constant 0 : index
    %441 = vector.load %arg8[%c1_154, %c0_155, %c0_156, %c0_157] : memref<2x1x16x32xbf16, #tpu.memory_space<vmem>>, vector<1x1x16x32xbf16>
    %442 = vector.shape_cast %441 : vector<1x1x16x32xbf16> to vector<1x16x32xbf16>
    %443 = vector.extract_strided_slice %385 {offsets = [2, 0], sizes = [1, 32], strides = [1, 1]} : vector<6x32xf32> to vector<1x32xf32>
    "tpu.trace_start"() <{level = 10 : i32, message = "bnd,bmd->bnm"}> : () -> ()
    %cst_158 = arith.constant dense<0.000000e+00> : vector<2x16x8xf32>
    %444 = tpu.matmul %437, %439, %cst_158 {dimension_numbers = #tpu.dot_dimension_numbers<[2], [2], [1], [1], [0, 0, 0, 1, 1, 1], [0], [0]>} : vector<2x16x16xf32>, vector<2x8x16xf32>, vector<2x16x8xf32> -> vector<2x16x8xf32>
    "tpu.trace_stop"() : () -> ()
    %cst_159 = arith.constant 2.500000e-01 : f32
    %445 = vector.broadcast %cst_159 : f32 to vector<2x16x8xf32>
    %446 = arith.mulf %444, %445 : vector<2x16x8xf32>
    %cst_160 = arith.constant dense<0xFF800000> : vector<2x16xf32>
    %447 = vector.multi_reduction <maximumf>, %446, %cst_160 [2] : vector<2x16x8xf32> to vector<2x16xf32>
    %448 = vector.shape_cast %447 : vector<2x16xf32> to vector<2x16x1xf32>
    %449 = vector.broadcast %448 : vector<2x16x1xf32> to vector<2x16x8xf32>
    %450 = arith.subf %446, %449 : vector<2x16x8xf32>
    %451 = math.exp %450 : vector<2x16x8xf32>
    %cst_161 = arith.constant dense<0.000000e+00> : vector<2x16xf32>
    %452 = vector.multi_reduction <add>, %451, %cst_161 [2] : vector<2x16x8xf32> to vector<2x16xf32>
    %453 = vector.shape_cast %452 : vector<2x16xf32> to vector<2x16x1xf32>
    %454 = tpu.reciprocal %453 {approx = true} : vector<2x16x1xf32> -> vector<2x16x1xf32>
    %455 = vector.broadcast %454 : vector<2x16x1xf32> to vector<2x16x8xf32>
    %456 = arith.mulf %451, %455 : vector<2x16x8xf32>
    "tpu.trace_start"() <{level = 10 : i32, message = "bnm,bmd->bnd"}> : () -> ()
    %cst_162 = arith.constant dense<0.000000e+00> : vector<2x16x16xf32>
    %457 = tpu.matmul %456, %440, %cst_162 {dimension_numbers = #tpu.dot_dimension_numbers<[2], [1], [1], [2], [0, 0, 0, 1, 1, 2], [0], [0]>} : vector<2x16x8xf32>, vector<2x8x16xf32>, vector<2x16x16xf32> -> vector<2x16x16xf32>
    "tpu.trace_stop"() : () -> ()
    %458 = vector.shape_cast %457 : vector<2x16x16xf32> to vector<32x16xf32>
    %459 = arith.truncf %458 : vector<32x16xf32> to vector<32x16xbf16>
    %460 = vector.shape_cast %442 : vector<1x16x32xbf16> to vector<16x32xbf16>
    %cst_163 = arith.constant dense<0.000000e+00> : vector<32x32xf32>
    %461 = tpu.matmul %459, %460, %cst_163 {dimension_numbers = #tpu.dot_dimension_numbers<[1], [0], [0], [1], [0, 0, 1, 1], [], []>} : vector<32x16xbf16>, vector<16x32xbf16>, vector<32x32xf32> -> vector<32x32xf32>
    %462 = vector.broadcast %443 : vector<1x32xf32> to vector<32x32xf32>
    %463 = arith.addf %461, %462 : vector<32x32xf32>
    %464 = arith.addf %383, %463 : vector<32x32xf32>
    %465 = vector.extract_strided_slice %385 {offsets = [3, 0], sizes = [1, 32], strides = [1, 1]} : vector<6x32xf32> to vector<1x32xf32>
    %466 = vector.extract_strided_slice %385 {offsets = [4, 0], sizes = [1, 32], strides = [1, 1]} : vector<6x32xf32> to vector<1x32xf32>
    %c1_164 = arith.constant 1 : index
    %c0_165 = arith.constant 0 : index
    %c0_166 = arith.constant 0 : index
    %467 = vector.load %arg9[%c1_164, %c0_165, %c0_166] : memref<2x32x256xbf16, #tpu.memory_space<vmem>>, vector<1x32x256xbf16>
    %468 = vector.shape_cast %467 : vector<1x32x256xbf16> to vector<32x256xbf16>
    %c1_167 = arith.constant 1 : index
    %c0_168 = arith.constant 0 : index
    %c0_169 = arith.constant 0 : index
    %469 = vector.load %arg13[%c1_167, %c0_168, %c0_169] : memref<2x1x256xf32, #tpu.memory_space<vmem>>, vector<1x1x256xf32>
    %470 = vector.shape_cast %469 : vector<1x1x256xf32> to vector<1x256xf32>
    %c1_170 = arith.constant 1 : index
    %c0_171 = arith.constant 0 : index
    %c0_172 = arith.constant 0 : index
    %471 = vector.load %arg10[%c1_170, %c0_171, %c0_172] : memref<2x128x32xbf16, #tpu.memory_space<vmem>>, vector<1x128x32xbf16>
    %472 = vector.shape_cast %471 : vector<1x128x32xbf16> to vector<128x32xbf16>
    %473 = vector.extract_strided_slice %385 {offsets = [5, 0], sizes = [1, 32], strides = [1, 1]} : vector<6x32xf32> to vector<1x32xf32>
    %cst_173 = arith.constant dense<0.000000e+00> : vector<32xf32>
    %474 = vector.multi_reduction <add>, %464, %cst_173 [1] : vector<32x32xf32> to vector<32xf32>
    %475 = vector.shape_cast %474 : vector<32xf32> to vector<32x1xf32>
    %cst_174 = arith.constant 3.200000e+01 : f32
    %476 = vector.broadcast %cst_174 : f32 to vector<32x1xf32>
    %477 = arith.divf %475, %476 : vector<32x1xf32>
    %478 = vector.broadcast %477 : vector<32x1xf32> to vector<32x32xf32>
    %479 = arith.subf %464, %478 : vector<32x32xf32>
    %480 = arith.mulf %479, %479 : vector<32x32xf32>
    %cst_175 = arith.constant dense<0.000000e+00> : vector<32xf32>
    %481 = vector.multi_reduction <add>, %480, %cst_175 [1] : vector<32x32xf32> to vector<32xf32>
    %482 = vector.shape_cast %481 : vector<32xf32> to vector<32x1xf32>
    %cst_176 = arith.constant 3.200000e+01 : f32
    %483 = vector.broadcast %cst_176 : f32 to vector<32x1xf32>
    %484 = arith.divf %482, %483 : vector<32x1xf32>
    %485 = vector.broadcast %477 : vector<32x1xf32> to vector<32x32xf32>
    %486 = arith.subf %464, %485 : vector<32x32xf32>
    %cst_177 = arith.constant 9.99999974E-6 : f32
    %487 = vector.broadcast %cst_177 : f32 to vector<32x1xf32>
    %488 = arith.addf %484, %487 : vector<32x1xf32>
    %489 = math.rsqrt %488 : vector<32x1xf32>
    %490 = vector.broadcast %489 : vector<32x1xf32> to vector<32x32xf32>
    %491 = arith.mulf %486, %490 : vector<32x32xf32>
    %492 = vector.broadcast %465 : vector<1x32xf32> to vector<32x32xf32>
    %493 = arith.mulf %491, %492 : vector<32x32xf32>
    %494 = vector.broadcast %466 : vector<1x32xf32> to vector<32x32xf32>
    %495 = arith.addf %493, %494 : vector<32x32xf32>
    %496 = arith.truncf %495 : vector<32x32xf32> to vector<32x32xbf16>
    %cst_178 = arith.constant dense<0.000000e+00> : vector<32x256xf32>
    %497 = tpu.matmul %496, %468, %cst_178 {dimension_numbers = #tpu.dot_dimension_numbers<[1], [0], [0], [1], [0, 0, 1, 1], [], []>} : vector<32x32xbf16>, vector<32x256xbf16>, vector<32x256xf32> -> vector<32x256xf32>
    %498 = vector.broadcast %470 : vector<1x256xf32> to vector<32x256xf32>
    %499 = arith.addf %497, %498 : vector<32x256xf32>
    %500 = vector.extract_strided_slice %499 {offsets = [0, 0], sizes = [32, 128], strides = [1, 1]} : vector<32x256xf32> to vector<32x128xf32>
    %501 = vector.extract_strided_slice %499 {offsets = [0, 128], sizes = [32, 128], strides = [1, 1]} : vector<32x256xf32> to vector<32x128xf32>
    %502 = arith.mulf %501, %501 : vector<32x128xf32>
    %503 = arith.mulf %501, %502 : vector<32x128xf32>
    %cst_179 = arith.constant 4.471500e-02 : f32
    %504 = vector.broadcast %cst_179 : f32 to vector<32x128xf32>
    %505 = arith.mulf %504, %503 : vector<32x128xf32>
    %506 = arith.addf %501, %505 : vector<32x128xf32>
    %cst_180 = arith.constant 0.797884583 : f32
    %507 = vector.broadcast %cst_180 : f32 to vector<32x128xf32>
    %508 = arith.mulf %507, %506 : vector<32x128xf32>
    %509 = math.tanh %508 : vector<32x128xf32>
    %cst_181 = arith.constant 1.000000e+00 : f32
    %510 = vector.broadcast %cst_181 : f32 to vector<32x128xf32>
    %511 = arith.addf %510, %509 : vector<32x128xf32>
    %cst_182 = arith.constant 5.000000e-01 : f32
    %512 = vector.broadcast %cst_182 : f32 to vector<32x128xf32>
    %513 = arith.mulf %512, %511 : vector<32x128xf32>
    %514 = arith.mulf %501, %513 : vector<32x128xf32>
    %515 = arith.mulf %500, %514 : vector<32x128xf32>
    %516 = arith.truncf %515 : vector<32x128xf32> to vector<32x128xbf16>
    %cst_183 = arith.constant dense<0.000000e+00> : vector<32x32xf32>
    %517 = tpu.matmul %516, %472, %cst_183 {dimension_numbers = #tpu.dot_dimension_numbers<[1], [0], [0], [1], [0, 0, 1, 1], [], []>} : vector<32x128xbf16>, vector<128x32xbf16>, vector<32x32xf32> -> vector<32x32xf32>
    %518 = vector.broadcast %473 : vector<1x32xf32> to vector<32x32xf32>
    %519 = arith.addf %517, %518 : vector<32x32xf32>
    %520 = arith.addf %464, %519 : vector<32x32xf32>
    %c1_184 = arith.constant 1 : index
    %c0_185 = arith.constant 0 : index
    %c0_186 = arith.constant 0 : index
    %521 = vector.load %arg18[%c1_184, %c0_185, %c0_186] : memref<2x6x32xf32, #tpu.memory_space<vmem>>, vector<1x6x32xf32>
    %522 = vector.shape_cast %521 : vector<1x6x32xf32> to vector<6x32xf32>
    %523 = vector.extract_strided_slice %522 {offsets = [0, 0], sizes = [1, 32], strides = [1, 1]} : vector<6x32xf32> to vector<1x32xf32>
    %524 = vector.extract_strided_slice %522 {offsets = [1, 0], sizes = [1, 32], strides = [1, 1]} : vector<6x32xf32> to vector<1x32xf32>
    %cst_187 = arith.constant dense<0.000000e+00> : vector<32xf32>
    %525 = vector.multi_reduction <add>, %520, %cst_187 [1] : vector<32x32xf32> to vector<32xf32>
    %526 = vector.shape_cast %525 : vector<32xf32> to vector<32x1xf32>
    %cst_188 = arith.constant 3.200000e+01 : f32
    %527 = vector.broadcast %cst_188 : f32 to vector<32x1xf32>
    %528 = arith.divf %526, %527 : vector<32x1xf32>
    %529 = vector.broadcast %528 : vector<32x1xf32> to vector<32x32xf32>
    %530 = arith.subf %520, %529 : vector<32x32xf32>
    %531 = arith.mulf %530, %530 : vector<32x32xf32>
    %cst_189 = arith.constant dense<0.000000e+00> : vector<32xf32>
    %532 = vector.multi_reduction <add>, %531, %cst_189 [1] : vector<32x32xf32> to vector<32xf32>
    %533 = vector.shape_cast %532 : vector<32xf32> to vector<32x1xf32>
    %cst_190 = arith.constant 3.200000e+01 : f32
    %534 = vector.broadcast %cst_190 : f32 to vector<32x1xf32>
    %535 = arith.divf %533, %534 : vector<32x1xf32>
    %536 = vector.broadcast %528 : vector<32x1xf32> to vector<32x32xf32>
    %537 = arith.subf %520, %536 : vector<32x32xf32>
    %cst_191 = arith.constant 9.99999974E-6 : f32
    %538 = vector.broadcast %cst_191 : f32 to vector<32x1xf32>
    %539 = arith.addf %535, %538 : vector<32x1xf32>
    %540 = math.rsqrt %539 : vector<32x1xf32>
    %541 = vector.broadcast %540 : vector<32x1xf32> to vector<32x32xf32>
    %542 = arith.mulf %537, %541 : vector<32x32xf32>
    %543 = vector.broadcast %523 : vector<1x32xf32> to vector<32x32xf32>
    %544 = arith.mulf %542, %543 : vector<32x32xf32>
    %545 = vector.broadcast %524 : vector<1x32xf32> to vector<32x32xf32>
    %546 = arith.addf %544, %545 : vector<32x32xf32>
    %547 = arith.truncf %546 : vector<32x32xf32> to vector<32x32xbf16>
    %c1_192 = arith.constant 1 : index
    %c0_193 = arith.constant 0 : index
    %c0_194 = arith.constant 0 : index
    %548 = vector.load %arg14[%c1_192, %c0_193, %c0_194] : memref<2x32x96xbf16, #tpu.memory_space<vmem>>, vector<1x32x96xbf16>
    %549 = vector.shape_cast %548 : vector<1x32x96xbf16> to vector<32x96xbf16>
    %cst_195 = arith.constant dense<0.000000e+00> : vector<32x96xf32>
    %550 = tpu.matmul %547, %549, %cst_195 {dimension_numbers = #tpu.dot_dimension_numbers<[1], [0], [0], [1], [0, 0, 1, 1], [], []>} : vector<32x32xbf16>, vector<32x96xbf16>, vector<32x96xf32> -> vector<32x96xf32>
    %551 = vector.extract_strided_slice %550 {offsets = [0, 0], sizes = [32, 32], strides = [1, 1]} : vector<32x96xf32> to vector<32x32xf32>
    %552 = vector.shape_cast %551 : vector<32x32xf32> to vector<2x16x32xf32>
    %553 = vector.extract_strided_slice %550 {offsets = [0, 32], sizes = [32, 32], strides = [1, 1]} : vector<32x96xf32> to vector<32x32xf32>
    %554 = vector.shape_cast %553 : vector<32x32xf32> to vector<2x16x32xf32>
    %555 = vector.extract_strided_slice %550 {offsets = [0, 64], sizes = [32, 32], strides = [1, 1]} : vector<32x96xf32> to vector<32x32xf32>
    %556 = vector.shape_cast %555 : vector<32x32xf32> to vector<2x16x32xf32>
    %c1_196 = arith.constant 1 : index
    %c0_197 = arith.constant 0 : index
    %c0_198 = arith.constant 0 : index
    %c0_199 = arith.constant 0 : index
    %557 = vector.load %arg15[%c1_196, %c0_197, %c0_198, %c0_199] : memref<2x4x8x32xbf16, #tpu.memory_space<vmem>>, vector<1x4x8x32xbf16>
    %558 = vector.shape_cast %557 : vector<1x4x8x32xbf16> to vector<4x8x32xbf16>
    %559 = vector.extract_strided_slice %522 {offsets = [2, 0], sizes = [1, 32], strides = [1, 1]} : vector<6x32xf32> to vector<1x32xf32>
    %560 = vector.extract_strided_slice %552 {offsets = [0, 0, 0], sizes = [2, 16, 8], strides = [1, 1, 1]} : vector<2x16x32xf32> to vector<2x16x8xf32>
    %561 = vector.extract_strided_slice %554 {offsets = [0, 0, 0], sizes = [2, 16, 8], strides = [1, 1, 1]} : vector<2x16x32xf32> to vector<2x16x8xf32>
    %562 = vector.extract_strided_slice %556 {offsets = [0, 0, 0], sizes = [2, 16, 8], strides = [1, 1, 1]} : vector<2x16x32xf32> to vector<2x16x8xf32>
    "tpu.trace_start"() <{level = 10 : i32, message = "bnd,bmd->bnm"}> : () -> ()
    %cst_200 = arith.constant dense<0.000000e+00> : vector<2x16x16xf32>
    %563 = tpu.matmul %560, %561, %cst_200 {dimension_numbers = #tpu.dot_dimension_numbers<[2], [2], [1], [1], [0, 0, 0, 1, 1, 1], [0], [0]>} : vector<2x16x8xf32>, vector<2x16x8xf32>, vector<2x16x16xf32> -> vector<2x16x16xf32>
    "tpu.trace_stop"() : () -> ()
    %cst_201 = arith.constant 0.353553385 : f32
    %564 = vector.broadcast %cst_201 : f32 to vector<2x16x16xf32>
    %565 = arith.mulf %563, %564 : vector<2x16x16xf32>
    %cst_202 = arith.constant dense<0xFF800000> : vector<2x16xf32>
    %566 = vector.multi_reduction <maximumf>, %565, %cst_202 [2] : vector<2x16x16xf32> to vector<2x16xf32>
    %567 = vector.shape_cast %566 : vector<2x16xf32> to vector<2x16x1xf32>
    %568 = vector.broadcast %567 : vector<2x16x1xf32> to vector<2x16x16xf32>
    %569 = arith.subf %565, %568 : vector<2x16x16xf32>
    %570 = math.exp %569 : vector<2x16x16xf32>
    %cst_203 = arith.constant dense<0.000000e+00> : vector<2x16xf32>
    %571 = vector.multi_reduction <add>, %570, %cst_203 [2] : vector<2x16x16xf32> to vector<2x16xf32>
    %572 = vector.shape_cast %571 : vector<2x16xf32> to vector<2x16x1xf32>
    %573 = tpu.reciprocal %572 {approx = true} : vector<2x16x1xf32> -> vector<2x16x1xf32>
    %574 = vector.broadcast %573 : vector<2x16x1xf32> to vector<2x16x16xf32>
    %575 = arith.mulf %570, %574 : vector<2x16x16xf32>
    "tpu.trace_start"() <{level = 10 : i32, message = "bnm,bmd->bnd"}> : () -> ()
    %cst_204 = arith.constant dense<0.000000e+00> : vector<2x16x8xf32>
    %576 = tpu.matmul %575, %562, %cst_204 {dimension_numbers = #tpu.dot_dimension_numbers<[2], [1], [1], [2], [0, 0, 0, 1, 1, 2], [0], [0]>} : vector<2x16x16xf32>, vector<2x16x8xf32>, vector<2x16x8xf32> -> vector<2x16x8xf32>
    "tpu.trace_stop"() : () -> ()
    %577 = vector.shape_cast %576 : vector<2x16x8xf32> to vector<32x8xf32>
    %578 = arith.truncf %577 : vector<32x8xf32> to vector<32x8xbf16>
    %579 = vector.extract_strided_slice %558 {offsets = [0, 0, 0], sizes = [1, 8, 32], strides = [1, 1, 1]} : vector<4x8x32xbf16> to vector<1x8x32xbf16>
    %580 = vector.shape_cast %579 : vector<1x8x32xbf16> to vector<8x32xbf16>
    %cst_205 = arith.constant dense<0.000000e+00> : vector<32x32xf32>
    %581 = tpu.matmul %578, %580, %cst_205 {dimension_numbers = #tpu.dot_dimension_numbers<[1], [0], [0], [1], [0, 0, 1, 1], [], []>} : vector<32x8xbf16>, vector<8x32xbf16>, vector<32x32xf32> -> vector<32x32xf32>
    %582 = vector.extract_strided_slice %552 {offsets = [0, 0, 8], sizes = [2, 16, 8], strides = [1, 1, 1]} : vector<2x16x32xf32> to vector<2x16x8xf32>
    %583 = vector.extract_strided_slice %554 {offsets = [0, 0, 8], sizes = [2, 16, 8], strides = [1, 1, 1]} : vector<2x16x32xf32> to vector<2x16x8xf32>
    %584 = vector.extract_strided_slice %556 {offsets = [0, 0, 8], sizes = [2, 16, 8], strides = [1, 1, 1]} : vector<2x16x32xf32> to vector<2x16x8xf32>
    "tpu.trace_start"() <{level = 10 : i32, message = "bnd,bmd->bnm"}> : () -> ()
    %cst_206 = arith.constant dense<0.000000e+00> : vector<2x16x16xf32>
    %585 = tpu.matmul %582, %583, %cst_206 {dimension_numbers = #tpu.dot_dimension_numbers<[2], [2], [1], [1], [0, 0, 0, 1, 1, 1], [0], [0]>} : vector<2x16x8xf32>, vector<2x16x8xf32>, vector<2x16x16xf32> -> vector<2x16x16xf32>
    "tpu.trace_stop"() : () -> ()
    %cst_207 = arith.constant 0.353553385 : f32
    %586 = vector.broadcast %cst_207 : f32 to vector<2x16x16xf32>
    %587 = arith.mulf %585, %586 : vector<2x16x16xf32>
    %cst_208 = arith.constant dense<0xFF800000> : vector<2x16xf32>
    %588 = vector.multi_reduction <maximumf>, %587, %cst_208 [2] : vector<2x16x16xf32> to vector<2x16xf32>
    %589 = vector.shape_cast %588 : vector<2x16xf32> to vector<2x16x1xf32>
    %590 = vector.broadcast %589 : vector<2x16x1xf32> to vector<2x16x16xf32>
    %591 = arith.subf %587, %590 : vector<2x16x16xf32>
    %592 = math.exp %591 : vector<2x16x16xf32>
    %cst_209 = arith.constant dense<0.000000e+00> : vector<2x16xf32>
    %593 = vector.multi_reduction <add>, %592, %cst_209 [2] : vector<2x16x16xf32> to vector<2x16xf32>
    %594 = vector.shape_cast %593 : vector<2x16xf32> to vector<2x16x1xf32>
    %595 = tpu.reciprocal %594 {approx = true} : vector<2x16x1xf32> -> vector<2x16x1xf32>
    %596 = vector.broadcast %595 : vector<2x16x1xf32> to vector<2x16x16xf32>
    %597 = arith.mulf %592, %596 : vector<2x16x16xf32>
    "tpu.trace_start"() <{level = 10 : i32, message = "bnm,bmd->bnd"}> : () -> ()
    %cst_210 = arith.constant dense<0.000000e+00> : vector<2x16x8xf32>
    %598 = tpu.matmul %597, %584, %cst_210 {dimension_numbers = #tpu.dot_dimension_numbers<[2], [1], [1], [2], [0, 0, 0, 1, 1, 2], [0], [0]>} : vector<2x16x16xf32>, vector<2x16x8xf32>, vector<2x16x8xf32> -> vector<2x16x8xf32>
    "tpu.trace_stop"() : () -> ()
    %599 = vector.shape_cast %598 : vector<2x16x8xf32> to vector<32x8xf32>
    %600 = arith.truncf %599 : vector<32x8xf32> to vector<32x8xbf16>
    %601 = vector.extract_strided_slice %558 {offsets = [1, 0, 0], sizes = [1, 8, 32], strides = [1, 1, 1]} : vector<4x8x32xbf16> to vector<1x8x32xbf16>
    %602 = vector.shape_cast %601 : vector<1x8x32xbf16> to vector<8x32xbf16>
    %cst_211 = arith.constant dense<0.000000e+00> : vector<32x32xf32>
    %603 = tpu.matmul %600, %602, %cst_211 {dimension_numbers = #tpu.dot_dimension_numbers<[1], [0], [0], [1], [0, 0, 1, 1], [], []>} : vector<32x8xbf16>, vector<8x32xbf16>, vector<32x32xf32> -> vector<32x32xf32>
    %604 = arith.addf %581, %603 : vector<32x32xf32>
    %605 = vector.extract_strided_slice %552 {offsets = [0, 0, 16], sizes = [2, 16, 8], strides = [1, 1, 1]} : vector<2x16x32xf32> to vector<2x16x8xf32>
    %606 = vector.extract_strided_slice %554 {offsets = [0, 0, 16], sizes = [2, 16, 8], strides = [1, 1, 1]} : vector<2x16x32xf32> to vector<2x16x8xf32>
    %607 = vector.extract_strided_slice %556 {offsets = [0, 0, 16], sizes = [2, 16, 8], strides = [1, 1, 1]} : vector<2x16x32xf32> to vector<2x16x8xf32>
    "tpu.trace_start"() <{level = 10 : i32, message = "bnd,bmd->bnm"}> : () -> ()
    %cst_212 = arith.constant dense<0.000000e+00> : vector<2x16x16xf32>
    %608 = tpu.matmul %605, %606, %cst_212 {dimension_numbers = #tpu.dot_dimension_numbers<[2], [2], [1], [1], [0, 0, 0, 1, 1, 1], [0], [0]>} : vector<2x16x8xf32>, vector<2x16x8xf32>, vector<2x16x16xf32> -> vector<2x16x16xf32>
    "tpu.trace_stop"() : () -> ()
    %cst_213 = arith.constant 0.353553385 : f32
    %609 = vector.broadcast %cst_213 : f32 to vector<2x16x16xf32>
    %610 = arith.mulf %608, %609 : vector<2x16x16xf32>
    %cst_214 = arith.constant dense<0xFF800000> : vector<2x16xf32>
    %611 = vector.multi_reduction <maximumf>, %610, %cst_214 [2] : vector<2x16x16xf32> to vector<2x16xf32>
    %612 = vector.shape_cast %611 : vector<2x16xf32> to vector<2x16x1xf32>
    %613 = vector.broadcast %612 : vector<2x16x1xf32> to vector<2x16x16xf32>
    %614 = arith.subf %610, %613 : vector<2x16x16xf32>
    %615 = math.exp %614 : vector<2x16x16xf32>
    %cst_215 = arith.constant dense<0.000000e+00> : vector<2x16xf32>
    %616 = vector.multi_reduction <add>, %615, %cst_215 [2] : vector<2x16x16xf32> to vector<2x16xf32>
    %617 = vector.shape_cast %616 : vector<2x16xf32> to vector<2x16x1xf32>
    %618 = tpu.reciprocal %617 {approx = true} : vector<2x16x1xf32> -> vector<2x16x1xf32>
    %619 = vector.broadcast %618 : vector<2x16x1xf32> to vector<2x16x16xf32>
    %620 = arith.mulf %615, %619 : vector<2x16x16xf32>
    "tpu.trace_start"() <{level = 10 : i32, message = "bnm,bmd->bnd"}> : () -> ()
    %cst_216 = arith.constant dense<0.000000e+00> : vector<2x16x8xf32>
    %621 = tpu.matmul %620, %607, %cst_216 {dimension_numbers = #tpu.dot_dimension_numbers<[2], [1], [1], [2], [0, 0, 0, 1, 1, 2], [0], [0]>} : vector<2x16x16xf32>, vector<2x16x8xf32>, vector<2x16x8xf32> -> vector<2x16x8xf32>
    "tpu.trace_stop"() : () -> ()
    %622 = vector.shape_cast %621 : vector<2x16x8xf32> to vector<32x8xf32>
    %623 = arith.truncf %622 : vector<32x8xf32> to vector<32x8xbf16>
    %624 = vector.extract_strided_slice %558 {offsets = [2, 0, 0], sizes = [1, 8, 32], strides = [1, 1, 1]} : vector<4x8x32xbf16> to vector<1x8x32xbf16>
    %625 = vector.shape_cast %624 : vector<1x8x32xbf16> to vector<8x32xbf16>
    %cst_217 = arith.constant dense<0.000000e+00> : vector<32x32xf32>
    %626 = tpu.matmul %623, %625, %cst_217 {dimension_numbers = #tpu.dot_dimension_numbers<[1], [0], [0], [1], [0, 0, 1, 1], [], []>} : vector<32x8xbf16>, vector<8x32xbf16>, vector<32x32xf32> -> vector<32x32xf32>
    %627 = arith.addf %604, %626 : vector<32x32xf32>
    %628 = vector.extract_strided_slice %552 {offsets = [0, 0, 24], sizes = [2, 16, 8], strides = [1, 1, 1]} : vector<2x16x32xf32> to vector<2x16x8xf32>
    %629 = vector.extract_strided_slice %554 {offsets = [0, 0, 24], sizes = [2, 16, 8], strides = [1, 1, 1]} : vector<2x16x32xf32> to vector<2x16x8xf32>
    %630 = vector.extract_strided_slice %556 {offsets = [0, 0, 24], sizes = [2, 16, 8], strides = [1, 1, 1]} : vector<2x16x32xf32> to vector<2x16x8xf32>
    "tpu.trace_start"() <{level = 10 : i32, message = "bnd,bmd->bnm"}> : () -> ()
    %cst_218 = arith.constant dense<0.000000e+00> : vector<2x16x16xf32>
    %631 = tpu.matmul %628, %629, %cst_218 {dimension_numbers = #tpu.dot_dimension_numbers<[2], [2], [1], [1], [0, 0, 0, 1, 1, 1], [0], [0]>} : vector<2x16x8xf32>, vector<2x16x8xf32>, vector<2x16x16xf32> -> vector<2x16x16xf32>
    "tpu.trace_stop"() : () -> ()
    %cst_219 = arith.constant 0.353553385 : f32
    %632 = vector.broadcast %cst_219 : f32 to vector<2x16x16xf32>
    %633 = arith.mulf %631, %632 : vector<2x16x16xf32>
    %cst_220 = arith.constant dense<0xFF800000> : vector<2x16xf32>
    %634 = vector.multi_reduction <maximumf>, %633, %cst_220 [2] : vector<2x16x16xf32> to vector<2x16xf32>
    %635 = vector.shape_cast %634 : vector<2x16xf32> to vector<2x16x1xf32>
    %636 = vector.broadcast %635 : vector<2x16x1xf32> to vector<2x16x16xf32>
    %637 = arith.subf %633, %636 : vector<2x16x16xf32>
    %638 = math.exp %637 : vector<2x16x16xf32>
    %cst_221 = arith.constant dense<0.000000e+00> : vector<2x16xf32>
    %639 = vector.multi_reduction <add>, %638, %cst_221 [2] : vector<2x16x16xf32> to vector<2x16xf32>
    %640 = vector.shape_cast %639 : vector<2x16xf32> to vector<2x16x1xf32>
    %641 = tpu.reciprocal %640 {approx = true} : vector<2x16x1xf32> -> vector<2x16x1xf32>
    %642 = vector.broadcast %641 : vector<2x16x1xf32> to vector<2x16x16xf32>
    %643 = arith.mulf %638, %642 : vector<2x16x16xf32>
    "tpu.trace_start"() <{level = 10 : i32, message = "bnm,bmd->bnd"}> : () -> ()
    %cst_222 = arith.constant dense<0.000000e+00> : vector<2x16x8xf32>
    %644 = tpu.matmul %643, %630, %cst_222 {dimension_numbers = #tpu.dot_dimension_numbers<[2], [1], [1], [2], [0, 0, 0, 1, 1, 2], [0], [0]>} : vector<2x16x16xf32>, vector<2x16x8xf32>, vector<2x16x8xf32> -> vector<2x16x8xf32>
    "tpu.trace_stop"() : () -> ()
    %645 = vector.shape_cast %644 : vector<2x16x8xf32> to vector<32x8xf32>
    %646 = arith.truncf %645 : vector<32x8xf32> to vector<32x8xbf16>
    %647 = vector.extract_strided_slice %558 {offsets = [3, 0, 0], sizes = [1, 8, 32], strides = [1, 1, 1]} : vector<4x8x32xbf16> to vector<1x8x32xbf16>
    %648 = vector.shape_cast %647 : vector<1x8x32xbf16> to vector<8x32xbf16>
    %cst_223 = arith.constant dense<0.000000e+00> : vector<32x32xf32>
    %649 = tpu.matmul %646, %648, %cst_223 {dimension_numbers = #tpu.dot_dimension_numbers<[1], [0], [0], [1], [0, 0, 1, 1], [], []>} : vector<32x8xbf16>, vector<8x32xbf16>, vector<32x32xf32> -> vector<32x32xf32>
    %650 = arith.addf %627, %649 : vector<32x32xf32>
    %651 = vector.broadcast %559 : vector<1x32xf32> to vector<32x32xf32>
    %652 = arith.addf %650, %651 : vector<32x32xf32>
    %653 = arith.addf %520, %652 : vector<32x32xf32>
    %654 = vector.extract_strided_slice %522 {offsets = [3, 0], sizes = [1, 32], strides = [1, 1]} : vector<6x32xf32> to vector<1x32xf32>
    %655 = vector.extract_strided_slice %522 {offsets = [4, 0], sizes = [1, 32], strides = [1, 1]} : vector<6x32xf32> to vector<1x32xf32>
    %c1_224 = arith.constant 1 : index
    %c0_225 = arith.constant 0 : index
    %c0_226 = arith.constant 0 : index
    %656 = vector.load %arg16[%c1_224, %c0_225, %c0_226] : memref<2x32x256xbf16, #tpu.memory_space<vmem>>, vector<1x32x256xbf16>
    %657 = vector.shape_cast %656 : vector<1x32x256xbf16> to vector<32x256xbf16>
    %c1_227 = arith.constant 1 : index
    %c0_228 = arith.constant 0 : index
    %c0_229 = arith.constant 0 : index
    %658 = vector.load %arg19[%c1_227, %c0_228, %c0_229] : memref<2x1x256xf32, #tpu.memory_space<vmem>>, vector<1x1x256xf32>
    %659 = vector.shape_cast %658 : vector<1x1x256xf32> to vector<1x256xf32>
    %c1_230 = arith.constant 1 : index
    %c0_231 = arith.constant 0 : index
    %c0_232 = arith.constant 0 : index
    %660 = vector.load %arg17[%c1_230, %c0_231, %c0_232] : memref<2x128x32xbf16, #tpu.memory_space<vmem>>, vector<1x128x32xbf16>
    %661 = vector.shape_cast %660 : vector<1x128x32xbf16> to vector<128x32xbf16>
    %662 = vector.extract_strided_slice %522 {offsets = [5, 0], sizes = [1, 32], strides = [1, 1]} : vector<6x32xf32> to vector<1x32xf32>
    %cst_233 = arith.constant dense<0.000000e+00> : vector<32xf32>
    %663 = vector.multi_reduction <add>, %653, %cst_233 [1] : vector<32x32xf32> to vector<32xf32>
    %664 = vector.shape_cast %663 : vector<32xf32> to vector<32x1xf32>
    %cst_234 = arith.constant 3.200000e+01 : f32
    %665 = vector.broadcast %cst_234 : f32 to vector<32x1xf32>
    %666 = arith.divf %664, %665 : vector<32x1xf32>
    %667 = vector.broadcast %666 : vector<32x1xf32> to vector<32x32xf32>
    %668 = arith.subf %653, %667 : vector<32x32xf32>
    %669 = arith.mulf %668, %668 : vector<32x32xf32>
    %cst_235 = arith.constant dense<0.000000e+00> : vector<32xf32>
    %670 = vector.multi_reduction <add>, %669, %cst_235 [1] : vector<32x32xf32> to vector<32xf32>
    %671 = vector.shape_cast %670 : vector<32xf32> to vector<32x1xf32>
    %cst_236 = arith.constant 3.200000e+01 : f32
    %672 = vector.broadcast %cst_236 : f32 to vector<32x1xf32>
    %673 = arith.divf %671, %672 : vector<32x1xf32>
    %674 = vector.broadcast %666 : vector<32x1xf32> to vector<32x32xf32>
    %675 = arith.subf %653, %674 : vector<32x32xf32>
    %cst_237 = arith.constant 9.99999974E-6 : f32
    %676 = vector.broadcast %cst_237 : f32 to vector<32x1xf32>
    %677 = arith.addf %673, %676 : vector<32x1xf32>
    %678 = math.rsqrt %677 : vector<32x1xf32>
    %679 = vector.broadcast %678 : vector<32x1xf32> to vector<32x32xf32>
    %680 = arith.mulf %675, %679 : vector<32x32xf32>
    %681 = vector.broadcast %654 : vector<1x32xf32> to vector<32x32xf32>
    %682 = arith.mulf %680, %681 : vector<32x32xf32>
    %683 = vector.broadcast %655 : vector<1x32xf32> to vector<32x32xf32>
    %684 = arith.addf %682, %683 : vector<32x32xf32>
    %685 = arith.truncf %684 : vector<32x32xf32> to vector<32x32xbf16>
    %cst_238 = arith.constant dense<0.000000e+00> : vector<32x256xf32>
    %686 = tpu.matmul %685, %657, %cst_238 {dimension_numbers = #tpu.dot_dimension_numbers<[1], [0], [0], [1], [0, 0, 1, 1], [], []>} : vector<32x32xbf16>, vector<32x256xbf16>, vector<32x256xf32> -> vector<32x256xf32>
    %687 = vector.broadcast %659 : vector<1x256xf32> to vector<32x256xf32>
    %688 = arith.addf %686, %687 : vector<32x256xf32>
    %689 = vector.extract_strided_slice %688 {offsets = [0, 0], sizes = [32, 128], strides = [1, 1]} : vector<32x256xf32> to vector<32x128xf32>
    %690 = vector.extract_strided_slice %688 {offsets = [0, 128], sizes = [32, 128], strides = [1, 1]} : vector<32x256xf32> to vector<32x128xf32>
    %691 = arith.mulf %690, %690 : vector<32x128xf32>
    %692 = arith.mulf %690, %691 : vector<32x128xf32>
    %cst_239 = arith.constant 4.471500e-02 : f32
    %693 = vector.broadcast %cst_239 : f32 to vector<32x128xf32>
    %694 = arith.mulf %693, %692 : vector<32x128xf32>
    %695 = arith.addf %690, %694 : vector<32x128xf32>
    %cst_240 = arith.constant 0.797884583 : f32
    %696 = vector.broadcast %cst_240 : f32 to vector<32x128xf32>
    %697 = arith.mulf %696, %695 : vector<32x128xf32>
    %698 = math.tanh %697 : vector<32x128xf32>
    %cst_241 = arith.constant 1.000000e+00 : f32
    %699 = vector.broadcast %cst_241 : f32 to vector<32x128xf32>
    %700 = arith.addf %699, %698 : vector<32x128xf32>
    %cst_242 = arith.constant 5.000000e-01 : f32
    %701 = vector.broadcast %cst_242 : f32 to vector<32x128xf32>
    %702 = arith.mulf %701, %700 : vector<32x128xf32>
    %703 = arith.mulf %690, %702 : vector<32x128xf32>
    %704 = arith.mulf %689, %703 : vector<32x128xf32>
    %705 = arith.truncf %704 : vector<32x128xf32> to vector<32x128xbf16>
    %cst_243 = arith.constant dense<0.000000e+00> : vector<32x32xf32>
    %706 = tpu.matmul %705, %661, %cst_243 {dimension_numbers = #tpu.dot_dimension_numbers<[1], [0], [0], [1], [0, 0, 1, 1], [], []>} : vector<32x128xbf16>, vector<128x32xbf16>, vector<32x32xf32> -> vector<32x32xf32>
    %707 = vector.broadcast %662 : vector<1x32xf32> to vector<32x32xf32>
    %708 = arith.addf %706, %707 : vector<32x32xf32>
    %709 = arith.addf %653, %708 : vector<32x32xf32>
    %710 = vector.shape_cast %709 : vector<32x32xf32> to vector<2x16x32xf32>
    %cst_244 = arith.constant dense<0.000000e+00> : vector<2x32xf32>
    %711 = vector.multi_reduction <add>, %710, %cst_244 [1] : vector<2x16x32xf32> to vector<2x32xf32>
    %c1_245 = arith.constant 1 : index
    %c0_246 = arith.constant 0 : index
    %c0_247 = arith.constant 0 : index
    %712 = vector.load %arg20[%c1_245, %c0_246, %c0_247] : memref<2x2x32xf32, #tpu.memory_space<vmem>>, vector<1x2x32xf32>
    %713 = vector.shape_cast %712 : vector<1x2x32xf32> to vector<2x32xf32>
    %714 = vector.shape_cast %711 : vector<2x32xf32> to vector<1x2x32xf32>
    tpu.vector_store %arg20[%c1_245, %c0_246, %c0_247], %714 {strides = array<i32>} : memref<2x2x32xf32, #tpu.memory_space<vmem>>, vector<1x2x32xf32>,
    return
  }
  func.func @transform_0(%arg0: i32) -> (i32, i32, i32) {
    %c0_i32 = arith.constant 0 : i32
    %c0_i32_0 = arith.constant 0 : i32
    %c0_i32_1 = arith.constant 0 : i32
    %c0_i32_2 = arith.constant 0 : i32
    return %c0_i32, %c0_i32_0, %c0_i32_1 : i32, i32, i32
  }
  func.func @transform_1(%arg0: i32) -> (i32, i32) {
    %c0_i32 = arith.constant 0 : i32
    %c0_i32_0 = arith.constant 0 : i32
    %c0_i32_1 = arith.constant 0 : i32
    return %c0_i32, %c0_i32_0 : i32, i32
  }
  func.func @transform_2(%arg0: i32) -> (i32, i32) {
    %c0_i32 = arith.constant 0 : i32
    %c0_i32_0 = arith.constant 0 : i32
    %c0_i32_1 = arith.constant 0 : i32
    return %c0_i32, %c0_i32_0 : i32, i32
  }
  func.func @transform_3(%arg0: i32) -> (i32, i32) {
    %c0_i32 = arith.constant 0 : i32
    %c0_i32_0 = arith.constant 0 : i32
    %c0_i32_1 = arith.constant 0 : i32
    return %c0_i32, %c0_i32_0 : i32, i32
  }
  func.func @transform_4(%arg0: i32) -> (i32, i32, i32) {
    %c0_i32 = arith.constant 0 : i32
    %c0_i32_0 = arith.constant 0 : i32
    %c0_i32_1 = arith.constant 0 : i32
    return %arg0, %c0_i32, %c0_i32_0 : i32, i32, i32
  }
  func.func @transform_5(%arg0: i32) -> (i32, i32, i32) {
    %c0_i32 = arith.constant 0 : i32
    %c0_i32_0 = arith.constant 0 : i32
    %c0_i32_1 = arith.constant 0 : i32
    return %arg0, %c0_i32, %c0_i32_0 : i32, i32, i32
  }
  func.func @transform_6(%arg0: i32) -> (i32, i32, i32) {
    %c0_i32 = arith.constant 0 : i32
    %c0_i32_0 = arith.constant 0 : i32
    %c0_i32_1 = arith.constant 0 : i32
    return %arg0, %c0_i32, %c0_i32_0 : i32, i32, i32
  }
  func.func @transform_7(%arg0: i32) -> (i32, i32, i32, i32) {
    %c0_i32 = arith.constant 0 : i32
    %c0_i32_0 = arith.constant 0 : i32
    %c0_i32_1 = arith.constant 0 : i32
    %c0_i32_2 = arith.constant 0 : i32
    return %arg0, %c0_i32, %c0_i32_0, %c0_i32_1 : i32, i32, i32, i32
  }
  func.func @transform_8(%arg0: i32) -> (i32, i32, i32) {
    %c0_i32 = arith.constant 0 : i32
    %c0_i32_0 = arith.constant 0 : i32
    %c0_i32_1 = arith.constant 0 : i32
    return %arg0, %c0_i32, %c0_i32_0 : i32, i32, i32
  }
  func.func @transform_9(%arg0: i32) -> (i32, i32, i32) {
    %c0_i32 = arith.constant 0 : i32
    %c0_i32_0 = arith.constant 0 : i32
    %c0_i32_1 = arith.constant 0 : i32
    return %arg0, %c0_i32, %c0_i32_0 : i32, i32, i32
  }
  func.func @transform_10(%arg0: i32) -> (i32, i32, i32) {
    %c0_i32 = arith.constant 0 : i32
    %c0_i32_0 = arith.constant 0 : i32
    %c0_i32_1 = arith.constant 0 : i32
    return %arg0, %c0_i32, %c0_i32_0 : i32, i32, i32
  }
  func.func @transform_11(%arg0: i32) -> (i32, i32, i32) {
    %c0_i32 = arith.constant 0 : i32
    %c0_i32_0 = arith.constant 0 : i32
    %c0_i32_1 = arith.constant 0 : i32
    return %arg0, %c0_i32, %c0_i32_0 : i32, i32, i32
  }
  func.func @transform_12(%arg0: i32) -> (i32, i32, i32) {
    %c0_i32 = arith.constant 0 : i32
    %c0_i32_0 = arith.constant 0 : i32
    %c0_i32_1 = arith.constant 0 : i32
    return %arg0, %c0_i32, %c0_i32_0 : i32, i32, i32
  }
  func.func @transform_13(%arg0: i32) -> (i32, i32, i32) {
    %c0_i32 = arith.constant 0 : i32
    %c0_i32_0 = arith.constant 0 : i32
    %c0_i32_1 = arith.constant 0 : i32
    return %arg0, %c0_i32, %c0_i32_0 : i32, i32, i32
  }
  func.func @transform_14(%arg0: i32) -> (i32, i32, i32, i32) {
    %c0_i32 = arith.constant 0 : i32
    %c0_i32_0 = arith.constant 0 : i32
    %c0_i32_1 = arith.constant 0 : i32
    %c0_i32_2 = arith.constant 0 : i32
    return %arg0, %c0_i32, %c0_i32_0, %c0_i32_1 : i32, i32, i32, i32
  }
  func.func @transform_15(%arg0: i32) -> (i32, i32, i32) {
    %c0_i32 = arith.constant 0 : i32
    %c0_i32_0 = arith.constant 0 : i32
    %c0_i32_1 = arith.constant 0 : i32
    return %arg0, %c0_i32, %c0_i32_0 : i32, i32, i32
  }
  func.func @transform_16(%arg0: i32) -> (i32, i32, i32) {
    %c0_i32 = arith.constant 0 : i32
    %c0_i32_0 = arith.constant 0 : i32
    %c0_i32_1 = arith.constant 0 : i32
    return %arg0, %c0_i32, %c0_i32_0 : i32, i32, i32
  }
  func.func @transform_17(%arg0: i32) -> (i32, i32, i32) {
    %c0_i32 = arith.constant 0 : i32
    %c0_i32_0 = arith.constant 0 : i32
    %c0_i32_1 = arith.constant 0 : i32
    return %arg0, %c0_i32, %c0_i32_0 : i32, i32, i32
  }
  func.func @transform_18(%arg0: i32) -> (i32, i32, i32) {
    %c0_i32 = arith.constant 0 : i32
    %c0_i32_0 = arith.constant 0 : i32
    %c0_i32_1 = arith.constant 0 : i32
    return %arg0, %c0_i32, %c0_i32_0 : i32, i32, i32
  }
  func.func @transform_19(%arg0: i32) -> (i32, i32, i32) {
    %c0_i32 = arith.constant 0 : i32
    %c0_i32_0 = arith.constant 0 : i32
    %c0_i32_1 = arith.constant 0 : i32
    return %arg0, %c0_i32, %c0_i32_0 : i32, i32, i32
  }
}

</mosaic_0001>

<bundles_post_ra>
// kernel: multi_perceiver_forward.1
= control target key start
LH: loop header
LB: loop body
LE: loop exit
PB: predicated region body
PF: predicated region fallthrough
CT: control target
= control target key end

     0   :  { %vm95_vm0 = vcmask 1043456   ;;  %v8747_v0 = vmov 0.0   ;;  %vm8748_vm1 = vmmov 0   ;;  %vm148_vm2 = vcmask 72704   ;;  %s8751_s22 = smov 112   ;;  %s8753_s28 = smov 64   ;;  %s10112_s1 = inlined_call_operand.vmem [shape: bf16[24,32], index: 1, kind: input, shape index: {}]   ;;  %s10113_s0 = inlined_call_operand.vmem [shape: f32[2,8,24], index: 0, kind: input, shape index: {}]   ;;  %s10114_s3 = inlined_call_operand.vmem [shape: f32[8,9], index: 3, kind: input, shape index: {}]   ;;  %s10115_s4 = inlined_call_operand.vmem [shape: f32[2,16,32], index: 4, kind: input, shape index: {}]   ;;  %s10116_s2 = inlined_call_operand.vmem [shape: f32[1,32], index: 2, kind: input, shape index: {}]   ;;  %s10117_s11 = inlined_call_operand.vmem [shape: f32[2,2,41], index: 11, kind: input, shape index: {}]   ;;  %s10118_s5 = inlined_call_operand.vmem [shape: bf16[2,32,16], index: 5, kind: input, shape index: {}]   ;;  %s10119_s6 = inlined_call_operand.vmem [shape: bf16[2,41,32], index: 6, kind: input, shape index: {}]   ;;  %s10120_s10 = inlined_call_operand.vmem [shape: f32[2,6,32], index: 10, kind: input, shape index: {}]   ;;  %s10121_s7 = inlined_call_operand.vmem [shape: bf16[2,1,16,32], index: 7, kind: input, shape index: {}]   ;;  %s10122_s8 = inlined_call_operand.vmem [shape: bf16[2,32,256], index: 8, kind: input, shape index: {}]   ;;  %s10123_s9 = inlined_call_operand.vmem [shape: bf16[2,128,32], index: 9, kind: input, shape index: {}]   ;;  %s10124_s12 = inlined_call_operand.vmem [shape: f32[2,1,256], index: 12, kind: input, shape index: {}]   ;;  %s10125_s13 = inlined_call_operand.vmem [shape: bf16[2,32,96], index: 13, kind: input, shape index: {}]   ;;  %s10126_s17 = inlined_call_operand.vmem [shape: f32[2,6,32], index: 17, kind: input, shape index: {}]   ;;  %s10127_s14 = inlined_call_operand.vmem [shape: bf16[2,4,8,32], index: 14, kind: input, shape index: {}]   ;;  %s10128_s15 = inlined_call_operand.vmem [shape: bf16[2,32,256], index: 15, kind: input, shape index: {}]   ;;  %s10129_s16 = inlined_call_operand.vmem [shape: bf16[2,128,32], index: 16, kind: input, shape index: {}]   ;;  %s10130_s18 = inlined_call_operand.vmem [shape: f32[2,1,256], index: 18, kind: input, shape index: {}]   ;;  %s10131_s19 = inlined_call_operand.vmem [shape: f32[2,2,32], index: 19, kind: output, shape index: {}]  }
   0x1   :  { %10139 = sst [smem:[#allocation2_spill]] %s10112_s1  ;;  %7572 = vmatprep.subr.bf16.mxu1 %v8747_v0  ;;  %7576 = vmatprep.mubr.msk.bf16.mxu1 %vm8748_vm1, %v8747_v0  ;;  %vm141_vm3 = vcmask 261120   ;;  %vm91_vm4 = vcmask 195584   ;;  %v7027_v17 = vld [vmem:[%s10116_s2] ss:$0 sm:$0xff]  ;;  %v220_v50 = vlaneseq  ;;  %vm341_vm5 = vcmask 1044480  }
   0x2   :  { %10140 = sst [smem:[#allocation3_spill]] %s10113_s0  ;;  %s10143_s20 = sld [smem:[#allocation2_spill]]  ;;  %7588 = vmatprep.subr.bf16.mxu0 %v8747_v0  ;;  %7590 = vmatprep.mubr.msk.bf16.mxu0 %vm8748_vm1, %v8747_v0  ;;  %v192_v53 = vld [vmem:[%s10117_s11] sm:$0x3]  ;;  %v8422_v59 = vld [vmem:[%s10119_s6 + $0x10] sm:$0x1f]  }
   0x3   :  { %10141 = sst [smem:[#allocation4_spill]] %s10114_s3  ;;  %s10144_s23 = sld [smem:[#allocation3_spill]]  ;;  %v8937_v52 = vshrl.u32 %v220_v50, 7  ;;  %v8421_v58 = vld [vmem:[%s10118_s5] sm:$0xff]   ;;  %v8750_v60 = vmov 65535   ;;  %vm446_vm6 = vcmask 130048  }
   0x4   :  { %10142 = sst [smem:[#allocation5_spill]] %s10115_s4  ;;  %s10145_s27 = sld [smem:[#allocation4_spill]]  ;;  %v342_v61 = vsel %vm95_vm0, 4294967295, %v8750_v60  ;;  %vm619_vm7 = vcmask 64512   ;;  %vm3597_vm9 = vcmask 1041409   ;;  %vm3600_vm10 = vcmask 254976  }
   0x5   :  { %s10146_s1 = sld [smem:[#allocation5_spill]]  ;;  %v8943_v54 = vsub.s32 0, %v8937_v52  ;;  %s8749_s3 = smov 96   ;;  %v8951_v56 = vsub.s32 1, %v8937_v52  ;;  %v8965_v62 = vsel %vm341_vm5, %v342_v61, 0  ;;  %vm9214_vm8 = vmpackc.low %vm619_vm7, %vm619_vm7 }
   0x6   :  { %v345_v63 = vand.u32 %v8422_v59, %v8965_v62  ;;  %v8426_v59 = vld [vmem:[%s10119_s6 + $0x8] sm:$0xff]   ;;  %s8754_s29 = smov 120   ;;  %s8755_s30 = smov 88  }
   0x7   :  { %v8946_v55 = vrot.slane %v192_v53, %v8943_v54  ;;  %v8954_v57 = vrot.slane %v192_v53, %v8951_v56  ;;  %s8758_s24 = smov 48   ;;  %s8759_s25 = smov 72  }
   0x8   :  { %v8419_v1 = vld [vmem:[%s10143_s20] sm:$0xff]   ;;  %v8420_v2 = vld [vmem:[%s10143_s20 + $0x8] ss:$0 sps:$4 sm:$0xff]   ;;  %7589 = vmatpush3.bf16.msra.mxu0 %v345_v63  ;;  %s8756_s20 = smov 56   ;;  %s10137_s4 = smov 104  }
   0x9   :  { %v63_v3 = vld [vmem:[%s10144_s23] sm:$0xff]  ;;  %7573 = vmatpush3.bf16.msra.mxu1 %v8419_v1  ;;  %v64_v4 = vld [vmem:[%s10144_s23 + $0x8] sm:$0xff]  ;;  %v97_v7 = vsel %vm95_vm0, %v8420_v2, 0  ;;  %7594 = vmatprep.subr.bf16.mxu0 %v8747_v0  ;;  %s10135_s21 = smov 40  }
   0xa   :  { %v140_v5 = vld [vmem:[%s10145_s27] sm:$0xff]  ;;  %7574 = vmatprep.subr.bf16.mxu1 %v8747_v0  ;;  %v7320_v9 = vpack.c.bf16 %v64_v4, %v63_v3  ;;  %v8424_v1 = vld [vmem:[%s10118_s5 + $0x8] sm:$0xff]  }
   0xb   :  { %v8886_v6 = vld [vmem:[%s10146_s1] sm:$0xff]  ;;  %v149_v8 = vsel %vm148_vm2, %v140_v5, 0.0  ;;  %v8906_v25 = vld [vmem:[%s10146_s1 + $0x8] sm:$0xff] }
   0xc   :  { %150 = vadd.xlane.f32.xlu1 %v149_v8  ;;  %v193_v10 = vsel %vm141_vm3, %v8886_v6, 0.0  ;;  %v196_v27 = vsel %vm141_vm3, %v8906_v25, 0.0 }
   0xd   :  { %7575 = vmatpush3.bf16.msra.mxu1 %v97_v7 }
   0xe   :  { %7580 = vmatprep.subr.bf16.mxu1 %v8421_v58 }
  0x10   :  { %194 = vadd.xlane.f32.xlu1 %v193_v10  ;;  %7577 = vmatmul.mubr.msk.bf16.vlgmr.msra.gmra.mrb[0].mxu1 %vm91_vm4, %v7320_v9 }
  0x11   :  { %7581 = vmatpush3.bf16.msra.mxu1 %v8421_v58 }
  0x12   :  { %7582 = vmatprep.subr.bf16.mxu1 %v8424_v1 }
  0x15   :  { %7583 = vmatpush3.bf16.msra.mxu1 %v8424_v1 }
  0x99   :  { %v151_v11 = vpop.xlane.xlu1 %150 }
  0x9d   :  { %v195_v12 = vpop.xlane.xlu1 %194 }
  0x9e   :  { %v200_v13 = vmul.f32 0.03125, %v195_v12 }
  0xa0   :  { %v8894_v14 = vsub.f32 %v8886_v6, %v200_v13 }
  0xa2   :  { %v204_v15 = vmul.f32 %v8894_v14, %v8894_v14 }
  0xa4   :  { %v206_v16 = vsel %vm141_vm3, %v204_v15, 0.0 }
  0xa5   :  { %207 = vadd.xlane.f32.xlu1 %v206_v16 }
  0xe3   :  { %v133_v18 = vpop.f32.mrb[0].mxu1 }
  0xe4   :  { %v134_v19 = vadd.f32 %v7027_v17, %v133_v18  ;;  %v7578_v20 = vpop.f32.mrb[1].mxu1 }
  0xe5   :  { %v136_v21 = vpop.f32.mrb[2].mxu1  ;;  %v7145_v20 = vld [vmem:[%s10117_s11 + $0x2] sm:$0x3]  ;;  %s8757_s11 = smov 80  }
  0xe6   :  { %v137_v22 = vadd.f32 %v7027_v17, %v136_v21  ;;  %v7579_v23 = vpop.f32.mrb[3].mxu1  ;;  %v142_v24 = vsel %vm141_vm3, %v134_v19, 0.0 }
  0xe7   :  { %143 = vadd.xlane.f32.xlu0 %v142_v24  ;;  %v8978_v23 = vld [vmem:[%s10120_s10] sm:$0x3f] }
  0xe8   :  { %v145_v26 = vsel %vm141_vm3, %v137_v22, 0.0 }
  0xeb   :  { %146 = vadd.xlane.f32.xlu0 %v145_v26 }
  0xef   :  { %197 = vadd.xlane.f32.xlu0 %v196_v27 }
 0x132   :  { %v208_v2 = vpop.xlane.xlu1 %207 }
 0x133   :  { %v212_v4 = vmul.f32 0.03125, %v208_v2 }
 0x135   :  { %v214_v9 = vadd.f32 1e-05, %v212_v4 }
 0x137   :  { %8493 = vrsqrt.f32 %v214_v9 }
 0x141   :  { %v8494_v21 = vpop.eup %8493 }
 0x174   :  { %v144_v28 = vpop.xlane.xlu0 %143 }
 0x175   :  { %v152_v29 = vadd.f32 %v151_v11, %v144_v28  ;;  %v8985_v28 = vrot.slane %v7145_v20, %v8943_v54 }
 0x177   :  { %v155_v30 = vmul.f32 0.024390243, %v152_v29  ;;  %v218_v29 = vmul.f32 %v8494_v21, %v8894_v14  ;;  %v229_v14 = vrot.slane %v8978_v23, %v8951_v56 }
 0x178   :  { %v147_v31 = vpop.xlane.xlu0 %146 }
 0x179   :  { %v8911_v32 = vsub.f32 %v134_v19, %v155_v30  ;;  %v8913_v33 = vsub.f32 %v140_v5, %v155_v30  ;;  %v153_v34 = vadd.f32 %v151_v11, %v147_v31  ;;  %v223_v30 = vrot.slane %v8978_v23, %v8943_v54 }
 0x17b   :  { %v156_v35 = vmul.f32 0.024390243, %v153_v34  ;;  %v159_v36 = vmul.f32 %v8911_v32, %v8911_v32  ;;  %v169_v41 = vmul.f32 %v8913_v33, %v8913_v33 }
 0x17c   :  { %v198_v37 = vpop.xlane.xlu0 %197 }
 0x17d   :  { %v8917_v38 = vsub.f32 %v137_v22, %v156_v35  ;;  %v8919_v39 = vsub.f32 %v140_v5, %v156_v35  ;;  %v161_v40 = vsel %vm141_vm3, %v159_v36, 0.0  ;;  %v201_v42 = vmul.f32 0.03125, %v198_v37 }
 0x17e   :  { %162 = vadd.xlane.f32.xlu1 %v161_v40  ;;  %v171_v45 = vsel %vm148_vm2, %v169_v41, 0.0  ;;  %v8997_v37 = vrot.slane %v7145_v20, %v8951_v56 }
 0x17f   :  { %v160_v43 = vmul.f32 %v8917_v38, %v8917_v38  ;;  %v8927_v44 = vsub.f32 %v8906_v25, %v201_v42  ;;  %v170_v47 = vmul.f32 %v8919_v39, %v8919_v39 }
 0x181   :  { %v164_v46 = vsel %vm141_vm3, %v160_v43, 0.0  ;;  %v205_v48 = vmul.f32 %v8927_v44, %v8927_v44  ;;  %v174_v49 = vsel %vm148_vm2, %v170_v47, 0.0  ;;  %v224_v43 = vmul.f32 %v223_v30, %v218_v29 }
 0x182   :  { %172 = vadd.xlane.f32.xlu1 %v171_v45  ;;  %165 = vadd.xlane.f32.xlu0 %v164_v46 }
 0x183   :  { %v209_v51 = vsel %vm141_vm3, %v205_v48, 0.0 }
 0x186   :  { %175 = vadd.xlane.f32.xlu0 %v174_v49  ;;  %v8425_v49 = vld [vmem:[%s10119_s6] sm:$0xff]  }
 0x18a   :  { %210 = vadd.xlane.f32.xlu0 %v209_v51  ;;  %v230_v51 = vadd.f32 %v229_v14, %v224_v43 }
 0x193   :  { %245 = vrot.lane.b32.xlu1 %v8946_v55, %s8749_s3 }
 0x1a0   :  { %251 = vrot.lane.b32.xlu0 %v8954_v57, %s8749_s3 }
 0x20b   :  { %v163_v3 = vpop.xlane.xlu1 %162 }
 0x20f   :  { %v173_v5 = vpop.xlane.xlu1 %172  ;;  %v166_v7 = vpop.xlane.xlu0 %165 }
 0x210   :  { %v177_v8 = vadd.f32 %v173_v5, %v163_v3 }
 0x212   :  { %v179_v10 = vmul.f32 0.024390243, %v177_v8 }
 0x213   :  { %v176_v11 = vpop.xlane.xlu0 %175  ;;  %v246_v27 = vpop.permute.xlu1 %245 }
 0x214   :  { %v181_v12 = vadd.f32 1e-05, %v179_v10  ;;  %v178_v13 = vadd.f32 %v176_v11, %v166_v7 }
 0x216   :  { %8495 = vrsqrt.f32 %v181_v12  ;;  %v180_v15 = vmul.f32 0.024390243, %v178_v13 }
 0x217   :  { %v211_v16 = vpop.xlane.xlu0 %210 }
 0x218   :  { %v182_v17 = vadd.f32 1e-05, %v180_v15  ;;  %v213_v18 = vmul.f32 0.03125, %v211_v16 }
 0x21a   :  { %8497 = vrsqrt.f32 %v182_v17  ;;  %v215_v19 = vadd.f32 1e-05, %v213_v18 }
 0x21c   :  { %8499 = vrsqrt.f32 %v215_v19 }
 0x220   :  { %v8496_v22 = vpop.eup %8495 }
 0x221   :  { %v185_v24 = vmul.f32 %v8496_v22, %v8911_v32  ;;  %v8982_v26 = vmul.f32 %v8496_v22, %v8913_v33  ;;  %v252_v32 = vpop.permute.xlu0 %251 }
 0x223   :  { %v248_v34 = vmul.f32 %v246_v27, %v8982_v26  ;;  %v3651_v33 = vmul.f32 %v8985_v28, %v185_v24  ;;  %v236_v61 = vmul.f32 %v8946_v55, %v185_v24 }
 0x224   :  { %v8498_v31 = vpop.eup %8497 }
 0x225   :  { %v186_v35 = vmul.f32 %v8498_v31, %v8917_v38  ;;  %v8993_v36 = vmul.f32 %v8498_v31, %v8919_v39  ;;  %v254_v45 = vadd.f32 %v252_v32, %v248_v34  ;;  %v9005_v47 = vadd.f32 %v8997_v37, %v3651_v33 }
 0x226   :  { %v8500_v40 = vpop.eup %8499  ;;  %v242_v1 = vadd.f32 %v8954_v57, %v236_v61 }
 0x227   :  { %v249_v41 = vmul.f32 %v246_v27, %v8993_v36  ;;  %v219_v42 = vmul.f32 %v8500_v40, %v8927_v44  ;;  %v3652_v38 = vmul.f32 %v8985_v28, %v186_v35  ;;  %v237_v60 = vmul.f32 %v8946_v55, %v186_v35 }
 0x229   :  { %v255_v39 = vadd.f32 %v252_v32, %v249_v41  ;;  %v225_v46 = vmul.f32 %v223_v30, %v219_v42  ;;  %v9008_v48 = vadd.f32 %v8997_v37, %v3652_v38  ;;  %v243_v63 = vadd.f32 %v8954_v57, %v237_v60 }
 0x22b   :  { %v332_v50 = vpack.c.bf16 %v255_v39, %v254_v45  ;;  %v231_v53 = vadd.f32 %v229_v14, %v225_v46  ;;  %v3748_v44 = vpack.c.bf16 %v9008_v48, %v9005_v47  ;;  %v331_v2 = vpack.c.bf16 %v243_v63, %v242_v1  ;;  %v8457_v47 = vld [vmem:[%s10129_s16 + $0x18] sm:$0xff]   ;;  %v8458_v48 = vld [vmem:[%s10129_s16 + $0x20] sm:$0xff]  }
 0x22d   :  { %7591 = vmatmul.mubr.msk.bf16.vlgmr.msra.gmra.mrb[0].mxu0 %vm148_vm2, %v332_v50  ;;  %v256_v58 = vpack.c.bf16 %v231_v53, %v230_v51 }
 0x22e   :  { %7595 = vmatpush3.bf16.msra.mxu0 %v8425_v49  ;;  %7598 = vmatprep.mubr.msk.bf16.mxu0 %vm8748_vm1, %v8747_v0 }
 0x22f   :  { %7584 = vmatprep.mubr.msk.bf16.mxu1 %vm141_vm3, %v256_v58  ;;  %7596 = vmatprep.subr.bf16.mxu0 %v8747_v0 }
 0x230   :  { %7585 = vmatmul.mubr.msk.bf16.vlgmr.msra.gmra.mrb[4].mxu1 %vm141_vm3, %v256_v58 }
 0x232   :  { %7597 = vmatpush3.bf16.msra.mxu0 %v8426_v59 }
 0x239   :  { %7599 = vmatmul.mubr.msk.bf16.vlgmr.msra.gmra.mrb[0].mxu0 %vm141_vm3, %v331_v2 }
 0x303   :  { %v7586_v3 = vpop.f32.mrb[4].mxu1 }
 0x304   :  { %v310_v4 = vpop.f32.mrb[5].mxu1 }
 0x305   :  { %v7587_v5 = vpop.f32.mrb[6].mxu1  ;;  %7604 = vmatprep.mubr.msk.f32.mxu1 %vm446_vm6, %v310_v4 }
 0x306   :  { %v313_v7 = vpop.f32.mrb[7].mxu1 }
 0x30c   :  { %v437_v8 = vpop.f32.mrb[0].mxu0 }
 0x30d   :  { %v7600_v9 = vpop.f32.mrb[1].mxu0  ;;  %7602 = vmatprep.subr.msk.mxu1 %vm446_vm6, %v437_v8 }
 0x30e   :  { %v440_v55 = vpop.f32.mrb[2].mxu0  ;;  %7603 = vmatpush3.xpose.msk.msra.mxu1 %vm446_vm6, %v437_v8  ;;  %v8427_v9 = vld [vmem:[%s10121_s7] sm:$0xff]  }
 0x30f   :  { %v7601_v10 = vpop.f32.mrb[3].mxu0  ;;  %7607 = vmatprep.subr.msk.mxu1 %vm446_vm6, %v440_v55  ;;  %7622 = vmatprep.subr.bf16.mxu0 %v8427_v9 }
 0x310   :  { %7623 = vmatpush3.bf16.msra.mxu0 %v8427_v9 }
 0x311   :  { %7605 = vmatmul.mubr.msk.f32.vlgmr.msra.gmra.mrb[8].mxu1 %vm446_vm6, %v313_v7 }
 0x312   :  { %7608 = vmatpush3.xpose.msk.msra.mxu1 %vm446_vm6, %v440_v55  ;;  %7609 = vmatprep.mubr.msk.f32.mxu1 %vm446_vm6, %v7586_v3 }
 0x315   :  { %7610 = vmatmul.mubr.msk.f32.vlgmr.msra.gmra.mrb[10].mxu1 %vm446_vm6, %v7587_v5 }
 0x3e4   :  { %v7606_v57 = vpop.f32.mrb[8].mxu1 }
 0x3e5   :  { %v616_v11 = vmul.f32 0.25, %v7606_v57  ;;  %v522_v12 = vpop.f32.mrb[9].mxu1 }
 0x3e6   :  { %v615_v13 = vmul.f32 0.25, %v522_v12 }
 0x3e7   :  { %v623_v15 = vsel %vm619_vm7, %v616_v11, -inf }
 0x3e8   :  { %624 = vmax.xlane.f32.xlu0 %v623_v15  ;;  %v7611_v16 = vpop.f32.mrb[10].mxu1  ;;  %v620_v17 = vsel %vm619_vm7, %v615_v13, -inf  ;;  %v9057_v15 = vsub.s32 2, %v8937_v52 }
 0x3e9   :  { %v618_v18 = vmul.f32 0.25, %v7611_v16  ;;  %621 = vmax.xlane.f32.xlu1 %v620_v17  ;;  %v606_v19 = vpop.f32.mrb[11].mxu1 }
 0x3ea   :  { %v617_v20 = vmul.f32 0.25, %v606_v19  ;;  %v837_v16 = vrot.slane %v8978_v23, %v9057_v15 }
 0x3eb   :  { %v629_v21 = vsel %vm619_vm7, %v618_v18, -inf }
 0x3ec   :  { %630 = vmax.xlane.f32.xlu0 %v629_v21  ;;  %v626_v22 = vsel %vm619_vm7, %v617_v20, -inf }
 0x3ed   :  { %627 = vmax.xlane.f32.xlu1 %v626_v22 }
 0x475   :  { %v625_v24 = vpop.xlane.xlu0 %624 }
 0x476   :  { %v633_v27 = vsub.f32 %v616_v11, %v625_v24  ;;  %v622_v29 = vpop.xlane.xlu1 %621 }
 0x477   :  { %v632_v30 = vsub.f32 %v615_v13, %v622_v29 }
 0x478   :  { %v638_v31 = vmul.f32 1.442695, %v633_v27 }
 0x479   :  { %v636_v34 = vmul.f32 1.442695, %v632_v30  ;;  %v631_v35 = vpop.xlane.xlu0 %630 }
 0x47a   :  { %8501 = vpow2.f32 %v638_v31  ;;  %v635_v32 = vsub.f32 %v618_v18, %v631_v35  ;;  %v628_v33 = vpop.xlane.xlu1 %627 }
 0x47b   :  { %8503 = vpow2.f32 %v636_v34  ;;  %v634_v40 = vsub.f32 %v617_v20, %v628_v33 }
 0x47c   :  { %v642_v14 = vmul.f32 1.442695, %v635_v32 }
 0x47d   :  { %v640_v41 = vmul.f32 1.442695, %v634_v40 }
 0x47e   :  { %8505 = vpow2.f32 %v642_v14 }
 0x47f   :  { %8507 = vpow2.f32 %v640_v41 }
 0x484   :  { %v8502_v42 = vpop.eup %8501 }
 0x485   :  { %v8504_v43 = vpop.eup %8503  ;;  %v647_v38 = vsel %vm619_vm7, %v8502_v42, 0.0 }
 0x486   :  { %648 = vadd.xlane.f32.xlu0 %v647_v38  ;;  %v644_v45 = vsel %vm619_vm7, %v8504_v43, 0.0 }
 0x487   :  { %645 = vadd.xlane.f32.xlu1 %v644_v45 }
 0x488   :  { %v8506_v39 = vpop.eup %8505 }
 0x489   :  { %v8508_v46 = vpop.eup %8507  ;;  %v653_v49 = vsel %vm619_vm7, %v8506_v39, 0.0 }
 0x48a   :  { %654 = vadd.xlane.f32.xlu0 %v653_v49  ;;  %v650_v50 = vsel %vm619_vm7, %v8508_v46, 0.0 }
 0x48b   :  { %651 = vadd.xlane.f32.xlu1 %v650_v50 }
 0x49c   :  { %664 = vrot.lane.b32.xlu1 %v437_v8, %s8751_s22 }
 0x4a0   :  { %748 = vrot.lane.b32.xlu0 %v440_v55, %s8751_s22 }
 0x513   :  { %v649_v51 = vpop.xlane.xlu0 %648 }
 0x514   :  { %8509 = vrcp.f32 %v649_v51  ;;  %v646_v53 = vpop.xlane.xlu1 %645 }
 0x515   :  { %8511 = vrcp.f32 %v646_v53 }
 0x517   :  { %v655_v58 = vpop.xlane.xlu0 %654 }
 0x518   :  { %8513 = vrcp.f32 %v655_v58  ;;  %v652_v59 = vpop.xlane.xlu1 %651 }
 0x519   :  { %8515 = vrcp.f32 %v652_v59 }
 0x51b   :  { %v749_v63 = vpop.permute.xlu0 %748 }
 0x51c   :  { %v665_v60 = vpop.permute.xlu1 %664 }
 0x51d   :  { %7612 = vmatprep.subr.mxu1 %v665_v60 }
 0x51e   :  { %v8510_v61 = vpop.eup %8509  ;;  %7613 = vmatpush3.msra.mxu1 %v665_v60 }
 0x51f   :  { %v8512_v1 = vpop.eup %8511  ;;  %7617 = vmatprep.subr.mxu1 %v749_v63  ;;  %v661_v3 = vmul.f32 %v8510_v61, %v8502_v42 }
 0x520   :  { %v660_v2 = vmul.f32 %v8512_v1, %v8504_v43 }
 0x522   :  { %v8514_v4 = vpop.eup %8513  ;;  %7614 = vmatprep.mubr.msk.f32.mxu1 %vm619_vm7, %v660_v2  ;;  %v8430_v2 = vld [vmem:[%s10122_s8 + $0x4] ss:$8 sps:$4 sm:$0xff]  }
 0x523   :  { %v8516_v5 = vpop.eup %8515  ;;  %7615 = vmatmul.mubr.msk.f32.vlgmr.msra.gmra.mrb[12].mxu1 %vm619_vm7, %v661_v3  ;;  %v663_v8 = vmul.f32 %v8514_v4, %v8506_v39  ;;  %v8428_v3 = vld [vmem:[%s10122_s8] ss:$8 sps:$4 sm:$0xff]   ;;  %v8431_v4 = vld [vmem:[%s10122_s8 + $0x10] ss:$8 sps:$4 sm:$0xff]  }
 0x524   :  { %7618 = vmatpush3.msra.mxu1 %v749_v63  ;;  %v662_v7 = vmul.f32 %v8516_v5, %v8508_v46  ;;  %v8433_v5 = vld [vmem:[%s10122_s8 + $0x14] ss:$8 sps:$4 sm:$0xff]  }
 0x525   :  { %1031 = vmatprep.subr.bf16.mxu1 %v8430_v2  ;;  %v8441_v2 = vld [vmem:[%s10123_s9 + $0x38] sm:$0xff]  }
 0x526   :  { %7619 = vmatprep.mubr.msk.f32.mxu1 %vm619_vm7, %v662_v7  ;;  %v8752_v7 = vmov 0  }
 0x527   :  { %7620 = vmatmul.mubr.msk.f32.vlgmr.msra.gmra.mrb[14].mxu1 %vm619_vm7, %v663_v8 }
 0x528   :  { %1032 = vmatpush1.bf16.msra.mxu1 %v8428_v3  ;;  %1063 = vmatprep.mubr.bf16.mxu1 %v8752_v7  ;;  %v907_v3 = vld [vmem:[%s10124_s12] sm:$0x3] }
 0x529   :  { %1033 = vmatprep.subr.bf16.mxu1 %v8433_v5 }
 0x52c   :  { %1034 = vmatpush1.bf16.msra.mxu1 %v8431_v4  ;;  %v1002_v4 = vrot.slane %v907_v3, %v8951_v56 }
 0x5f6   :  { %v7616_v55 = vpop.f32.mrb[12].mxu1 }
 0x5f7   :  { %v739_v10 = vpop.f32.mrb[13].mxu1 }
 0x5f8   :  { %v832_v57 = vpack.c.bf16 %v7616_v55, %v739_v10 }
 0x5fa   :  { %v7621_v11 = vpop.f32.mrb[14].mxu1  ;;  %7624 = vmatprep.mubr.msk.bf16.mxu0 %vm446_vm6, %v832_v57 }
 0x5fb   :  { %v823_v12 = vpop.f32.mrb[15].mxu1 }
 0x5fc   :  { %v833_v13 = vpack.c.bf16 %v7621_v11, %v823_v12 }
 0x5fe   :  { %7625 = vmatmul.mubr.msk.bf16.vlgmr.msra.gmra.mrb[4].mxu0 %vm446_vm6, %v833_v13 }
 0x6d1   :  { %v7626_v17 = vpop.f32.mrb[4].mxu0 }
 0x6d2   :  { %v884_v18 = vpop.f32.mrb[5].mxu0  ;;  %v893_v19 = vadd.f32 %v7626_v17, %v837_v16 }
 0x6d3   :  { %v885_v20 = vadd.f32 %v884_v18, %v837_v16  ;;  %v7627_v21 = vpop.f32.mrb[6].mxu0 }
 0x6d4   :  { %v887_v22 = vpop.f32.mrb[7].mxu0  ;;  %v896_v27 = vadd.f32 %v7627_v21, %v837_v16  ;;  %v9065_v30 = vadd.f32 %v893_v19, %v8886_v6 }
 0x6d5   :  { %v9062_v24 = vadd.f32 %v885_v20, %v8886_v6  ;;  %v888_v29 = vadd.f32 %v887_v22, %v837_v16  ;;  %v9103_v20 = vsub.s32 3, %v8937_v52  ;;  %v9108_v22 = vsub.s32 4, %v8937_v52 }
 0x6d6   :  { %v9073_v35 = vadd.f32 %v896_v27, %v8906_v25  ;;  %v930_v33 = vsel %vm141_vm3, %v9065_v30, 0.0 }
 0x6d7   :  { %v9068_v31 = vadd.f32 %v888_v29, %v8906_v25  ;;  %v924_v34 = vsel %vm141_vm3, %v9062_v24, 0.0  ;;  %v979_v21 = vrot.slane %v8978_v23, %v9103_v20 }
 0x6d8   :  { %925 = vadd.xlane.f32.xlu1 %v924_v34  ;;  %v933_v6 = vsel %vm141_vm3, %v9073_v35, 0.0 }
 0x6d9   :  { %v927_v32 = vsel %vm141_vm3, %v9068_v31, 0.0 }
 0x6da   :  { %928 = vadd.xlane.f32.xlu0 %v927_v32 }
 0x6dc   :  { %931 = vadd.xlane.f32.xlu1 %v930_v33 }
 0x6de   :  { %934 = vadd.xlane.f32.xlu0 %v933_v6  ;;  %v987_v6 = vrot.slane %v8978_v23, %v9108_v22 }
 0x765   :  { %v926_v40 = vpop.xlane.xlu1 %925 }
 0x766   :  { %v936_v14 = vmul.f32 0.03125, %v926_v40 }
 0x767   :  { %v929_v41 = vpop.xlane.xlu0 %928 }
 0x768   :  { %v940_v42 = vsub.f32 %v9062_v24, %v936_v14  ;;  %v937_v43 = vmul.f32 0.03125, %v929_v41 }
 0x769   :  { %v932_v25 = vpop.xlane.xlu1 %931 }
 0x76a   :  { %v941_v38 = vsub.f32 %v9068_v31, %v937_v43  ;;  %v938_v45 = vmul.f32 0.03125, %v932_v25  ;;  %v944_v39 = vmul.f32 %v940_v42, %v940_v42 }
 0x76b   :  { %v935_v46 = vpop.xlane.xlu0 %934 }
 0x76c   :  { %v942_v49 = vsub.f32 %v9065_v30, %v938_v45  ;;  %v939_v50 = vmul.f32 0.03125, %v935_v46  ;;  %v948_v51 = vsel %vm141_vm3, %v944_v39, 0.0  ;;  %v945_v53 = vmul.f32 %v941_v38, %v941_v38 }
 0x76d   :  { %949 = vadd.xlane.f32.xlu1 %v948_v51 }
 0x76e   :  { %v943_v58 = vsub.f32 %v9073_v35, %v939_v50  ;;  %v951_v59 = vsel %vm141_vm3, %v945_v53, 0.0  ;;  %v946_v60 = vmul.f32 %v942_v49, %v942_v49 }
 0x76f   :  { %952 = vadd.xlane.f32.xlu0 %v951_v59  ;;  %v8434_v59 = vld [vmem:[%s10123_s9] sm:$0xff]  }
 0x770   :  { %v954_v61 = vsel %vm141_vm3, %v946_v60, 0.0  ;;  %v947_v63 = vmul.f32 %v943_v58, %v943_v58  ;;  %7628 = vmatprep.subr.bf16.mxu0 %v8434_v59  ;;  %v8437_v60 = vld [vmem:[%s10123_s9 + $0x18] sm:$0xff]  }
 0x771   :  { %955 = vadd.xlane.f32.xlu1 %v954_v61  ;;  %7629 = vmatpush3.bf16.msra.mxu0 %v8434_v59  ;;  %v8438_v61 = vld [vmem:[%s10123_s9 + $0x20] sm:$0xff]   ;;  %v998_v59 = vrot.slane %v907_v3, %v8943_v54 }
 0x772   :  { %v957_v1 = vsel %vm141_vm3, %v947_v63, 0.0  ;;  %v8439_v63 = vld [vmem:[%s10123_s9 + $0x28] sm:$0xff]  }
 0x773   :  { %958 = vadd.xlane.f32.xlu0 %v957_v1  ;;  %v8440_v1 = vld [vmem:[%s10123_s9 + $0x30] sm:$0xff]  }
 0x7fa   :  { %v950_v8 = vpop.xlane.xlu1 %949 }
 0x7fb   :  { %v960_v9 = vmul.f32 0.03125, %v950_v8 }
 0x7fc   :  { %v953_v55 = vpop.xlane.xlu0 %952 }
 0x7fd   :  { %v964_v10 = vadd.f32 1e-05, %v960_v9  ;;  %v961_v57 = vmul.f32 0.03125, %v953_v55 }
 0x7fe   :  { %v956_v11 = vpop.xlane.xlu1 %955 }
 0x7ff   :  { %8517 = vrsqrt.f32 %v964_v10  ;;  %v965_v12 = vadd.f32 1e-05, %v961_v57  ;;  %v962_v13 = vmul.f32 0.03125, %v956_v11 }
 0x800   :  { %v959_v16 = vpop.xlane.xlu0 %958 }
 0x801   :  { %8519 = vrsqrt.f32 %v965_v12  ;;  %v966_v17 = vadd.f32 1e-05, %v962_v13  ;;  %v963_v18 = vmul.f32 0.03125, %v959_v16 }
 0x803   :  { %8521 = vrsqrt.f32 %v966_v17  ;;  %v967_v19 = vadd.f32 1e-05, %v963_v18 }
 0x805   :  { %8523 = vrsqrt.f32 %v967_v19 }
 0x809   :  { %v8518_v27 = vpop.eup %8517 }
 0x80a   :  { %v972_v29 = vmul.f32 %v8518_v27, %v940_v42 }
 0x80b   :  { %v8520_v34 = vpop.eup %8519 }
 0x80c   :  { %v980_v32 = vmul.f32 %v979_v21, %v972_v29  ;;  %v973_v33 = vmul.f32 %v8520_v34, %v941_v38 }
 0x80d   :  { %v8522_v40 = vpop.eup %8521 }
 0x80e   :  { %v981_v14 = vmul.f32 %v979_v21, %v973_v33  ;;  %v988_v43 = vadd.f32 %v987_v6, %v980_v32  ;;  %v974_v45 = vmul.f32 %v8522_v40, %v942_v49  ;;  %v8435_v49 = vld [vmem:[%s10123_s9 + $0x8] sm:$0xff]  }
 0x80f   :  { %v8524_v41 = vpop.eup %8523  ;;  %7630 = vmatprep.subr.bf16.mxu0 %v8435_v49 }
 0x810   :  { %v989_v25 = vadd.f32 %v987_v6, %v981_v14  ;;  %v975_v39 = vmul.f32 %v8524_v41, %v943_v58  ;;  %v982_v51 = vmul.f32 %v979_v21, %v974_v45  ;;  %7631 = vmatpush3.bf16.msra.mxu0 %v8435_v49  ;;  %v8436_v58 = vld [vmem:[%s10123_s9 + $0x10] sm:$0xff]  }
 0x811   :  { %7632 = vmatprep.subr.bf16.mxu0 %v8436_v58 }
 0x812   :  { %v992_v46 = vpack.c.bf16 %v989_v25, %v988_v43  ;;  %v983_v50 = vmul.f32 %v979_v21, %v975_v39  ;;  %v990_v53 = vadd.f32 %v987_v6, %v982_v51 }
 0x814   :  { %7058 = vmatmul.mubr.msk.bf16.vlgmr.msra.gmra.mrb[16].mxu1 %vm141_vm3, %v992_v46  ;;  %v991_v42 = vadd.f32 %v987_v6, %v983_v50  ;;  %7633 = vmatpush3.bf16.msra.mxu0 %v8436_v58 }
 0x815   :  { %1073 = vmatprep.mubr.bf16.mxu1 %v8752_v7  ;;  %7634 = vmatprep.subr.bf16.mxu0 %v8437_v60 }
 0x816   :  { %v993_v38 = vpack.c.bf16 %v991_v42, %v990_v53 }
 0x818   :  { %7635 = vmatpush3.bf16.msra.mxu0 %v8437_v60 }
 0x819   :  { %7636 = vmatprep.subr.bf16.mxu0 %v8438_v61 }
 0x81c   :  { %7059 = vmatmul.mubr.msk.bf16.gmra.mrb[20].mxu1 %vm141_vm3, %v993_v38  ;;  %7637 = vmatpush3.bf16.msra.mxu0 %v8438_v61 }
 0x81d   :  { %7638 = vmatprep.subr.bf16.mxu0 %v8439_v63 }
 0x820   :  { %7639 = vmatpush3.bf16.msra.mxu0 %v8439_v63 }
 0x821   :  { %7640 = vmatprep.subr.bf16.mxu0 %v8440_v1 }
 0x824   :  { %7641 = vmatpush3.bf16.msra.mxu0 %v8440_v1 }
 0x825   :  { %7642 = vmatprep.subr.bf16.mxu0 %v8441_v2 }
 0x828   :  { %7643 = vmatpush3.bf16.msra.mxu0 %v8441_v2 }
 0x8e7   :  { %v1065_v5 = vpop.f32.mrb[16].mxu1 }
 0x8e8   :  { %v1067_v8 = vpop.f32.mrb[17].mxu1  ;;  %v1066_v63 = vadd.f32 %v1065_v5, %v998_v59 }
 0x8e9   :  { %v1068_v9 = vadd.f32 %v1067_v8, %v1002_v4  ;;  %v1069_v55 = vpop.f32.mrb[18].mxu1 }
 0x8ea   :  { %v1071_v10 = vpop.f32.mrb[19].mxu1 }
 0x8eb   :  { %v1084_v57 = vmul.f32 %v1068_v9, %v1068_v9  ;;  %v1072_v11 = vadd.f32 %v1071_v10, %v1002_v4 }
 0x8ed   :  { %v1088_v12 = vmul.f32 %v1084_v57, %v1068_v9  ;;  %v1085_v13 = vmul.f32 %v1072_v11, %v1072_v11 }
 0x8ef   :  { %v1092_v16 = vmul.f32 0.044715, %v1088_v12  ;;  %v1089_v17 = vmul.f32 %v1085_v13, %v1072_v11  ;;  %v1075_v18 = vpop.f32.mrb[20].mxu1 }
 0x8f0   :  { %v1077_v19 = vpop.f32.mrb[21].mxu1 }
 0x8f1   :  { %v1096_v21 = vadd.f32 %v1092_v16, %v1068_v9  ;;  %v1093_v27 = vmul.f32 0.044715, %v1089_v17  ;;  %v1078_v29 = vadd.f32 %v1077_v19, %v1002_v4  ;;  %v1079_v34 = vpop.f32.mrb[22].mxu1 }
 0x8f2   :  { %v1081_v32 = vpop.f32.mrb[23].mxu1 }
 0x8f3   :  { %v1100_v33 = vmul.f32 0.7978846, %v1096_v21  ;;  %v1097_v6 = vadd.f32 %v1093_v27, %v1072_v11  ;;  %v1086_v40 = vmul.f32 %v1078_v29, %v1078_v29  ;;  %v1082_v14 = vadd.f32 %v1081_v32, %v1002_v4 }
 0x8f4   :  { %v1070_v4 = vadd.f32 %v1069_v55, %v998_v59  ;;  %v1076_v27 = vadd.f32 %v1075_v18, %v998_v59 }
 0x8f5   :  { %8525 = vtanh.f32 %v1100_v33  ;;  %v1101_v41 = vmul.f32 0.7978846, %v1097_v6  ;;  %v1090_v43 = vmul.f32 %v1086_v40, %v1078_v29  ;;  %v1087_v25 = vmul.f32 %v1082_v14, %v1082_v14 }
 0x8f6   :  { %v1080_v33 = vadd.f32 %v1079_v34, %v998_v59 }
 0x8f7   :  { %8527 = vtanh.f32 %v1101_v41  ;;  %v1094_v45 = vmul.f32 0.044715, %v1090_v43  ;;  %v1091_v39 = vmul.f32 %v1087_v25, %v1082_v14 }
 0x8f9   :  { %v1098_v46 = vadd.f32 %v1094_v45, %v1078_v29  ;;  %v1095_v50 = vmul.f32 0.044715, %v1091_v39 }
 0x8fb   :  { %v1102_v51 = vmul.f32 0.7978846, %v1098_v46  ;;  %v1099_v42 = vadd.f32 %v1095_v50, %v1082_v14 }
 0x8fd   :  { %8529 = vtanh.f32 %v1102_v51  ;;  %v1103_v53 = vmul.f32 0.7978846, %v1099_v42 }
 0x8ff   :  { %v8526_v38 = vpop.eup %8525  ;;  %8531 = vtanh.f32 %v1103_v53 }
 0x900   :  { %v1108_v49 = vadd.f32 1.0, %v8526_v38 }
 0x901   :  { %v8528_v58 = vpop.eup %8527 }
 0x902   :  { %v1109_v60 = vadd.f32 1.0, %v8528_v58  ;;  %v1112_v61 = vmul.f32 0.5, %v1108_v49 }
 0x904   :  { %v1113_v1 = vmul.f32 0.5, %v1109_v60  ;;  %v1116_v2 = vmul.f32 %v1112_v61, %v1068_v9  ;;  %v9145_v9 = vsub.s32 5, %v8937_v52 }
 0x906   :  { %v1117_v8 = vmul.f32 %v1113_v1, %v1072_v11  ;;  %v1120_v10 = vmul.f32 %v1116_v2, %v1066_v63  ;;  %v1129_v55 = vrot.slane %v8978_v23, %v9145_v9 }
 0x907   :  { %v8530_v57 = vpop.eup %8529 }
 0x908   :  { %v1110_v12 = vadd.f32 1.0, %v8530_v57  ;;  %v1121_v13 = vmul.f32 %v1117_v8, %v1070_v4 }
 0x909   :  { %v8532_v16 = vpop.eup %8531 }
 0x90a   :  { %v1114_v17 = vmul.f32 0.5, %v1110_v12  ;;  %v1111_v19 = vadd.f32 1.0, %v8532_v16  ;;  %v1124_v21 = vpack.c.bf16 %v1121_v13, %v1120_v10 }
 0x90c   :  { %v1118_v32 = vmul.f32 %v1114_v17, %v1078_v29  ;;  %v1115_v3 = vmul.f32 0.5, %v1111_v19  ;;  %7644 = vmatprep.mubr.bf16.mxu0 %v1124_v21  ;;  %v8442_v17 = vld [vmem:[%s10125_s13] sm:$0xff]   ;;  %v8443_v19 = vld [vmem:[%s10125_s13 + $0x8] sm:$0xff]  }
 0x90d   :  { %7648 = vmatprep.subr.bf16.mxu1 %v8442_v17 }
 0x90e   :  { %v1119_v6 = vmul.f32 %v1115_v3, %v1082_v14  ;;  %v1122_v40 = vmul.f32 %v1118_v32, %v1076_v27  ;;  %7649 = vmatpush3.bf16.msra.mxu1 %v8442_v17 }
 0x90f   :  { %7650 = vmatprep.subr.bf16.mxu1 %v8443_v19 }
 0x910   :  { %v1123_v5 = vmul.f32 %v1119_v6, %v1080_v33 }
 0x912   :  { %v1125_v41 = vpack.c.bf16 %v1123_v5, %v1122_v40  ;;  %7651 = vmatpush3.bf16.msra.mxu1 %v8443_v19 }
 0x914   :  { %7645 = vmatmul.mubr.bf16.vlgmr.msra.gmra.mrb[8].mxu0 %v1125_v41 }
 0x9e7   :  { %v7646_v11 = vpop.f32.mrb[8].mxu0 }
 0x9e8   :  { %v1212_v43 = vpop.f32.mrb[9].mxu0  ;;  %v1221_v25 = vadd.f32 %v7646_v11, %v1129_v55 }
 0x9e9   :  { %v1213_v45 = vadd.f32 %v1212_v43, %v1129_v55  ;;  %v7647_v18 = vpop.f32.mrb[10].mxu0 }
 0x9ea   :  { %v1215_v29 = vpop.f32.mrb[11].mxu0  ;;  %v1224_v34 = vadd.f32 %v7647_v18, %v1129_v55  ;;  %v9153_v46 = vadd.f32 %v1221_v25, %v9065_v30  ;;  %v1231_v25 = vld [vmem:[%s10126_s17] sm:$0x3f] }
 0x9eb   :  { %v9150_v39 = vadd.f32 %v1213_v45, %v9062_v24  ;;  %v1216_v14 = vadd.f32 %v1215_v29, %v1129_v55  ;;  %v1287_v45 = vrot.slane %v1231_v25, %v8943_v54 }
 0x9ec   :  { %v9161_v50 = vadd.f32 %v1224_v34, %v9073_v35  ;;  %v1238_v24 = vsel %vm141_vm3, %v9153_v46, 0.0 }
 0x9ed   :  { %v9156_v52 = vadd.f32 %v1216_v14, %v9068_v31  ;;  %v1232_v23 = vsel %vm141_vm3, %v9150_v39, 0.0 }
 0x9ee   :  { %1233 = vadd.xlane.f32.xlu1 %v1232_v23  ;;  %v1241_v30 = vsel %vm141_vm3, %v9161_v50, 0.0 }
 0x9ef   :  { %v1235_v51 = vsel %vm141_vm3, %v9156_v52, 0.0 }
 0x9f0   :  { %1236 = vadd.xlane.f32.xlu0 %v1235_v51  ;;  %v1295_v51 = vrot.slane %v1231_v25, %v8951_v56 }
 0x9f2   :  { %1239 = vadd.xlane.f32.xlu1 %v1238_v24 }
 0x9f4   :  { %1242 = vadd.xlane.f32.xlu0 %v1241_v30 }
 0xa7b   :  { %v1234_v31 = vpop.xlane.xlu1 %1233 }
 0xa7c   :  { %v1244_v42 = vmul.f32 0.03125, %v1234_v31 }
 0xa7d   :  { %v1237_v53 = vpop.xlane.xlu0 %1236 }
 0xa7e   :  { %v1248_v38 = vsub.f32 %v9150_v39, %v1244_v42  ;;  %v1245_v59 = vmul.f32 0.03125, %v1237_v53 }
 0xa7f   :  { %v1240_v35 = vpop.xlane.xlu1 %1239 }
 0xa80   :  { %v1249_v49 = vsub.f32 %v9156_v52, %v1245_v59  ;;  %v1246_v58 = vmul.f32 0.03125, %v1240_v35  ;;  %v1252_v60 = vmul.f32 %v1248_v38, %v1248_v38 }
 0xa81   :  { %v1243_v61 = vpop.xlane.xlu0 %1242 }
 0xa82   :  { %v1250_v63 = vsub.f32 %v9153_v46, %v1246_v58  ;;  %v1247_v1 = vmul.f32 0.03125, %v1243_v61  ;;  %v1256_v2 = vsel %vm141_vm3, %v1252_v60, 0.0  ;;  %v1253_v4 = vmul.f32 %v1249_v49, %v1249_v49 }
 0xa83   :  { %1257 = vadd.xlane.f32.xlu1 %v1256_v2 }
 0xa84   :  { %v1251_v8 = vsub.f32 %v9161_v50, %v1247_v1  ;;  %v1259_v10 = vsel %vm141_vm3, %v1253_v4, 0.0  ;;  %v1254_v57 = vmul.f32 %v1250_v63, %v1250_v63 }
 0xa85   :  { %1260 = vadd.xlane.f32.xlu0 %v1259_v10 }
 0xa86   :  { %v1262_v12 = vsel %vm141_vm3, %v1254_v57, 0.0  ;;  %v1255_v13 = vmul.f32 %v1251_v8, %v1251_v8 }
 0xa87   :  { %1263 = vadd.xlane.f32.xlu1 %v1262_v12 }
 0xa88   :  { %v1265_v16 = vsel %vm141_vm3, %v1255_v13, 0.0 }
 0xa89   :  { %1266 = vadd.xlane.f32.xlu0 %v1265_v16 }
 0xb10   :  { %v1258_v21 = vpop.xlane.xlu1 %1257 }
 0xb11   :  { %v1268_v27 = vmul.f32 0.03125, %v1258_v21 }
 0xb12   :  { %v1261_v32 = vpop.xlane.xlu0 %1260 }
 0xb13   :  { %v1272_v3 = vadd.f32 1e-05, %v1268_v27  ;;  %v1269_v33 = vmul.f32 0.03125, %v1261_v32 }
 0xb14   :  { %v1264_v6 = vpop.xlane.xlu1 %1263 }
 0xb15   :  { %8533 = vrsqrt.f32 %v1272_v3  ;;  %v1273_v40 = vadd.f32 1e-05, %v1269_v33  ;;  %v1270_v5 = vmul.f32 0.03125, %v1264_v6 }
 0xb16   :  { %v1267_v41 = vpop.xlane.xlu0 %1266 }
 0xb17   :  { %8535 = vrsqrt.f32 %v1273_v40  ;;  %v1274_v55 = vadd.f32 1e-05, %v1270_v5  ;;  %v1271_v11 = vmul.f32 0.03125, %v1267_v41 }
 0xb19   :  { %8537 = vrsqrt.f32 %v1274_v55  ;;  %v1275_v43 = vadd.f32 1e-05, %v1271_v11 }
 0xb1b   :  { %8539 = vrsqrt.f32 %v1275_v43 }
 0xb1f   :  { %v8534_v18 = vpop.eup %8533 }
 0xb20   :  { %v1280_v29 = vmul.f32 %v8534_v18, %v1248_v38 }
 0xb21   :  { %v8536_v34 = vpop.eup %8535 }
 0xb22   :  { %v1281_v14 = vmul.f32 %v8536_v34, %v1249_v49  ;;  %v1288_v23 = vmul.f32 %v1287_v45, %v1280_v29 }
 0xb23   :  { %v8538_v24 = vpop.eup %8537 }
 0xb24   :  { %v1282_v30 = vmul.f32 %v8538_v24, %v1250_v63  ;;  %v1289_v31 = vmul.f32 %v1287_v45, %v1281_v14  ;;  %v1296_v35 = vadd.f32 %v1295_v51, %v1288_v23 }
 0xb25   :  { %v8540_v42 = vpop.eup %8539 }
 0xb26   :  { %v1290_v53 = vmul.f32 %v1287_v45, %v1282_v30  ;;  %v1283_v59 = vmul.f32 %v8540_v42, %v1251_v8  ;;  %v1297_v58 = vadd.f32 %v1295_v51, %v1289_v31 }
 0xb28   :  { %v1291_v60 = vmul.f32 %v1287_v45, %v1283_v59  ;;  %v1300_v61 = vpack.c.bf16 %v1297_v58, %v1296_v35  ;;  %v1298_v1 = vadd.f32 %v1295_v51, %v1290_v53 }
 0xb2a   :  { %7652 = vmatprep.mubr.msk.bf16.mxu1 %vm141_vm3, %v1300_v61  ;;  %v1299_v2 = vadd.f32 %v1295_v51, %v1291_v60 }
 0xb2c   :  { %v1301_v38 = vpack.c.bf16 %v1299_v2, %v1298_v1 }
 0xb2e   :  { %7653 = vmatmul.mubr.msk.bf16.vlgmr.msra.gmra.mrb[24].mxu1 %vm141_vm3, %v1301_v38 }
 0xc01   :  { %v9190_v49 = vpop.f32.mrb[24].mxu1 }
 0xc02   :  { %v9192_v4 = vpop.f32.mrb[25].mxu1 }
 0xc03   :  { %v9194_v63 = vpop.f32.mrb[26].mxu1  ;;  %7660 = vmatprep.mubr.msk.f32.mxu1 %vm619_vm7, %v9192_v4 }
 0xc04   :  { %v9198_v8 = vpop.f32.mrb[27].mxu1  ;;  %v9202_v10 = vpack.i.bf16 %v9194_v63, %v9190_v49 }
 0xc05   :  { %v9206_v57 = vpack.i.bf16 %v9198_v8, %v9192_v4 }
 0xc06   :  { %8265 = vrot.lane.b32.xlu0 %v9202_v10, %s8749_s3 }
 0xc07   :  { %8260 = vrot.lane.b32.xlu1 %v9206_v57, %s8749_s3 }
 0xc78   :  { %v8266_v12 = vpop.permute.xlu0 %8265 }
 0xc79   :  { %v8261_v13 = vpop.permute.xlu1 %8260  ;;  %v8268_v16 = vunpack.i.h.bf16 %v8266_v12  ;;  %v8267_v17 = vunpack.i.l.bf16 %v8266_v12 }
 0xc7a   :  { %v8263_v19 = vunpack.i.h.bf16 %v8261_v13  ;;  %v8262_v21 = vunpack.i.l.bf16 %v8261_v13 }
 0xc7b   :  { %v8050_v3 = vpack.c.bf16 %v8268_v16, %v8267_v17 }
 0xc7c   :  { %v8044_v32 = vpack.c.bf16 %v8263_v19, %v8262_v21 }
 0xc7e   :  { %8046 = vmatprep.subr.msk.bf16.mxu1 %vm9214_vm8, %v8044_v32 }
 0xc7f   :  { %8049 = vmatpush3.bf16.xpose.msk.msra.mxu1 %vm9214_vm8, %v8044_v32 }
 0xc80   :  { %8052 = vmatprep.subr.msk.bf16.mxu1 %vm9214_vm8, %v8050_v3 }
 0xc86   :  { %7661 = vmatmul.mubr.msk.f32.vlgmr.msra.gmra.mrb[28].mxu1 %vm619_vm7, %v9198_v8 }
 0xc87   :  { %8055 = vmatpush3.bf16.xpose.msk.msra.mxu1 %vm9214_vm8, %v8050_v3  ;;  %7667 = vmatprep.mubr.msk.f32.mxu1 %vm619_vm7, %v9190_v49 }
 0xc8e   :  { %7668 = vmatmul.mubr.msk.f32.vlgmr.msra.gmra.mrb[30].mxu1 %vm619_vm7, %v9194_v63 }
 0xd59   :  { %v7662_v33 = vpop.f32.mrb[28].mxu1 }
 0xd5a   :  { %v1457_v6 = vpop.f32.mrb[29].mxu1  ;;  %v1556_v35 = vmul.f32 0.35355338, %v7662_v33 }
 0xd5b   :  { %v1555_v58 = vmul.f32 0.35355338, %v1457_v6 }
 0xd5c   :  { %v1562_v60 = vsel %vm446_vm6, %v1556_v35, -inf }
 0xd5d   :  { %v1559_v61 = vsel %vm446_vm6, %v1555_v58, -inf }
 0xd61   :  { %v7669_v40 = vpop.f32.mrb[30].mxu1 }
 0xd62   :  { %v1558_v5 = vmul.f32 0.35355338, %v7669_v40  ;;  %v1546_v41 = vpop.f32.mrb[31].mxu1 }
 0xd63   :  { %v1557_v55 = vmul.f32 0.35355338, %v1546_v41 }
 0xd64   :  { %v1568_v11 = vsel %vm446_vm6, %v1558_v5, -inf }
 0xd65   :  { %1569 = vmax.xlane.f32.xlu0 %v1568_v11  ;;  %v1565_v43 = vsel %vm446_vm6, %v1557_v55, -inf }
 0xd66   :  { %1566 = vmax.xlane.f32.xlu1 %v1565_v43 }
 0xd77   :  { %8270 = vrot.lane.b32.xlu1 %v9202_v10, %s8753_s28 }
 0xd7b   :  { %1870 = vrot.lane.b32.xlu1 %v9190_v49, %s8754_s29 }
 0xdf2   :  { %v1570_v25 = vpop.xlane.xlu0 %1569 }
 0xdf3   :  { %v1574_v45 = vsub.f32 %v1558_v5, %v1570_v25  ;;  %v1567_v18 = vpop.xlane.xlu1 %1566 }
 0xdf4   :  { %v1573_v29 = vsub.f32 %v1557_v55, %v1567_v18 }
 0xdf5   :  { %v1581_v34 = vmul.f32 1.442695, %v1574_v45 }
 0xdf6   :  { %v1579_v14 = vmul.f32 1.442695, %v1573_v29 }
 0xdf7   :  { %8541 = vpow2.f32 %v1581_v34  ;;  %v8271_v23 = vpop.permute.xlu1 %8270 }
 0xdf8   :  { %8543 = vpow2.f32 %v1579_v14  ;;  %v8273_v51 = vunpack.i.h.bf16 %v8271_v23  ;;  %v8272_v24 = vunpack.i.l.bf16 %v8271_v23 }
 0xdfa   :  { %v8060_v30 = vpack.c.bf16 %v8273_v51, %v8272_v24 }
 0xdfb   :  { %v1871_v1 = vpop.permute.xlu1 %1870 }
 0xdfc   :  { %8061 = vmatprep.subr.bf16.mxu1 %v8060_v30 }
 0xdfd   :  { %8063 = vmatpush3.bf16.msra.mxu1 %v8060_v30 }
 0xe01   :  { %v8542_v31 = vpop.eup %8541 }
 0xe02   :  { %v8544_v42 = vpop.eup %8543  ;;  %v1592_v53 = vsel %vm446_vm6, %v8542_v31, 0.0 }
 0xe03   :  { %1593 = vadd.xlane.f32.xlu0 %v1592_v53  ;;  %v1589_v59 = vsel %vm446_vm6, %v8544_v42, 0.0 }
 0xe04   :  { %1590 = vadd.xlane.f32.xlu1 %v1589_v59 }
 0xe15   :  { %1872 = vrot.lane.b32.xlu1 %v9194_v63, %s8754_s29 }
 0xe19   :  { %8275 = vrot.lane.b32.xlu0 %v9202_v10, %s8755_s30 }
 0xe38   :  { %1563 = vmax.xlane.f32.xlu0 %v1562_v60 }
 0xe39   :  { %1560 = vmax.xlane.f32.xlu1 %v1559_v61 }
 0xe4a   :  { %8280 = vrot.lane.b32.xlu1 %v9206_v57, %s8753_s28 }
 0xe4e   :  { %1779 = vrot.lane.b32.xlu1 %v9192_v4, %s8754_s29 }
 0xe52   :  { %1781 = vrot.lane.b32.xlu1 %v9198_v8, %s8754_s29 }
 0xe90   :  { %v1594_v2 = vpop.xlane.xlu0 %1593 }
 0xe91   :  { %8545 = vrcp.f32 %v1594_v2  ;;  %v1591_v38 = vpop.xlane.xlu1 %1590 }
 0xe92   :  { %8547 = vrcp.f32 %v1591_v38 }
 0xe94   :  { %v8276_v12 = vpop.permute.xlu0 %8275 }
 0xe95   :  { %v8278_v13 = vunpack.i.h.bf16 %v8276_v12  ;;  %v8277_v16 = vunpack.i.l.bf16 %v8276_v12  ;;  %v1873_v33 = vpop.permute.xlu1 %1872 }
 0xe97   :  { %v8070_v17 = vpack.c.bf16 %v8278_v13, %v8277_v16 }
 0xe99   :  { %8072 = vmatprep.subr.msk.bf16.mxu1 %vm9214_vm8, %v8070_v17 }
 0xe9b   :  { %v8546_v19 = vpop.eup %8545 }
 0xe9c   :  { %v8548_v21 = vpop.eup %8547  ;;  %v1602_v3 = vmul.f32 %v8546_v19, %v8542_v31 }
 0xe9d   :  { %v1601_v32 = vmul.f32 %v8548_v21, %v8544_v42 }
 0xe9f   :  { %7681 = vmatprep.mubr.msk.f32.mxu1 %vm446_vm6, %v1601_v32 }
 0xea0   :  { %7682 = vmatmul.mubr.msk.f32.vlgmr.msra.gmra.mrb[32].mxu1 %vm446_vm6, %v1602_v3 }
 0xea1   :  { %8075 = vmatpush3.bf16.xpose.msk.msra.mxu1 %vm9214_vm8, %v8070_v17  ;;  %7695 = vmatprep.mubr.msk.f32.mxu1 %vm619_vm7, %v1871_v1 }
 0xea8   :  { %7696 = vmatmul.mubr.msk.f32.vlgmr.msra.gmra.mrb[34].mxu1 %vm619_vm7, %v1873_v33 }
 0xec5   :  { %v1564_v6 = vpop.xlane.xlu0 %1563 }
 0xec6   :  { %v1572_v40 = vsub.f32 %v1556_v35, %v1564_v6  ;;  %v1561_v5 = vpop.xlane.xlu1 %1560 }
 0xec7   :  { %v1571_v41 = vsub.f32 %v1555_v58, %v1561_v5 }
 0xec8   :  { %v1577_v55 = vmul.f32 1.442695, %v1572_v40 }
 0xec9   :  { %v1575_v11 = vmul.f32 1.442695, %v1571_v41 }
 0xeca   :  { %v8281_v43 = vpop.permute.xlu1 %8280 }
 0xecb   :  { %8549 = vpow2.f32 %v1575_v11  ;;  %v8283_v25 = vunpack.i.h.bf16 %v8281_v43  ;;  %v8282_v45 = vunpack.i.l.bf16 %v8281_v43 }
 0xecc   :  { %8551 = vpow2.f32 %v1577_v55 }
 0xecd   :  { %v8056_v18 = vpack.c.bf16 %v8283_v25, %v8282_v45 }
 0xece   :  { %v1780_v38 = vpop.permute.xlu1 %1779 }
 0xecf   :  { %8057 = vmatprep.subr.bf16.mxu0 %v8056_v18 }
 0xed0   :  { %8059 = vmatpush3.bf16.msra.mxu0 %v8056_v18 }
 0xed2   :  { %v1782_v17 = vpop.permute.xlu1 %1781 }
 0xed5   :  { %v8550_v29 = vpop.eup %8549 }
 0xed6   :  { %v1583_v34 = vsel %vm446_vm6, %v8550_v29, 0.0  ;;  %v8552_v14 = vpop.eup %8551 }
 0xed7   :  { %1584 = vadd.xlane.f32.xlu0 %v1583_v34  ;;  %v1586_v23 = vsel %vm446_vm6, %v8552_v14, 0.0 }
 0xedb   :  { %1587 = vadd.xlane.f32.xlu0 %v1586_v23 }
 0xef1   :  { %8285 = vrot.lane.b32.xlu0 %v9206_v57, %s8755_s30 }
 0xf64   :  { %v1585_v51 = vpop.xlane.xlu0 %1584 }
 0xf65   :  { %8553 = vrcp.f32 %v1585_v51 }
 0xf68   :  { %v1588_v24 = vpop.xlane.xlu0 %1587 }
 0xf69   :  { %8555 = vrcp.f32 %v1588_v24 }
 0xf6c   :  { %v8286_v30 = vpop.permute.xlu0 %8285 }
 0xf6d   :  { %v8288_v31 = vunpack.i.h.bf16 %v8286_v30  ;;  %v8287_v42 = vunpack.i.l.bf16 %v8286_v30 }
 0xf6f   :  { %v8554_v53 = vpop.eup %8553  ;;  %v8064_v59 = vpack.c.bf16 %v8288_v31, %v8287_v42 }
 0xf70   :  { %v1599_v35 = vmul.f32 %v8554_v53, %v8550_v29 }
 0xf71   :  { %8066 = vmatprep.subr.msk.bf16.mxu0 %vm9214_vm8, %v8064_v59 }
 0xf72   :  { %7674 = vmatprep.mubr.msk.f32.mxu0 %vm446_vm6, %v1599_v35 }
 0xf73   :  { %v8556_v58 = vpop.eup %8555  ;;  %v9267_v60 = vpop.f32.mrb[32].mxu1 }
 0xf74   :  { %v9269_v61 = vpop.f32.mrb[33].mxu1  ;;  %v1600_v1 = vmul.f32 %v8556_v58, %v8552_v14 }
 0xf75   :  { %v1778_v2 = vpack.c.bf16 %v9267_v60, %v9269_v61 }
 0xf76   :  { %7675 = vmatmul.mubr.msk.f32.vlgmr.msra.gmra.mrb[12].mxu0 %vm446_vm6, %v1600_v1 }
 0xf77   :  { %8069 = vmatpush3.bf16.xpose.msk.msra.mxu0 %vm9214_vm8, %v8064_v59  ;;  %7688 = vmatprep.mubr.msk.f32.mxu0 %vm619_vm7, %v1780_v38 }
 0xf7b   :  { %v7697_v12 = vpop.f32.mrb[34].mxu1 }
 0xf7c   :  { %v1964_v13 = vmul.f32 0.35355338, %v7697_v12  ;;  %v1952_v16 = vpop.f32.mrb[35].mxu1 }
 0xf7d   :  { %v1963_v19 = vmul.f32 0.35355338, %v1952_v16 }
 0xf7e   :  { %7689 = vmatmul.mubr.msk.f32.vlgmr.msra.gmra.mrb[14].mxu0 %vm619_vm7, %v1782_v17  ;;  %v1974_v21 = vsel %vm446_vm6, %v1964_v13, -inf }
 0xf7f   :  { %1975 = vmax.xlane.f32.xlu0 %v1974_v21  ;;  %v1971_v32 = vsel %vm446_vm6, %v1963_v19, -inf }
 0xf80   :  { %1972 = vmax.xlane.f32.xlu1 %v1971_v32 }
 0xf91   :  { %8290 = vrot.lane.b32.xlu1 %v9202_v10, %s8756_s20 }
 0xf95   :  { %8300 = vrot.lane.b32.xlu1 %v9202_v10, %s8757_s11 }
 0xf99   :  { %2301 = vrot.lane.b32.xlu1 %v9192_v4, %s8751_s22 }
 0xf9d   :  { %2303 = vrot.lane.b32.xlu1 %v9198_v8, %s8751_s22 }
 0xfa1   :  { %2394 = vrot.lane.b32.xlu1 %v9194_v63, %s8751_s22 }
0x100c   :  { %v1976_v3 = vpop.xlane.xlu0 %1975 }
0x100d   :  { %v1980_v33 = vsub.f32 %v1964_v13, %v1976_v3  ;;  %v1973_v6 = vpop.xlane.xlu1 %1972 }
0x100e   :  { %v1979_v40 = vsub.f32 %v1963_v19, %v1973_v6 }
0x100f   :  { %v1987_v5 = vmul.f32 1.442695, %v1980_v33 }
0x1010   :  { %v1985_v41 = vmul.f32 1.442695, %v1979_v40 }
0x1011   :  { %8557 = vpow2.f32 %v1987_v5  ;;  %v8291_v55 = vpop.permute.xlu1 %8290 }
0x1012   :  { %v8293_v11 = vunpack.i.h.bf16 %v8291_v55  ;;  %v8292_v43 = vunpack.i.l.bf16 %v8291_v55  ;;  %8559 = vpow2.f32 %v1985_v41 }
0x1014   :  { %v8080_v25 = vpack.c.bf16 %v8293_v11, %v8292_v43 }
0x1015   :  { %v8301_v16 = vpop.permute.xlu1 %8300 }
0x1016   :  { %8081 = vmatprep.subr.bf16.mxu1 %v8080_v25  ;;  %v8303_v21 = vunpack.i.h.bf16 %v8301_v16  ;;  %v8302_v32 = vunpack.i.l.bf16 %v8301_v16 }
0x1017   :  { %8083 = vmatpush3.bf16.msra.mxu1 %v8080_v25 }
0x1018   :  { %v8090_v6 = vpack.c.bf16 %v8303_v21, %v8302_v32 }
0x1019   :  { %v2302_v40 = vpop.permute.xlu1 %2301 }
0x101b   :  { %v8558_v45 = vpop.eup %8557 }
0x101c   :  { %v1998_v18 = vsel %vm446_vm6, %v8558_v45, 0.0  ;;  %v8560_v29 = vpop.eup %8559 }
0x101d   :  { %1999 = vadd.xlane.f32.xlu0 %v1998_v18  ;;  %v1995_v34 = vsel %vm446_vm6, %v8560_v29, 0.0  ;;  %v2304_v5 = vpop.permute.xlu1 %2303 }
0x1021   :  { %1996 = vadd.xlane.f32.xlu0 %v1995_v34  ;;  %v2395_v55 = vpop.permute.xlu1 %2394 }
0x1037   :  { %8295 = vrot.lane.b32.xlu0 %v9206_v57, %s8757_s11 }
0x103b   :  { %2392 = vrot.lane.b32.xlu0 %v9190_v49, %s8751_s22 }
0x1049   :  { %v9296_v14 = vpop.f32.mrb[12].mxu0 }
0x104a   :  { %v9298_v23 = vpop.f32.mrb[13].mxu0 }
0x104b   :  { %v1777_v51 = vpack.c.bf16 %v9296_v14, %v9298_v23 }
0x1051   :  { %v7690_v24 = vpop.f32.mrb[14].mxu0 }
0x1052   :  { %v1962_v30 = vmul.f32 0.35355338, %v7690_v24  ;;  %v1861_v31 = vpop.f32.mrb[15].mxu0 }
0x1053   :  { %v1961_v53 = vmul.f32 0.35355338, %v1861_v31 }
0x1054   :  { %v1968_v42 = vsel %vm446_vm6, %v1962_v30, -inf }
0x1055   :  { %1969 = vmax.xlane.f32.xlu1 %v1968_v42  ;;  %v1965_v59 = vsel %vm446_vm6, %v1961_v53, -inf }
0x105a   :  { %1966 = vmax.xlane.f32.xlu0 %v1965_v59 }
0x10aa   :  { %v2000_v35 = vpop.xlane.xlu0 %1999 }
0x10ab   :  { %8561 = vrcp.f32 %v2000_v35 }
0x10ae   :  { %v1997_v58 = vpop.xlane.xlu0 %1996 }
0x10af   :  { %8563 = vrcp.f32 %v1997_v58 }
0x10b2   :  { %v8296_v1 = vpop.permute.xlu0 %8295 }
0x10b3   :  { %v8298_v38 = vunpack.i.h.bf16 %v8296_v1  ;;  %v8297_v12 = vunpack.i.l.bf16 %v8296_v1 }
0x10b5   :  { %v8084_v13 = vpack.c.bf16 %v8298_v38, %v8297_v12  ;;  %v8562_v17 = vpop.eup %8561 }
0x10b6   :  { %v2008_v33 = vmul.f32 %v8562_v17, %v8558_v45  ;;  %v2393_v41 = vpop.permute.xlu0 %2392 }
0x10b7   :  { %8086 = vmatprep.subr.msk.bf16.mxu1 %vm9214_vm8, %v8084_v13 }
0x10b9   :  { %v8564_v19 = vpop.eup %8563 }
0x10ba   :  { %v2007_v3 = vmul.f32 %v8564_v19, %v8560_v29 }
0x10bc   :  { %7709 = vmatprep.mubr.msk.f32.mxu1 %vm446_vm6, %v2007_v3 }
0x10bd   :  { %7710 = vmatmul.mubr.msk.f32.vlgmr.msra.gmra.mrb[36].mxu1 %vm446_vm6, %v2008_v33 }
0x10be   :  { %8089 = vmatpush3.bf16.xpose.msk.msra.mxu1 %vm9214_vm8, %v8084_v13  ;;  %7728 = vmatprep.mubr.msk.f32.mxu1 %vm619_vm7, %v2302_v40 }
0x10bf   :  { %8092 = vmatprep.subr.msk.bf16.mxu1 %vm9214_vm8, %v8090_v6 }
0x10c5   :  { %7729 = vmatmul.mubr.msk.f32.vlgmr.msra.gmra.mrb[38].mxu1 %vm619_vm7, %v2304_v5 }
0x10c6   :  { %8095 = vmatpush3.bf16.xpose.msk.msra.mxu1 %vm9214_vm8, %v8090_v6  ;;  %7735 = vmatprep.mubr.msk.f32.mxu1 %vm619_vm7, %v2393_v41 }
0x10cd   :  { %7736 = vmatmul.mubr.msk.f32.vlgmr.msra.gmra.mrb[40].mxu1 %vm619_vm7, %v2395_v55 }
0x10e2   :  { %v1970_v11 = vpop.xlane.xlu1 %1969 }
0x10e3   :  { %v1978_v43 = vsub.f32 %v1962_v30, %v1970_v11 }
0x10e5   :  { %v1983_v18 = vmul.f32 1.442695, %v1978_v43 }
0x10e7   :  { %v1967_v25 = vpop.xlane.xlu0 %1966 }
0x10e8   :  { %v1977_v45 = vsub.f32 %v1961_v53, %v1967_v25 }
0x10ea   :  { %v1981_v29 = vmul.f32 1.442695, %v1977_v45 }
0x10ec   :  { %8565 = vpow2.f32 %v1981_v29 }
0x10ed   :  { %8567 = vpow2.f32 %v1983_v18  ;;  %v1374_v18 = vld [vmem:[%s10127_s14 + $0x4] sm:$0xf] }
0x10ee   :  { %v2192_v29 = vsel %vm95_vm0, %v1374_v18, 0 }
0x10f6   :  { %v8566_v34 = vpop.eup %8565 }
0x10f7   :  { %v1989_v24 = vsel %vm446_vm6, %v8566_v34, 0.0  ;;  %v8568_v31 = vpop.eup %8567 }
0x10f8   :  { %1990 = vadd.xlane.f32.xlu0 %v1989_v24  ;;  %v1992_v42 = vsel %vm446_vm6, %v8568_v31, 0.0 }
0x10fc   :  { %1993 = vadd.xlane.f32.xlu0 %v1992_v42 }
0x1112   :  { %8305 = vrot.lane.b32.xlu0 %v9206_v57, %s8756_s20 }
0x1185   :  { %v1991_v59 = vpop.xlane.xlu0 %1990 }
0x1186   :  { %8569 = vrcp.f32 %v1991_v59 }
0x1189   :  { %v1994_v30 = vpop.xlane.xlu0 %1993 }
0x118a   :  { %8571 = vrcp.f32 %v1994_v30 }
0x118d   :  { %v8306_v53 = vpop.permute.xlu0 %8305 }
0x118e   :  { %v8308_v35 = vunpack.i.h.bf16 %v8306_v53  ;;  %v8307_v58 = vunpack.i.l.bf16 %v8306_v53 }
0x1190   :  { %v8570_v1 = vpop.eup %8569  ;;  %v9322_v38 = vpop.f32.mrb[36].mxu1  ;;  %v8076_v12 = vpack.c.bf16 %v8308_v35, %v8307_v58 }
0x1191   :  { %v9324_v13 = vpop.f32.mrb[37].mxu1  ;;  %v2005_v16 = vmul.f32 %v8570_v1, %v8566_v34  ;;  %v1373_v34 = vld [vmem:[%s10127_s14] sm:$0xf] }
0x1192   :  { %v2184_v17 = vpack.c.bf16 %v9322_v38, %v9324_v13  ;;  %8077 = vmatprep.subr.bf16.mxu0 %v8076_v12 }
0x1193   :  { %8079 = vmatpush3.bf16.msra.mxu0 %v8076_v12  ;;  %7702 = vmatprep.mubr.msk.f32.mxu0 %vm446_vm6, %v2005_v16 }
0x1194   :  { %v8572_v19 = vpop.eup %8571  ;;  %8236 = vmatprep.subr.msk.bf16.mxu0 %vm95_vm0, %v1374_v18 }
0x1195   :  { %v2006_v21 = vmul.f32 %v8572_v19, %v8568_v31 }
0x1197   :  { %7703 = vmatmul.mubr.msk.f32.vlgmr.msra.gmra.mrb[16].mxu0 %vm446_vm6, %v2006_v21 }
0x1198   :  { %v7730_v32 = vpop.f32.mrb[38].mxu1  ;;  %7713 = vmatpush3.bf16.msra.mxu0 %v2192_v29  ;;  %v1375_v29 = vld [vmem:[%s10127_s14 + $0x8] sm:$0xf] }
0x1199   :  { %v2484_v3 = vmul.f32 0.35355338, %v7730_v32  ;;  %v2383_v33 = vpop.f32.mrb[39].mxu1  ;;  %8237 = vmatprep.subr.msk.bf16.mxu0 %vm95_vm0, %v1373_v34 }
0x119a   :  { %v2483_v6 = vmul.f32 0.35355338, %v2383_v33 }
0x119b   :  { %v2490_v40 = vsel %vm446_vm6, %v2484_v3, -inf }
0x119c   :  { %2491 = vmax.xlane.f32.xlu1 %v2490_v40  ;;  %v2487_v5 = vsel %vm446_vm6, %v2483_v6, -inf }
0x11a0   :  { %2488 = vmax.xlane.f32.xlu1 %v2487_v5  ;;  %v7737_v41 = vpop.f32.mrb[40].mxu1 }
0x11a1   :  { %v2474_v55 = vpop.f32.mrb[41].mxu1  ;;  %v2486_v43 = vmul.f32 0.35355338, %v7737_v41 }
0x11a2   :  { %v2485_v11 = vmul.f32 0.35355338, %v2474_v55 }
0x11a3   :  { %v2496_v45 = vsel %vm446_vm6, %v2486_v43, -inf }
0x11a4   :  { %v2493_v25 = vsel %vm446_vm6, %v2485_v11, -inf }
0x11a5   :  { %2494 = vmax.xlane.f32.xlu1 %v2493_v25  ;;  %v2250_v25 = vsel %vm95_vm0, %v1373_v34, 0 }
0x11a9   :  { %2497 = vmax.xlane.f32.xlu1 %v2496_v45 }
0x1229   :  { %v2492_v24 = vpop.xlane.xlu1 %2491 }
0x122a   :  { %v2500_v31 = vsub.f32 %v2484_v3, %v2492_v24 }
0x122c   :  { %v2505_v42 = vmul.f32 1.442695, %v2500_v31 }
0x122d   :  { %v2489_v59 = vpop.xlane.xlu1 %2488 }
0x122e   :  { %8573 = vpow2.f32 %v2505_v42  ;;  %v2499_v30 = vsub.f32 %v2483_v6, %v2489_v59 }
0x1230   :  { %v2503_v53 = vmul.f32 1.442695, %v2499_v30 }
0x1232   :  { %8575 = vpow2.f32 %v2503_v53  ;;  %v2495_v35 = vpop.xlane.xlu1 %2494  ;;  %v2714_v53 = vsel %vm95_vm0, %v1375_v29, 0 }
0x1233   :  { %v2501_v58 = vsub.f32 %v2485_v11, %v2495_v35 }
0x1235   :  { %v2507_v1 = vmul.f32 1.442695, %v2501_v58 }
0x1236   :  { %v2498_v12 = vpop.xlane.xlu1 %2497 }
0x1237   :  { %8577 = vpow2.f32 %v2507_v1  ;;  %v2502_v16 = vsub.f32 %v2486_v43, %v2498_v12 }
0x1238   :  { %v8574_v19 = vpop.eup %8573 }
0x1239   :  { %v2509_v21 = vmul.f32 1.442695, %v2502_v16  ;;  %v2514_v32 = vsel %vm446_vm6, %v8574_v19, 0.0 }
0x123a   :  { %2515 = vadd.xlane.f32.xlu1 %v2514_v32 }
0x123b   :  { %8579 = vpow2.f32 %v2509_v21 }
0x123c   :  { %v8576_v33 = vpop.eup %8575 }
0x123d   :  { %v2511_v3 = vsel %vm446_vm6, %v8576_v33, 0.0 }
0x123e   :  { %2512 = vadd.xlane.f32.xlu1 %v2511_v3 }
0x1241   :  { %v8578_v40 = vpop.eup %8577 }
0x1242   :  { %v2517_v6 = vsel %vm446_vm6, %v8578_v40, 0.0 }
0x1243   :  { %2518 = vadd.xlane.f32.xlu0 %v2517_v6 }
0x1245   :  { %v9346_v5 = vpop.eup %8579 }
0x1246   :  { %v2520_v41 = vsel %vm446_vm6, %v9346_v5, 0.0 }
0x1247   :  { %2521 = vadd.xlane.f32.xlu1 %v2520_v41 }
0x1258   :  { %8310 = vrot.lane.b32.xlu1 %v9206_v57, %s8758_s24 }
0x1259   :  { %8325 = vrot.lane.b32.xlu0 %v9202_v10, %s8759_s25 }
0x125c   :  { %8315 = vrot.lane.b32.xlu1 %v9202_v10, %s8758_s24 }
0x1260   :  { %8320 = vrot.lane.b32.xlu1 %v9206_v57, %s8759_s25 }
0x1264   :  { %2769 = vrot.lane.b32.xlu1 %v9192_v4, %s10137_s4 }
0x1268   :  { %2771 = vrot.lane.b32.xlu1 %v9198_v8, %s10137_s4 }
0x126a   :  { %v7704_v55 = vpop.f32.mrb[16].mxu0 }
0x126b   :  { %v2087_v11 = vpop.f32.mrb[17].mxu0 }
0x126c   :  { %v2183_v43 = vpack.c.bf16 %v7704_v55, %v2087_v11  ;;  %2860 = vrot.lane.b32.xlu1 %v9190_v49, %s10137_s4 }
0x126e   :  { %7714 = vmatprep.mubr.msk.bf16.mxu0 %vm619_vm7, %v2183_v43 }
0x126f   :  { %7715 = vmatmul.mubr.msk.bf16.vlgmr.msra.gmra.mrb[20].mxu0 %vm619_vm7, %v2184_v17 }
0x1270   :  { %2862 = vrot.lane.b32.xlu1 %v9194_v63, %s10137_s4  ;;  %7720 = vmatprep.mubr.msk.bf16.mxu0 %vm619_vm7, %v1777_v51 }
0x1271   :  { %7719 = vmatpush3.bf16.msra.mxu0 %v2250_v25 }
0x127b   :  { %7721 = vmatmul.mubr.msk.bf16.vlgmr.msra.gmra.mrb[20].mxu0 %vm619_vm7, %v1778_v2 }
0x12c7   :  { %v2516_v49 = vpop.xlane.xlu1 %2515 }
0x12cb   :  { %v2513_v4 = vpop.xlane.xlu1 %2512 }
0x12cc   :  { %8581 = vrcp.f32 %v2513_v4 }
0x12d0   :  { %v2519_v8 = vpop.xlane.xlu0 %2518 }
0x12d1   :  { %8583 = vrcp.f32 %v2519_v8 }
0x12d2   :  { %8585 = vrcp.f32 %v2516_v49 }
0x12d4   :  { %v2522_v38 = vpop.xlane.xlu1 %2521  ;;  %v8326_v51 = vpop.permute.xlu0 %8325 }
0x12d5   :  { %8587 = vrcp.f32 %v2522_v38  ;;  %v8328_v34 = vunpack.i.h.bf16 %v8326_v51  ;;  %v8327_v24 = vunpack.i.l.bf16 %v8326_v51 }
0x12d6   :  { %v8582_v13 = vpop.eup %8581 }
0x12d7   :  { %v2527_v63 = vmul.f32 %v8582_v13, %v8576_v33  ;;  %v8110_v1 = vpack.c.bf16 %v8328_v34, %v8327_v24 }
0x12d8   :  { %v8311_v17 = vpop.permute.xlu1 %8310 }
0x12d9   :  { %v8313_v14 = vunpack.i.h.bf16 %v8311_v17  ;;  %v8312_v23 = vunpack.i.l.bf16 %v8311_v17  ;;  %7742 = vmatprep.mubr.msk.f32.mxu0 %vm446_vm6, %v2527_v63 }
0x12db   :  { %v8584_v45 = vpop.eup %8583  ;;  %v8096_v60 = vpack.c.bf16 %v8313_v14, %v8312_v23 }
0x12dc   :  { %v8586_v61 = vpop.eup %8585  ;;  %v8316_v2 = vpop.permute.xlu1 %8315  ;;  %v2529_v18 = vmul.f32 %v8584_v45, %v8578_v40 }
0x12dd   :  { %v8318_v31 = vunpack.i.h.bf16 %v8316_v2  ;;  %v8317_v42 = vunpack.i.l.bf16 %v8316_v2  ;;  %8097 = vmatprep.subr.bf16.mxu0 %v8096_v60  ;;  %v2528_v59 = vmul.f32 %v8586_v61, %v8574_v19 }
0x12de   :  { %8099 = vmatpush3.bf16.msra.mxu0 %v8096_v60  ;;  %7749 = vmatprep.mubr.msk.f32.mxu1 %vm446_vm6, %v2529_v18 }
0x12df   :  { %v8100_v30 = vpack.c.bf16 %v8318_v31, %v8317_v42  ;;  %8238 = vmatprep.subr.msk.bf16.mxu0 %vm95_vm0, %v1375_v29  ;;  %v8588_v35 = vpop.eup %8587 }
0x12e0   :  { %v8321_v58 = vpop.permute.xlu1 %8320  ;;  %v2530_v19 = vmul.f32 %v8588_v35, %v9346_v5 }
0x12e1   :  { %v8323_v12 = vunpack.i.h.bf16 %v8321_v58  ;;  %v8322_v16 = vunpack.i.l.bf16 %v8321_v58  ;;  %7743 = vmatmul.mubr.msk.f32.vlgmr.msra.gmra.mrb[18].mxu0 %vm446_vm6, %v2528_v59  ;;  %8101 = vmatprep.subr.bf16.mxu1 %v8100_v30 }
0x12e2   :  { %8103 = vmatpush3.bf16.msra.mxu1 %v8100_v30  ;;  %7753 = vmatpush3.bf16.msra.mxu0 %v2714_v53 }
0x12e3   :  { %v8104_v21 = vpack.c.bf16 %v8323_v12, %v8322_v16  ;;  %8112 = vmatprep.subr.msk.bf16.mxu0 %vm9214_vm8, %v8110_v1 }
0x12e4   :  { %v2770_v32 = vpop.permute.xlu1 %2769 }
0x12e5   :  { %7750 = vmatmul.mubr.msk.f32.vlgmr.msra.gmra.mrb[42].mxu1 %vm446_vm6, %v2530_v19  ;;  %8106 = vmatprep.subr.msk.bf16.mxu1 %vm9214_vm8, %v8104_v21 }
0x12e6   :  { %7762 = vmatprep.mubr.msk.f32.mxu1 %vm619_vm7, %v2770_v32 }
0x12e8   :  { %v2772_v33 = vpop.permute.xlu1 %2771 }
0x12eb   :  { %8109 = vmatpush3.bf16.xpose.msk.msra.mxu1 %vm9214_vm8, %v8104_v21 }
0x12ec   :  { %v2861_v11 = vpop.permute.xlu1 %2860 }
0x12f0   :  { %v2863_v43 = vpop.permute.xlu1 %2862 }
0x12f2   :  { %7763 = vmatmul.mubr.msk.f32.vlgmr.msra.gmra.mrb[44].mxu1 %vm619_vm7, %v2772_v33 }
0x13b4   :  { %v7744_v3 = vpop.f32.mrb[18].mxu0 }
0x13b5   :  { %v2609_v40 = vpop.f32.mrb[19].mxu0 }
0x13b6   :  { %v2705_v6 = vpack.c.bf16 %v7744_v3, %v2609_v40 }
0x13b8   :  { %v7751_v41 = vpop.f32.mrb[42].mxu1  ;;  %7754 = vmatprep.mubr.msk.bf16.mxu0 %vm619_vm7, %v2705_v6 }
0x13b9   :  { %v2696_v5 = vpop.f32.mrb[43].mxu1 }
0x13ba   :  { %v2706_v55 = vpack.c.bf16 %v7751_v41, %v2696_v5 }
0x13bc   :  { %7755 = vmatmul.mubr.msk.bf16.vlgmr.msra.gmra.mrb[20].mxu0 %vm619_vm7, %v2706_v55 }
0x13bd   :  { %8115 = vmatpush3.bf16.xpose.msk.msra.mxu0 %vm9214_vm8, %v8110_v1  ;;  %7769 = vmatprep.mubr.msk.f32.mxu0 %vm619_vm7, %v2861_v11 }
0x13c4   :  { %7770 = vmatmul.mubr.msk.f32.vlgmr.msra.gmra.mrb[24].mxu0 %vm619_vm7, %v2863_v43 }
0x13c5   :  { %v7764_v25 = vpop.f32.mrb[44].mxu1 }
0x13c6   :  { %v2952_v49 = vmul.f32 0.35355338, %v7764_v25  ;;  %v2851_v4 = vpop.f32.mrb[45].mxu1 }
0x13c7   :  { %v2951_v8 = vmul.f32 0.35355338, %v2851_v4 }
0x13c8   :  { %v2958_v38 = vsel %vm446_vm6, %v2952_v49, -inf }
0x13c9   :  { %2959 = vmax.xlane.f32.xlu0 %v2958_v38  ;;  %v2955_v13 = vsel %vm446_vm6, %v2951_v8, -inf }
0x13ca   :  { %2956 = vmax.xlane.f32.xlu1 %v2955_v13 }
0x1456   :  { %v2960_v63 = vpop.xlane.xlu0 %2959 }
0x1457   :  { %v2957_v17 = vpop.xlane.xlu1 %2956  ;;  %v2968_v14 = vsub.f32 %v2952_v49, %v2960_v63 }
0x1458   :  { %v2967_v23 = vsub.f32 %v2951_v8, %v2957_v17 }
0x1459   :  { %v2973_v51 = vmul.f32 1.442695, %v2968_v14 }
0x145a   :  { %v2971_v45 = vmul.f32 1.442695, %v2967_v23  ;;  %v1376_v23 = vld [vmem:[%s10127_s14 + $0xc] sm:$0xf] }
0x145b   :  { %8589 = vpow2.f32 %v2973_v51  ;;  %v3182_v51 = vsel %vm95_vm0, %v1376_v23, 0 }
0x145c   :  { %8591 = vpow2.f32 %v2971_v45 }
0x1465   :  { %v8590_v34 = vpop.eup %8589 }
0x1466   :  { %v8592_v31 = vpop.eup %8591  ;;  %v2982_v42 = vsel %vm446_vm6, %v8590_v34, 0.0 }
0x1467   :  { %v2979_v59 = vsel %vm446_vm6, %v8592_v31, 0.0 }
0x1497   :  { %v7771_v60 = vpop.f32.mrb[24].mxu0 }
0x1498   :  { %v2954_v61 = vmul.f32 0.35355338, %v7771_v60  ;;  %v2942_v2 = vpop.f32.mrb[25].mxu0 }
0x1499   :  { %v2953_v18 = vmul.f32 0.35355338, %v2942_v2 }
0x149a   :  { %v2964_v29 = vsel %vm446_vm6, %v2954_v61, -inf }
0x149b   :  { %2965 = vmax.xlane.f32.xlu0 %v2964_v29  ;;  %v2961_v24 = vsel %vm446_vm6, %v2953_v18, -inf }
0x149c   :  { %2962 = vmax.xlane.f32.xlu1 %v2961_v24 }
0x149f   :  { %2983 = vadd.xlane.f32.xlu0 %v2982_v42 }
0x14a0   :  { %2980 = vadd.xlane.f32.xlu1 %v2979_v59 }
0x1528   :  { %v2966_v30 = vpop.xlane.xlu0 %2965 }
0x1529   :  { %v2970_v53 = vsub.f32 %v2954_v61, %v2966_v30  ;;  %v2963_v35 = vpop.xlane.xlu1 %2962 }
0x152a   :  { %v2969_v58 = vsub.f32 %v2953_v18, %v2963_v35 }
0x152b   :  { %v2977_v1 = vmul.f32 1.442695, %v2970_v53 }
0x152c   :  { %v2975_v12 = vmul.f32 1.442695, %v2969_v58  ;;  %v2984_v6 = vpop.xlane.xlu0 %2983 }
0x152d   :  { %8593 = vpow2.f32 %v2977_v1  ;;  %v2981_v16 = vpop.xlane.xlu1 %2980 }
0x152e   :  { %8595 = vpow2.f32 %v2975_v12 }
0x152f   :  { %8597 = vrcp.f32 %v2981_v16 }
0x1530   :  { %8599 = vrcp.f32 %v2984_v6 }
0x1537   :  { %v8594_v21 = vpop.eup %8593 }
0x1538   :  { %v8596_v19 = vpop.eup %8595  ;;  %v2988_v32 = vsel %vm446_vm6, %v8594_v21, 0.0 }
0x1539   :  { %2989 = vadd.xlane.f32.xlu0 %v2988_v32  ;;  %v2985_v33 = vsel %vm446_vm6, %v8596_v19, 0.0  ;;  %v8598_v3 = vpop.eup %8597 }
0x153a   :  { %2986 = vadd.xlane.f32.xlu1 %v2985_v33  ;;  %v2995_v40 = vmul.f32 %v8598_v3, %v8592_v31  ;;  %v8600_v13 = vpop.eup %8599 }
0x153b   :  { %v2996_v63 = vmul.f32 %v8600_v13, %v8590_v34  ;;  %v9431_v34 = vld [vmem:[%s10126_s17] sm:$0x3f] }
0x153c   :  { %7776 = vmatprep.mubr.msk.f32.mxu1 %vm446_vm6, %v2995_v40  ;;  %v3240_v24 = vrot.slane %v9431_v34, %v9057_v15 }
0x154b   :  { %8330 = vrot.lane.b32.xlu1 %v9206_v57, %s10135_s21 }
0x154f   :  { %8335 = vrot.lane.b32.xlu0 %v9202_v10, %s10135_s21 }
0x15c6   :  { %v2990_v41 = vpop.xlane.xlu0 %2989 }
0x15c7   :  { %8601 = vrcp.f32 %v2990_v41  ;;  %v2987_v5 = vpop.xlane.xlu1 %2986 }
0x15c8   :  { %8603 = vrcp.f32 %v2987_v5 }
0x15ca   :  { %v8336_v55 = vpop.permute.xlu0 %8335 }
0x15cb   :  { %v8338_v11 = vunpack.i.h.bf16 %v8336_v55  ;;  %v8337_v43 = vunpack.i.l.bf16 %v8336_v55  ;;  %v8331_v25 = vpop.permute.xlu1 %8330 }
0x15cc   :  { %v8333_v49 = vunpack.i.h.bf16 %v8331_v25  ;;  %v8332_v4 = vunpack.i.l.bf16 %v8331_v25 }
0x15cd   :  { %v8120_v8 = vpack.c.bf16 %v8338_v11, %v8337_v43 }
0x15ce   :  { %v8116_v38 = vpack.c.bf16 %v8333_v49, %v8332_v4 }
0x15cf   :  { %8121 = vmatprep.subr.bf16.mxu0 %v8120_v8 }
0x15d0   :  { %8117 = vmatprep.subr.bf16.mxu1 %v8116_v38  ;;  %8123 = vmatpush3.bf16.msra.mxu0 %v8120_v8 }
0x15d1   :  { %v8602_v57 = vpop.eup %8601  ;;  %8119 = vmatpush3.bf16.msra.mxu1 %v8116_v38  ;;  %8239 = vmatprep.subr.msk.bf16.mxu0 %vm95_vm0, %v1376_v23 }
0x15d2   :  { %v8604_v10 = vpop.eup %8603  ;;  %v2998_v14 = vmul.f32 %v8602_v57, %v8594_v21 }
0x15d3   :  { %v2997_v17 = vmul.f32 %v8604_v10, %v8596_v19 }
0x15d4   :  { %7777 = vmatmul.mubr.msk.f32.vlgmr.msra.gmra.mrb[46].mxu1 %vm446_vm6, %v2996_v63 }
0x15d5   :  { %7783 = vmatprep.mubr.msk.f32.mxu0 %vm446_vm6, %v2997_v17  ;;  %3409 = vmatprep.mubr.bf16.mxu1 %v8752_v7 }
0x15d6   :  { %7784 = vmatmul.mubr.msk.f32.vlgmr.msra.gmra.mrb[26].mxu0 %vm446_vm6, %v2998_v14 }
0x15d7   :  { %7787 = vmatpush3.bf16.msra.mxu0 %v3182_v51 }
0x16a7   :  { %v7778_v45 = vpop.f32.mrb[46].mxu1 }
0x16a8   :  { %v3077_v60 = vpop.f32.mrb[47].mxu1 }
0x16a9   :  { %v3173_v61 = vpack.c.bf16 %v7778_v45, %v3077_v60  ;;  %v7785_v2 = vpop.f32.mrb[26].mxu0 }
0x16aa   :  { %v3164_v18 = vpop.f32.mrb[27].mxu0 }
0x16ab   :  { %v3174_v29 = vpack.c.bf16 %v7785_v2, %v3164_v18  ;;  %7788 = vmatprep.mubr.msk.bf16.mxu0 %vm619_vm7, %v3173_v61 }
0x16ad   :  { %7789 = vmatmul.mubr.msk.bf16.vlgmr.msra.gmra.mrb[20].mxu0 %vm619_vm7, %v3174_v29 }
0x1780   :  { %v7790_v31 = vpop.f32.mrb[20].mxu0 }
0x1781   :  { %v3218_v42 = vpop.f32.mrb[21].mxu0  ;;  %v3243_v59 = vadd.f32 %v7790_v31, %v3240_v24 }
0x1782   :  { %v3241_v30 = vadd.f32 %v3240_v24, %v3218_v42  ;;  %v7791_v53 = vpop.f32.mrb[22].mxu0 }
0x1783   :  { %v3221_v35 = vpop.f32.mrb[23].mxu0  ;;  %v3244_v1 = vadd.f32 %v7791_v53, %v3240_v24  ;;  %v9439_v16 = vadd.f32 %v3243_v59, %v9153_v46  ;;  %v8446_v53 = vld [vmem:[%s10128_s15 + $0x4] ss:$8 sps:$4 sm:$0xff]  }
0x1784   :  { %v9436_v58 = vadd.f32 %v3241_v30, %v9150_v39  ;;  %v3242_v12 = vadd.f32 %v3240_v24, %v3221_v35  ;;  %v9454_v39 = vld [vmem:[%s10146_s1 + $0x10] sm:$0xff]  ;;  %v8444_v35 = vld [vmem:[%s10128_s15] ss:$8 sps:$4 sm:$0xff]   ;;  %3377 = vmatprep.subr.bf16.mxu1 %v8446_v53 }
0x1785   :  { %v9447_v32 = vadd.f32 %v3244_v1, %v9161_v50  ;;  %v3276_v46 = vsel %vm141_vm3, %v9439_v16, 0.0  ;;  %v3609_v3 = vsel %vm141_vm3, %v9454_v39, 0.0  ;;  %3378 = vmatpush1.bf16.msra.mxu1 %v8444_v35  ;;  %v8449_v1 = vld [vmem:[%s10128_s15 + $0x14] ss:$8 sps:$4 sm:$0xff]  }
0x1786   :  { %v9442_v21 = vadd.f32 %v3242_v12, %v9156_v52  ;;  %v3270_v19 = vsel %vm141_vm3, %v9436_v58, 0.0  ;;  %v9461_v52 = vld [vmem:[%s10146_s1 + $0x18] sm:$0xff]  ;;  %3379 = vmatprep.subr.bf16.mxu1 %v8449_v1 }
0x1787   :  { %3271 = vadd.xlane.f32.xlu1 %v3270_v19  ;;  %v3279_v50 = vsel %vm141_vm3, %v9447_v32, 0.0  ;;  %v3612_v40 = vsel %vm141_vm3, %v9461_v52, 0.0 }
0x1788   :  { %v3273_v33 = vsel %vm141_vm3, %v9442_v21, 0.0 }
0x1789   :  { %3274 = vadd.xlane.f32.xlu0 %v3273_v33 }
0x178b   :  { %3277 = vadd.xlane.f32.xlu1 %v3276_v46 }
0x178d   :  { %3280 = vadd.xlane.f32.xlu0 %v3279_v50 }
0x178f   :  { %3610 = vadd.xlane.f32.xlu1 %v3609_v3 }
0x1791   :  { %3613 = vadd.xlane.f32.xlu0 %v3612_v40 }
0x1814   :  { %v3272_v6 = vpop.xlane.xlu1 %3271 }
0x1815   :  { %v3282_v41 = vmul.f32 0.03125, %v3272_v6 }
0x1816   :  { %v3275_v5 = vpop.xlane.xlu0 %3274 }
0x1817   :  { %v9470_v55 = vsub.f32 %v9436_v58, %v3282_v41  ;;  %v3283_v11 = vmul.f32 0.03125, %v3275_v5 }
0x1818   :  { %v3278_v43 = vpop.xlane.xlu1 %3277 }
0x1819   :  { %v9473_v25 = vsub.f32 %v9442_v21, %v3283_v11  ;;  %v3284_v49 = vmul.f32 0.03125, %v3278_v43  ;;  %v3290_v4 = vmul.f32 %v9470_v55, %v9470_v55 }
0x181a   :  { %v3281_v8 = vpop.xlane.xlu0 %3280 }
0x181b   :  { %v9478_v38 = vsub.f32 %v9439_v16, %v3284_v49  ;;  %v3285_v13 = vmul.f32 0.03125, %v3281_v8  ;;  %v3294_v57 = vsel %vm141_vm3, %v3290_v4, 0.0  ;;  %v3291_v10 = vmul.f32 %v9473_v25, %v9473_v25 }
0x181c   :  { %3295 = vadd.xlane.f32.xlu1 %v3294_v57  ;;  %v3611_v63 = vpop.xlane.xlu1 %3610 }
0x181d   :  { %v9484_v17 = vsub.f32 %v9447_v32, %v3285_v13  ;;  %v3615_v14 = vmul.f32 0.03125, %v3611_v63  ;;  %v3297_v23 = vsel %vm141_vm3, %v3291_v10, 0.0  ;;  %v3292_v51 = vmul.f32 %v9478_v38, %v9478_v38 }
0x181e   :  { %3298 = vadd.xlane.f32.xlu0 %v3297_v23  ;;  %v3614_v45 = vpop.xlane.xlu0 %3613  ;;  %v3325_v63 = vrot.slane %v9431_v34, %v9103_v20 }
0x181f   :  { %v9490_v60 = vsub.f32 %v9454_v39, %v3615_v14  ;;  %v3616_v61 = vmul.f32 0.03125, %v3614_v45  ;;  %v3300_v2 = vsel %vm141_vm3, %v3292_v51, 0.0  ;;  %v3293_v18 = vmul.f32 %v9484_v17, %v9484_v17 }
0x1820   :  { %3301 = vadd.xlane.f32.xlu1 %v3300_v2  ;;  %v3333_v2 = vrot.slane %v9431_v34, %v9108_v22 }
0x1821   :  { %v9496_v29 = vsub.f32 %v9461_v52, %v3616_v61  ;;  %v3303_v24 = vsel %vm141_vm3, %v3293_v18, 0.0  ;;  %v3619_v31 = vmul.f32 %v9490_v60, %v9490_v60  ;;  %v9533_v18 = vld [vmem:[%s10120_s10 + $0x8] sm:$0x3f] }
0x1822   :  { %3304 = vadd.xlane.f32.xlu0 %v3303_v24 }
0x1823   :  { %v3621_v42 = vsel %vm141_vm3, %v3619_v31, 0.0  ;;  %v3620_v59 = vmul.f32 %v9496_v29, %v9496_v29 }
0x1824   :  { %3622 = vadd.xlane.f32.xlu1 %v3621_v42 }
0x1825   :  { %v3624_v30 = vsel %vm141_vm3, %v3620_v59, 0.0  ;;  %v3638_v59 = vrot.slane %v9533_v18, %v8943_v54 }
0x1826   :  { %3625 = vadd.xlane.f32.xlu0 %v3624_v30 }
0x1835   :  { %3660 = vrot.lane.b32.xlu1 %v8985_v28, %s8749_s3  ;;  %v8447_v28 = vld [vmem:[%s10128_s15 + $0x10] ss:$8 sps:$4 sm:$0xff]  }
0x1836   :  { %3380 = vmatpush1.bf16.msra.mxu1 %v8447_v28 }
0x183c   :  { %3666 = vrot.lane.b32.xlu0 %v8997_v37, %s8749_s3  ;;  %v8450_v37 = vld [vmem:[%s10118_s5 + $0x10] sm:$0xff]  }
0x183d   :  { %7812 = vmatprep.subr.bf16.mxu1 %v8450_v37 }
0x18a9   :  { %v3296_v12 = vpop.xlane.xlu1 %3295 }
0x18aa   :  { %v3306_v19 = vmul.f32 0.03125, %v3296_v12 }
0x18ab   :  { %v3299_v33 = vpop.xlane.xlu0 %3298 }
0x18ac   :  { %v3310_v46 = vadd.f32 1e-05, %v3306_v19  ;;  %v3307_v50 = vmul.f32 0.03125, %v3299_v33  ;;  %v8451_v19 = vld [vmem:[%s10118_s5 + $0x18] sm:$0xff]  }
0x18ad   :  { %v3302_v3 = vpop.xlane.xlu1 %3301 }
0x18ae   :  { %8605 = vrsqrt.f32 %v3310_v46  ;;  %v3311_v40 = vadd.f32 1e-05, %v3307_v50  ;;  %v3308_v6 = vmul.f32 0.03125, %v3302_v3  ;;  %v3644_v3 = vrot.slane %v9533_v18, %v8951_v56 }
0x18af   :  { %v3305_v41 = vpop.xlane.xlu0 %3304 }
0x18b0   :  { %8607 = vrsqrt.f32 %v3311_v40  ;;  %v3312_v5 = vadd.f32 1e-05, %v3308_v6  ;;  %v3309_v11 = vmul.f32 0.03125, %v3305_v41 }
0x18b1   :  { %v3623_v43 = vpop.xlane.xlu1 %3622 }
0x18b2   :  { %8609 = vrsqrt.f32 %v3312_v5  ;;  %v3313_v49 = vadd.f32 1e-05, %v3309_v11  ;;  %v3627_v4 = vmul.f32 0.03125, %v3623_v43 }
0x18b3   :  { %v3626_v8 = vpop.xlane.xlu0 %3625 }
0x18b4   :  { %8611 = vrsqrt.f32 %v3313_v49  ;;  %v3629_v13 = vadd.f32 1e-05, %v3627_v4  ;;  %v3628_v57 = vmul.f32 0.03125, %v3626_v8 }
0x18b6   :  { %8613 = vrsqrt.f32 %v3629_v13  ;;  %v3630_v10 = vadd.f32 1e-05, %v3628_v57 }
0x18b7   :  { %v3667_v8 = vpop.permute.xlu0 %3666 }
0x18b8   :  { %v8606_v14 = vpop.eup %8605  ;;  %8615 = vrsqrt.f32 %v3630_v10  ;;  %v8452_v10 = vld [vmem:[%s10119_s6 + $0x18] sm:$0xff]  }
0x18b9   :  { %v3318_v23 = vmul.f32 %v8606_v14, %v9470_v55  ;;  %v8460_v14 = vld [vmem:[%s10129_s16 + $0x30] sm:$0xff]  }
0x18ba   :  { %v8608_v51 = vpop.eup %8607 }
0x18bb   :  { %v3326_v45 = vmul.f32 %v3325_v63, %v3318_v23  ;;  %v3319_v61 = vmul.f32 %v8608_v51, %v9473_v25  ;;  %v8461_v23 = vld [vmem:[%s10129_s16 + $0x38] sm:$0xff]   ;;  %v3253_v51 = vld [vmem:[%s10130_s18] sm:$0x3] }
0x18bc   :  { %v8610_v24 = vpop.eup %8609 }
0x18bd   :  { %v3327_v31 = vmul.f32 %v3325_v63, %v3319_v61  ;;  %v3334_v30 = vadd.f32 %v3333_v2, %v3326_v45  ;;  %v3320_v25 = vmul.f32 %v8610_v24, %v9478_v38  ;;  %v3348_v45 = vrot.slane %v3253_v51, %v8951_v56 }
0x18be   :  { %v8612_v42 = vpop.eup %8611 }
0x18bf   :  { %v3321_v55 = vmul.f32 %v8612_v42, %v9484_v17  ;;  %v3335_v53 = vadd.f32 %v3333_v2, %v3327_v31  ;;  %v3328_v50 = vmul.f32 %v3325_v63, %v3320_v25 }
0x18c0   :  { %v8614_v35 = vpop.eup %8613 }
0x18c1   :  { %v3338_v1 = vpack.c.bf16 %v3335_v53, %v3334_v30  ;;  %v3329_v28 = vmul.f32 %v3325_v63, %v3321_v55  ;;  %v3633_v12 = vmul.f32 %v8614_v35, %v9490_v60  ;;  %v3336_v60 = vadd.f32 %v3333_v2, %v3328_v50  ;;  %v8455_v63 = vld [vmem:[%s10129_s16 + $0x8] sm:$0xff]  }
0x18c2   :  { %v8616_v33 = vpop.eup %8615 }
0x18c3   :  { %v3634_v46 = vmul.f32 %v8616_v33, %v9496_v29  ;;  %7132 = vmatmul.mubr.msk.bf16.vlgmr.msra.gmra.mrb[48].mxu1 %vm141_vm3, %v3338_v1  ;;  %v3639_v17 = vmul.f32 %v3638_v59, %v3633_v12  ;;  %v3337_v38 = vadd.f32 %v3333_v2, %v3329_v28  ;;  %v8423_v29 = vld [vmem:[%s10119_s6 + $0x28] sm:$0x1f]  }
0x18c4   :  { %3419 = vmatprep.mubr.bf16.mxu1 %v8752_v7  ;;  %7813 = vmatpush3.bf16.msra.mxu1 %v8450_v37  ;;  %v3661_v37 = vpop.permute.xlu1 %3660  ;;  %v3759_v43 = vand.u32 %v8423_v29, %v8965_v62 }
0x18c5   :  { %v3640_v40 = vmul.f32 %v3638_v59, %v3634_v46  ;;  %7814 = vmatprep.subr.bf16.mxu1 %v8451_v19  ;;  %v3645_v6 = vadd.f32 %v3644_v3, %v3639_v17  ;;  %v3339_v5 = vpack.c.bf16 %v3337_v38, %v3336_v60  ;;  %v3663_v49 = vmul.f32 %v3661_v37, %v8982_v26  ;;  %v8453_v26 = vld [vmem:[%s10119_s6 + $0x20] sm:$0xff]  }
0x18c6   :  { %v3664_v4 = vmul.f32 %v3661_v37, %v8993_v36  ;;  %v8454_v36 = vld [vmem:[%s10129_s16] sm:$0xff]  }
0x18c7   :  { %v3646_v41 = vadd.f32 %v3644_v3, %v3640_v40  ;;  %v3669_v13 = vadd.f32 %v3667_v8, %v3663_v49  ;;  %7792 = vmatprep.subr.bf16.mxu0 %v8454_v36 }
0x18c8   :  { %7815 = vmatpush3.bf16.msra.mxu1 %v8451_v19  ;;  %v3670_v57 = vadd.f32 %v3667_v8, %v3664_v4  ;;  %7793 = vmatpush3.bf16.msra.mxu0 %v8454_v36 }
0x18c9   :  { %v3671_v11 = vpack.c.bf16 %v3646_v41, %v3645_v6  ;;  %7820 = vmatprep.subr.bf16.mxu1 %v8747_v0  ;;  %7794 = vmatprep.subr.bf16.mxu0 %v8455_v63 }
0x18ca   :  { %v3749_v62 = vpack.c.bf16 %v3670_v57, %v3669_v13 }
0x18cb   :  { %7133 = vmatmul.mubr.msk.bf16.gmra.mrb[52].mxu1 %vm141_vm3, %v3339_v5 }
0x18cc   :  { %7816 = vmatprep.mubr.msk.bf16.mxu1 %vm141_vm3, %v3671_v11  ;;  %7795 = vmatpush3.bf16.msra.mxu0 %v8455_v63 }
0x18d3   :  { %7817 = vmatmul.mubr.msk.bf16.vlgmr.msra.gmra.mrb[56].mxu1 %vm141_vm3, %v3671_v11 }
0x18d4   :  { %7821 = vmatpush3.bf16.msra.mxu1 %v3759_v43  ;;  %7822 = vmatprep.mubr.msk.bf16.mxu1 %vm8748_vm1, %v8747_v0 }
0x18d5   :  { %7826 = vmatprep.subr.bf16.mxu1 %v8747_v0 }
0x18db   :  { %7823 = vmatmul.mubr.msk.bf16.vlgmr.msra.gmra.mrb[60].mxu1 %vm148_vm2, %v3749_v62 }
0x18dc   :  { %7827 = vmatpush3.bf16.msra.mxu1 %v8452_v10  ;;  %7830 = vmatprep.mubr.msk.bf16.mxu1 %vm8748_vm1, %v8747_v0 }
0x18dd   :  { %7828 = vmatprep.subr.bf16.mxu1 %v8747_v0  ;;  %v8456_v0 = vld [vmem:[%s10129_s16 + $0x10] sm:$0xff]  }
0x18de   :  { %7796 = vmatprep.subr.bf16.mxu0 %v8456_v0 }
0x18df   :  { %7797 = vmatpush3.bf16.msra.mxu0 %v8456_v0 }
0x18e0   :  { %7829 = vmatpush3.bf16.msra.mxu1 %v8453_v26  ;;  %7798 = vmatprep.subr.bf16.mxu0 %v8457_v47  ;;  %v3344_v26 = vrot.slane %v3253_v51, %v8943_v54 }
0x18e3   :  { %7799 = vmatpush3.bf16.msra.mxu0 %v8457_v47 }
0x18e4   :  { %7800 = vmatprep.subr.bf16.mxu0 %v8458_v48 }
0x18e7   :  { %7831 = vmatmul.mubr.msk.bf16.vlgmr.msra.gmra.mrb[60].mxu1 %vm141_vm3, %v3748_v44  ;;  %7801 = vmatpush3.bf16.msra.mxu0 %v8458_v48  ;;  %v8459_v44 = vld [vmem:[%s10129_s16 + $0x28] sm:$0xff]  }
0x18e8   :  { %7802 = vmatprep.subr.bf16.mxu0 %v8459_v44 }
0x18eb   :  { %7803 = vmatpush3.bf16.msra.mxu0 %v8459_v44 }
0x18ec   :  { %7804 = vmatprep.subr.bf16.mxu0 %v8460_v14 }
0x18ef   :  { %7805 = vmatpush3.bf16.msra.mxu0 %v8460_v14 }
0x18f0   :  { %7806 = vmatprep.subr.bf16.mxu0 %v8461_v23 }
0x18f3   :  { %7807 = vmatpush3.bf16.msra.mxu0 %v8461_v23 }
0x1996   :  { %v3411_v61 = vpop.f32.mrb[48].mxu1 }
0x1997   :  { %v3413_v2 = vpop.f32.mrb[49].mxu1  ;;  %v3412_v48 = vadd.f32 %v3411_v61, %v3344_v26 }
0x1998   :  { %v3414_v24 = vadd.f32 %v3413_v2, %v3348_v45  ;;  %v3415_v31 = vpop.f32.mrb[50].mxu1 }
0x1999   :  { %v3417_v42 = vpop.f32.mrb[51].mxu1  ;;  %v3416_v23 = vadd.f32 %v3415_v31, %v3344_v26 }
0x199a   :  { %v3430_v59 = vmul.f32 %v3414_v24, %v3414_v24  ;;  %v3418_v55 = vadd.f32 %v3417_v42, %v3348_v45 }
0x199c   :  { %v3434_v30 = vmul.f32 %v3430_v59, %v3414_v24  ;;  %v3431_v53 = vmul.f32 %v3418_v55, %v3418_v55 }
0x199e   :  { %v3438_v25 = vmul.f32 0.044715, %v3434_v30  ;;  %v3435_v35 = vmul.f32 %v3431_v53, %v3418_v55  ;;  %v3421_v1 = vpop.f32.mrb[52].mxu1 }
0x199f   :  { %v3423_v28 = vpop.f32.mrb[53].mxu1  ;;  %v3422_v51 = vadd.f32 %v3421_v1, %v3344_v26 }
0x19a0   :  { %v3442_v12 = vadd.f32 %v3438_v25, %v3414_v24  ;;  %v3439_v19 = vmul.f32 0.044715, %v3435_v35  ;;  %v3424_v33 = vadd.f32 %v3423_v28, %v3348_v45  ;;  %v3425_v46 = vpop.f32.mrb[54].mxu1 }
0x19a1   :  { %v3427_v50 = vpop.f32.mrb[55].mxu1 }
0x19a2   :  { %v3446_v17 = vmul.f32 0.7978846, %v3442_v12  ;;  %v3443_v3 = vadd.f32 %v3439_v19, %v3418_v55  ;;  %v3432_v38 = vmul.f32 %v3424_v33, %v3424_v33  ;;  %v3428_v40 = vadd.f32 %v3427_v50, %v3348_v45 }
0x19a4   :  { %8617 = vtanh.f32 %v3446_v17  ;;  %v3447_v60 = vmul.f32 0.7978846, %v3443_v3  ;;  %v3436_v6 = vmul.f32 %v3432_v38, %v3424_v33  ;;  %v3433_v41 = vmul.f32 %v3428_v40, %v3428_v40 }
0x19a6   :  { %8619 = vtanh.f32 %v3447_v60  ;;  %v3440_v5 = vmul.f32 0.044715, %v3436_v6  ;;  %v3437_v11 = vmul.f32 %v3433_v41, %v3428_v40  ;;  %v7818_v29 = vpop.f32.mrb[56].mxu1 }
0x19a7   :  { %v3726_v37 = vpop.f32.mrb[57].mxu1  ;;  %7841 = vmatprep.mubr.msk.f32.mxu1 %vm446_vm6, %v7818_v29 }
0x19a8   :  { %v3444_v43 = vadd.f32 %v3440_v5, %v3424_v33  ;;  %v3441_v49 = vmul.f32 0.044715, %v3437_v11  ;;  %v7819_v4 = vpop.f32.mrb[58].mxu1 }
0x19a9   :  { %v3729_v8 = vpop.f32.mrb[59].mxu1 }
0x19aa   :  { %v3448_v13 = vmul.f32 0.7978846, %v3444_v43  ;;  %v3445_v57 = vadd.f32 %v3441_v49, %v3428_v40 }
0x19ac   :  { %8621 = vtanh.f32 %v3448_v13  ;;  %v3449_v10 = vmul.f32 0.7978846, %v3445_v57 }
0x19ae   :  { %v8618_v62 = vpop.eup %8617  ;;  %8623 = vtanh.f32 %v3449_v10 }
0x19af   :  { %v3454_v36 = vadd.f32 1.0, %v8618_v62 }
0x19b0   :  { %v8620_v63 = vpop.eup %8619 }
0x19b1   :  { %v3455_v0 = vadd.f32 1.0, %v8620_v63  ;;  %v3458_v47 = vmul.f32 0.5, %v3454_v36 }
0x19b3   :  { %v3459_v44 = vmul.f32 0.5, %v3455_v0  ;;  %v3462_v14 = vmul.f32 %v3458_v47, %v3414_v24  ;;  %v3426_v24 = vadd.f32 %v3425_v46, %v3344_v26  ;;  %v3475_v46 = vrot.slane %v9431_v34, %v9145_v9 }
0x19b5   :  { %v3463_v45 = vmul.f32 %v3459_v44, %v3418_v55  ;;  %v3466_v2 = vmul.f32 %v3462_v14, %v3412_v48 }
0x19b6   :  { %v8622_v42 = vpop.eup %8621 }
0x19b7   :  { %v3456_v59 = vadd.f32 1.0, %v8622_v42  ;;  %v3467_v30 = vmul.f32 %v3463_v45, %v3416_v23 }
0x19b8   :  { %v8624_v53 = vpop.eup %8623 }
0x19b9   :  { %v3460_v25 = vmul.f32 0.5, %v3456_v59  ;;  %v3457_v35 = vadd.f32 1.0, %v8624_v53  ;;  %v3470_v28 = vpack.c.bf16 %v3467_v30, %v3466_v2 }
0x19ba   :  { %v9605_v12 = vpop.f32.mrb[60].mxu1 }
0x19bb   :  { %v3464_v19 = vmul.f32 %v3460_v25, %v3424_v33  ;;  %v3461_v50 = vmul.f32 0.5, %v3457_v35  ;;  %7808 = vmatprep.mubr.bf16.mxu0 %v3470_v28  ;;  %v7832_v17 = vpop.f32.mrb[61].mxu1  ;;  %7834 = vmatprep.subr.msk.mxu0 %vm446_vm6, %v9605_v12 }
0x19bc   :  { %v9609_v61 = vpop.f32.mrb[62].mxu1 }
0x19bd   :  { %v3465_v31 = vmul.f32 %v3461_v50, %v3428_v40  ;;  %v7833_v55 = vpop.f32.mrb[63].mxu1  ;;  %7839 = vmatprep.subr.msk.mxu1 %vm446_vm6, %v9609_v61  ;;  %v3468_v3 = vmul.f32 %v3464_v19, %v3422_v51 }
0x19be   :  { %7840 = vmatpush3.xpose.msk.msra.mxu1 %vm446_vm6, %v9609_v61 }
0x19bf   :  { %v3469_v1 = vmul.f32 %v3465_v31, %v3426_v24 }
0x19c1   :  { %7842 = vmatmul.mubr.msk.f32.vlgmr.msra.gmra.mrb[64].mxu1 %vm446_vm6, %v7819_v4  ;;  %v3471_v33 = vpack.c.bf16 %v3469_v1, %v3468_v3 }
0x19c3   :  { %7809 = vmatmul.mubr.bf16.vlgmr.msra.gmra.mrb[28].mxu0 %v3471_v33 }
0x19c4   :  { %7835 = vmatpush3.xpose.msk.msra.mxu0 %vm446_vm6, %v9605_v12  ;;  %7836 = vmatprep.mubr.msk.f32.mxu0 %vm446_vm6, %v3726_v37 }
0x19cb   :  { %7837 = vmatmul.mubr.msk.f32.vlgmr.msra.gmra.mrb[32].mxu0 %vm446_vm6, %v3729_v8 }
0x1a94   :  { %v7843_v38 = vpop.f32.mrb[64].mxu1 }
0x1a95   :  { %v4020_v40 = vpop.f32.mrb[65].mxu1  ;;  %v4032_v48 = vmul.f32 0.25, %v7843_v38 }
0x1a96   :  { %v7810_v60 = vpop.f32.mrb[28].mxu0 }
0x1a97   :  { %v3567_v6 = vadd.f32 %v7810_v60, %v3475_v46  ;;  %v3558_v41 = vpop.f32.mrb[29].mxu0  ;;  %v4042_v59 = vsel %vm619_vm7, %v4032_v48, -inf }
0x1a98   :  { %v3559_v5 = vadd.f32 %v3558_v41, %v3475_v46  ;;  %v7811_v11 = vpop.f32.mrb[30].mxu0 }
0x1a99   :  { %v3575_v29 = vadd.f32 %v3567_v6, %v9439_v16  ;;  %v3570_v43 = vadd.f32 %v7811_v11, %v3475_v46  ;;  %v3561_v49 = vpop.f32.mrb[31].mxu0 }
0x1a9a   :  { %v3573_v4 = vadd.f32 %v3559_v5, %v9436_v58  ;;  %v3562_v13 = vadd.f32 %v3561_v49, %v3475_v46 }
0x1a9b   :  { %v3576_v37 = vadd.f32 %v3570_v43, %v9447_v32  ;;  %v3586_v34 = vsel %vm141_vm3, %v3575_v29, 0.0 }
0x1a9c   :  { %v3574_v8 = vadd.f32 %v3562_v13, %v9442_v21  ;;  %v3577_v10 = vsel %vm141_vm3, %v3573_v4, 0.0  ;;  %v4031_v21 = vmul.f32 0.25, %v4020_v40 }
0x1a9d   :  { %v3587_v57 = vsel %vm141_vm3, %v3576_v37, 0.0 }
0x1a9e   :  { %v3588_v62 = vadd.f32 %v3587_v57, %v3586_v34  ;;  %v3578_v26 = vsel %vm141_vm3, %v3574_v8, 0.0  ;;  %v7838_v36 = vpop.f32.mrb[32].mxu0  ;;  %v4039_v53 = vsel %vm619_vm7, %v4031_v21, -inf }
0x1a9f   :  { %v3579_v16 = vadd.f32 %v3578_v26, %v3577_v10  ;;  %v4030_v63 = vmul.f32 0.25, %v7838_v36  ;;  %v3936_v0 = vpop.f32.mrb[33].mxu0 }
0x1aa0   :  { %v3589_v47 = vrot.slane %v3588_v62, 4  ;;  %v4029_v58 = vmul.f32 0.25, %v3936_v0 }
0x1aa1   :  { %v3580_v44 = vrot.slane %v3579_v16, 4  ;;  %v4036_v32 = vsel %vm619_vm7, %v4030_v63, -inf }
0x1aa2   :  { %v3590_v14 = vadd.f32 %v3589_v47, %v3588_v62  ;;  %4037 = vmax.xlane.f32.xlu0 %v4036_v32  ;;  %v4033_v23 = vsel %vm619_vm7, %v4029_v58, -inf }
0x1aa3   :  { %v3581_v45 = vadd.f32 %v3580_v44, %v3579_v16  ;;  %4034 = vmax.xlane.f32.xlu1 %v4033_v23 }
0x1aa4   :  { %v3591_v2 = vrot.slane %v3590_v14, 2 }
0x1aa5   :  { %v3582_v42 = vrot.slane %v3581_v45, 2 }
0x1aa6   :  { %v3592_v30 = vadd.f32 %v3591_v2, %v3590_v14  ;;  %4043 = vmax.xlane.f32.xlu0 %v4042_v59 }
0x1aa7   :  { %v3583_v25 = vadd.f32 %v3582_v42, %v3581_v45  ;;  %4040 = vmax.xlane.f32.xlu1 %v4039_v53  ;;  %v4250_v45 = vrot.slane %v9533_v18, %v9057_v15 }
0x1aa8   :  { %v3593_v35 = vrot.slane %v3592_v30, 1 }
0x1aa9   :  { %v3584_v28 = vrot.slane %v3583_v25, 1 }
0x1aaa   :  { %v3594_v51 = vadd.f32 %v3593_v35, %v3592_v30 }
0x1aab   :  { %v3585_v19 = vadd.f32 %v3584_v28, %v3583_v25 }
0x1aad   :  { %v3598_v50 = vsel %vm3597_vm9, %v3594_v51, %v3585_v19 }
0x1aae   :  { %3601 = vst.msk [vmem:[%s10131_s19] sm:$0x3] %vm3600_vm10, %v3598_v50 }
0x1b2f   :  { %v4038_v17 = vpop.xlane.xlu0 %4037 }
0x1b30   :  { %v4035_v24 = vpop.xlane.xlu1 %4034  ;;  %v4046_v31 = vsub.f32 %v4030_v63, %v4038_v17 }
0x1b31   :  { %v4045_v55 = vsub.f32 %v4029_v58, %v4035_v24  ;;  %v8462_v58 = vld [vmem:[%s10121_s7 + $0x8] sm:$0xff]  }
0x1b32   :  { %v4051_v38 = vmul.f32 1.442695, %v4046_v31 }
0x1b33   :  { %v4044_v3 = vpop.xlane.xlu0 %4043  ;;  %v4049_v60 = vmul.f32 1.442695, %v4045_v55 }
0x1b34   :  { %v4048_v1 = vsub.f32 %v4032_v48, %v4044_v3  ;;  %v4041_v33 = vpop.xlane.xlu1 %4040 }
0x1b35   :  { %v4047_v46 = vsub.f32 %v4031_v21, %v4041_v33 }
0x1b36   :  { %v4055_v40 = vmul.f32 1.442695, %v4048_v1 }
0x1b37   :  { %v4053_v6 = vmul.f32 1.442695, %v4047_v46 }
0x1b38   :  { %8625 = vpow2.f32 %v4055_v40 }
0x1b39   :  { %8627 = vpow2.f32 %v4053_v6 }
0x1b3a   :  { %8629 = vpow2.f32 %v4051_v38 }
0x1b3b   :  { %8631 = vpow2.f32 %v4049_v60 }
0x1b42   :  { %v8626_v41 = vpop.eup %8625 }
0x1b43   :  { %v8628_v5 = vpop.eup %8627  ;;  %v4066_v11 = vsel %vm619_vm7, %v8626_v41, 0.0 }
0x1b44   :  { %v8630_v29 = vpop.eup %8629  ;;  %4067 = vadd.xlane.f32.xlu0 %v4066_v11  ;;  %v4063_v43 = vsel %vm619_vm7, %v8628_v5, 0.0 }
0x1b45   :  { %v8632_v49 = vpop.eup %8631  ;;  %4064 = vadd.xlane.f32.xlu1 %v4063_v43  ;;  %v4060_v4 = vsel %vm619_vm7, %v8630_v29, 0.0 }
0x1b46   :  { %v4057_v13 = vsel %vm619_vm7, %v8632_v49, 0.0 }
0x1b48   :  { %4061 = vadd.xlane.f32.xlu0 %v4060_v4 }
0x1b49   :  { %4058 = vadd.xlane.f32.xlu1 %v4057_v13 }
0x1b5a   :  { %4077 = vrot.lane.b32.xlu1 %v9605_v12, %s8751_s22 }
0x1b5e   :  { %4161 = vrot.lane.b32.xlu0 %v9609_v61, %s8751_s22 }
0x1bd1   :  { %v4068_v37 = vpop.xlane.xlu0 %4067 }
0x1bd2   :  { %8633 = vrcp.f32 %v4068_v37  ;;  %v4065_v8 = vpop.xlane.xlu1 %4064 }
0x1bd3   :  { %8635 = vrcp.f32 %v4065_v8 }
0x1bd5   :  { %v4062_v34 = vpop.xlane.xlu0 %4061 }
0x1bd6   :  { %8637 = vrcp.f32 %v4062_v34  ;;  %v4059_v57 = vpop.xlane.xlu1 %4058 }
0x1bd7   :  { %8639 = vrcp.f32 %v4059_v57  ;;  %v8465_v57 = vld [vmem:[%s10122_s8 + $0x24] ss:$8 sps:$4 sm:$0xff]  }
0x1bd9   :  { %v4162_v10 = vpop.permute.xlu0 %4161 }
0x1bda   :  { %7849 = vmatprep.subr.mxu1 %v4162_v10  ;;  %v4078_v62 = vpop.permute.xlu1 %4077 }
0x1bdb   :  { %7844 = vmatprep.subr.mxu0 %v4078_v62  ;;  %7850 = vmatpush3.msra.mxu1 %v4162_v10  ;;  %v8463_v10 = vld [vmem:[%s10122_s8 + $0x20] ss:$8 sps:$4 sm:$0xff]  }
0x1bdc   :  { %v8634_v26 = vpop.eup %8633  ;;  %7845 = vmatpush3.msra.mxu0 %v4078_v62  ;;  %4447 = vmatprep.subr.bf16.mxu1 %v8465_v57  ;;  %v8466_v62 = vld [vmem:[%s10122_s8 + $0x30] ss:$8 sps:$4 sm:$0xff]  }
0x1bdd   :  { %v8636_v36 = vpop.eup %8635  ;;  %v4076_v16 = vmul.f32 %v8634_v26, %v8626_v41  ;;  %7854 = vmatprep.subr.bf16.mxu0 %v8462_v58  ;;  %v8468_v26 = vld [vmem:[%s10122_s8 + $0x34] ss:$8 sps:$4 sm:$0xff]  }
0x1bde   :  { %v4075_v12 = vmul.f32 %v8636_v36, %v8628_v5 }
0x1be0   :  { %v8638_v63 = vpop.eup %8637  ;;  %7851 = vmatprep.mubr.msk.f32.mxu1 %vm619_vm7, %v4075_v12 }
0x1be1   :  { %v8640_v61 = vpop.eup %8639  ;;  %7852 = vmatmul.mubr.msk.f32.vlgmr.msra.gmra.mrb[66].mxu1 %vm619_vm7, %v4076_v16  ;;  %v4074_v47 = vmul.f32 %v8638_v63, %v8630_v29 }
0x1be2   :  { %v4073_v0 = vmul.f32 %v8640_v61, %v8632_v49  ;;  %4479 = vmatprep.mubr.bf16.mxu1 %v8752_v7  ;;  %4448 = vmatpush1.bf16.msra.mxu1 %v8463_v10 }
0x1be3   :  { %4449 = vmatprep.subr.bf16.mxu1 %v8468_v26 }
0x1be4   :  { %7846 = vmatprep.mubr.msk.f32.mxu0 %vm619_vm7, %v4073_v0 }
0x1be5   :  { %7847 = vmatmul.mubr.msk.f32.vlgmr.msra.gmra.mrb[34].mxu0 %vm619_vm7, %v4074_v47 }
0x1be6   :  { %7855 = vmatpush3.bf16.msra.mxu0 %v8462_v58  ;;  %4450 = vmatpush1.bf16.msra.mxu1 %v8466_v62 }
0x1cb4   :  { %v7853_v48 = vpop.f32.mrb[66].mxu1 }
0x1cb5   :  { %v4236_v44 = vpop.f32.mrb[67].mxu1 }
0x1cb6   :  { %v4246_v32 = vpack.c.bf16 %v7853_v48, %v4236_v44 }
0x1cb8   :  { %v7848_v21 = vpop.f32.mrb[34].mxu0 }
0x1cb9   :  { %v4152_v14 = vpop.f32.mrb[35].mxu0 }
0x1cba   :  { %v4245_v23 = vpack.c.bf16 %v7848_v21, %v4152_v14  ;;  %v4395_v14 = vrot.slane %v9533_v18, %v9103_v20 }
0x1cbc   :  { %7856 = vmatprep.mubr.msk.bf16.mxu0 %vm446_vm6, %v4245_v23 }
0x1cbd   :  { %7857 = vmatmul.mubr.msk.bf16.vlgmr.msra.gmra.mrb[36].mxu0 %vm446_vm6, %v4246_v32 }
0x1d90   :  { %v7858_v2 = vpop.f32.mrb[36].mxu0 }
0x1d91   :  { %v4297_v42 = vpop.f32.mrb[37].mxu0  ;;  %v4306_v59 = vadd.f32 %v7858_v2, %v4250_v45 }
0x1d92   :  { %v4298_v30 = vadd.f32 %v4297_v42, %v4250_v45  ;;  %v7859_v53 = vpop.f32.mrb[38].mxu0 }
0x1d93   :  { %v4300_v25 = vpop.f32.mrb[39].mxu0  ;;  %v4309_v28 = vadd.f32 %v7859_v53, %v4250_v45  ;;  %v9663_v19 = vadd.f32 %v9454_v39, %v4306_v59 }
0x1d94   :  { %v9660_v35 = vadd.f32 %v9454_v39, %v4298_v30  ;;  %v4301_v51 = vadd.f32 %v4300_v25, %v4250_v45  ;;  %v4403_v30 = vrot.slane %v9533_v18, %v9108_v22 }
0x1d95   :  { %v9671_v24 = vadd.f32 %v9461_v52, %v4309_v28  ;;  %v4346_v55 = vsel %vm141_vm3, %v9663_v19, 0.0 }
0x1d96   :  { %v9666_v50 = vadd.f32 %v9461_v52, %v4301_v51  ;;  %v4340_v17 = vsel %vm141_vm3, %v9660_v35, 0.0 }
0x1d97   :  { %4341 = vadd.xlane.f32.xlu1 %v4340_v17  ;;  %v4349_v39 = vsel %vm141_vm3, %v9671_v24, 0.0 }
0x1d98   :  { %v4343_v31 = vsel %vm141_vm3, %v9666_v50, 0.0 }
0x1d99   :  { %4344 = vadd.xlane.f32.xlu0 %v4343_v31 }
0x1d9b   :  { %4347 = vadd.xlane.f32.xlu1 %v4346_v55 }
0x1d9d   :  { %4350 = vadd.xlane.f32.xlu0 %v4349_v39 }
0x1e24   :  { %v4342_v3 = vpop.xlane.xlu1 %4341 }
0x1e25   :  { %v4352_v1 = vmul.f32 0.03125, %v4342_v3 }
0x1e26   :  { %v4345_v33 = vpop.xlane.xlu0 %4344 }
0x1e27   :  { %v4356_v46 = vsub.f32 %v9660_v35, %v4352_v1  ;;  %v4353_v38 = vmul.f32 0.03125, %v4345_v33 }
0x1e28   :  { %v4348_v52 = vpop.xlane.xlu1 %4347 }
0x1e29   :  { %v4357_v40 = vsub.f32 %v9666_v50, %v4353_v38  ;;  %v4354_v60 = vmul.f32 0.03125, %v4348_v52  ;;  %v4360_v6 = vmul.f32 %v4356_v46, %v4356_v46  ;;  %v8469_v52 = vld [vmem:[%s10123_s9 + $0x40] sm:$0xff]  }
0x1e2a   :  { %v4351_v41 = vpop.xlane.xlu0 %4350  ;;  %7860 = vmatprep.subr.bf16.mxu0 %v8469_v52 }
0x1e2b   :  { %v4358_v5 = vsub.f32 %v9663_v19, %v4354_v60  ;;  %v4355_v11 = vmul.f32 0.03125, %v4351_v41  ;;  %v4364_v29 = vsel %vm141_vm3, %v4360_v6, 0.0  ;;  %v4361_v43 = vmul.f32 %v4357_v40, %v4357_v40  ;;  %7861 = vmatpush3.bf16.msra.mxu0 %v8469_v52  ;;  %v8471_v60 = vld [vmem:[%s10123_s9 + $0x50] sm:$0xff]   ;;  %v8472_v6 = vld [vmem:[%s10123_s9 + $0x58] sm:$0xff]   ;;  %v8473_v41 = vld [vmem:[%s10123_s9 + $0x60] sm:$0xff]  }
0x1e2c   :  { %4365 = vadd.xlane.f32.xlu1 %v4364_v29  ;;  %v8476_v29 = vld [vmem:[%s10123_s9 + $0x78] sm:$0xff]  }
0x1e2d   :  { %v4359_v49 = vsub.f32 %v9671_v24, %v4355_v11  ;;  %v4367_v4 = vsel %vm141_vm3, %v4361_v43, 0.0  ;;  %v4362_v13 = vmul.f32 %v4358_v5, %v4358_v5  ;;  %v8475_v11 = vld [vmem:[%s10123_s9 + $0x70] sm:$0xff]   ;;  %v7184_v43 = vld [vmem:[%s10124_s12 + $0x2] sm:$0x3] }
0x1e2e   :  { %4368 = vadd.xlane.f32.xlu0 %v4367_v4 }
0x1e2f   :  { %v4370_v37 = vsel %vm141_vm3, %v4362_v13, 0.0  ;;  %v4363_v8 = vmul.f32 %v4359_v49, %v4359_v49 }
0x1e30   :  { %4371 = vadd.xlane.f32.xlu1 %v4370_v37 }
0x1e31   :  { %v4373_v34 = vsel %vm141_vm3, %v4363_v8, 0.0 }
0x1e32   :  { %4374 = vadd.xlane.f32.xlu0 %v4373_v34 }
0x1eb9   :  { %v4366_v36 = vpop.xlane.xlu1 %4365 }
0x1eba   :  { %v4376_v12 = vmul.f32 0.03125, %v4366_v36 }
0x1ebb   :  { %v4369_v16 = vpop.xlane.xlu0 %4368 }
0x1ebc   :  { %v4380_v63 = vadd.f32 1e-05, %v4376_v12  ;;  %v4377_v61 = vmul.f32 0.03125, %v4369_v16 }
0x1ebd   :  { %v4372_v0 = vpop.xlane.xlu1 %4371 }
0x1ebe   :  { %8641 = vrsqrt.f32 %v4380_v63  ;;  %v4381_v47 = vadd.f32 1e-05, %v4377_v61  ;;  %v4378_v58 = vmul.f32 0.03125, %v4372_v0 }
0x1ebf   :  { %v4375_v48 = vpop.xlane.xlu0 %4374 }
0x1ec0   :  { %8643 = vrsqrt.f32 %v4381_v47  ;;  %v4382_v44 = vadd.f32 1e-05, %v4378_v58  ;;  %v4379_v32 = vmul.f32 0.03125, %v4375_v48 }
0x1ec2   :  { %8645 = vrsqrt.f32 %v4382_v44  ;;  %v4383_v21 = vadd.f32 1e-05, %v4379_v32 }
0x1ec4   :  { %8647 = vrsqrt.f32 %v4383_v21 }
0x1ec8   :  { %v8642_v23 = vpop.eup %8641 }
0x1ec9   :  { %v4388_v45 = vmul.f32 %v8642_v23, %v4356_v46 }
0x1eca   :  { %v8644_v2 = vpop.eup %8643 }
0x1ecb   :  { %v4396_v42 = vmul.f32 %v4395_v14, %v4388_v45  ;;  %v4389_v59 = vmul.f32 %v8644_v2, %v4357_v40  ;;  %v8470_v40 = vld [vmem:[%s10123_s9 + $0x48] sm:$0xff]  }
0x1ecc   :  { %v8646_v53 = vpop.eup %8645  ;;  %7862 = vmatprep.subr.bf16.mxu0 %v8470_v40 }
0x1ecd   :  { %v4397_v25 = vmul.f32 %v4395_v14, %v4389_v59  ;;  %v4390_v51 = vmul.f32 %v8646_v53, %v4358_v5  ;;  %v4404_v31 = vadd.f32 %v4403_v30, %v4396_v42  ;;  %7863 = vmatpush3.bf16.msra.mxu0 %v8470_v40  ;;  %v8474_v5 = vld [vmem:[%s10123_s9 + $0x68] sm:$0xff]  }
0x1ece   :  { %v8648_v28 = vpop.eup %8647  ;;  %7864 = vmatprep.subr.bf16.mxu0 %v8471_v60 }
0x1ecf   :  { %v4391_v17 = vmul.f32 %v8648_v28, %v4359_v49  ;;  %v4405_v55 = vadd.f32 %v4403_v30, %v4397_v25  ;;  %v4398_v1 = vmul.f32 %v4395_v14, %v4390_v51  ;;  %v4418_v49 = vrot.slane %v7184_v43, %v8951_v56 }
0x1ed1   :  { %v4408_v39 = vpack.c.bf16 %v4405_v55, %v4404_v31  ;;  %v4399_v3 = vmul.f32 %v4395_v14, %v4391_v17  ;;  %v4406_v46 = vadd.f32 %v4403_v30, %v4398_v1  ;;  %7865 = vmatpush3.bf16.msra.mxu0 %v8471_v60  ;;  %v4414_v31 = vrot.slane %v7184_v43, %v8943_v54 }
0x1ed2   :  { %7866 = vmatprep.subr.bf16.mxu0 %v8472_v6 }
0x1ed3   :  { %7205 = vmatmul.mubr.msk.bf16.vlgmr.msra.gmra.mrb[68].mxu1 %vm141_vm3, %v4408_v39  ;;  %v4407_v33 = vadd.f32 %v4403_v30, %v4399_v3 }
0x1ed4   :  { %4489 = vmatprep.mubr.bf16.mxu1 %v8752_v7 }
0x1ed5   :  { %v4409_v38 = vpack.c.bf16 %v4407_v33, %v4406_v46  ;;  %7867 = vmatpush3.bf16.msra.mxu0 %v8472_v6 }
0x1ed6   :  { %7868 = vmatprep.subr.bf16.mxu0 %v8473_v41 }
0x1ed9   :  { %7869 = vmatpush3.bf16.msra.mxu0 %v8473_v41 }
0x1eda   :  { %7870 = vmatprep.subr.bf16.mxu0 %v8474_v5 }
0x1edb   :  { %7206 = vmatmul.mubr.msk.bf16.gmra.mrb[72].mxu1 %vm141_vm3, %v4409_v38 }
0x1edd   :  { %7871 = vmatpush3.bf16.msra.mxu0 %v8474_v5 }
0x1ede   :  { %7872 = vmatprep.subr.bf16.mxu0 %v8475_v11 }
0x1ee1   :  { %7873 = vmatpush3.bf16.msra.mxu0 %v8475_v11 }
0x1ee2   :  { %7874 = vmatprep.subr.bf16.mxu0 %v8476_v29 }
0x1ee5   :  { %7875 = vmatpush3.bf16.msra.mxu0 %v8476_v29 }
0x1fa6   :  { %v4481_v4 = vpop.f32.mrb[68].mxu1 }
0x1fa7   :  { %v4483_v13 = vpop.f32.mrb[69].mxu1  ;;  %v4482_v33 = vadd.f32 %v4481_v4, %v4414_v31 }
0x1fa8   :  { %v4484_v37 = vadd.f32 %v4483_v13, %v4418_v49  ;;  %v4485_v8 = vpop.f32.mrb[70].mxu1 }
0x1fa9   :  { %v4487_v34 = vpop.f32.mrb[71].mxu1  ;;  %v4486_v52 = vadd.f32 %v4485_v8, %v4414_v31 }
0x1faa   :  { %v4500_v57 = vmul.f32 %v4484_v37, %v4484_v37  ;;  %v4488_v10 = vadd.f32 %v4487_v34, %v4418_v49 }
0x1fac   :  { %v4504_v62 = vmul.f32 %v4500_v57, %v4484_v37  ;;  %v4501_v26 = vmul.f32 %v4488_v10, %v4488_v10 }
0x1fae   :  { %v4508_v36 = vmul.f32 0.044715, %v4504_v62  ;;  %v4505_v12 = vmul.f32 %v4501_v26, %v4488_v10  ;;  %v4491_v16 = vpop.f32.mrb[72].mxu1 }
0x1faf   :  { %v4493_v63 = vpop.f32.mrb[73].mxu1  ;;  %v4492_v34 = vadd.f32 %v4491_v16, %v4414_v31 }
0x1fb0   :  { %v4512_v61 = vadd.f32 %v4508_v36, %v4484_v37  ;;  %v4509_v0 = vmul.f32 0.044715, %v4505_v12  ;;  %v4494_v47 = vadd.f32 %v4493_v63, %v4418_v49  ;;  %v4495_v58 = vpop.f32.mrb[74].mxu1 }
0x1fb1   :  { %v4497_v48 = vpop.f32.mrb[75].mxu1  ;;  %v4496_v62 = vadd.f32 %v4495_v58, %v4414_v31 }
0x1fb2   :  { %v4516_v44 = vmul.f32 0.7978846, %v4512_v61  ;;  %v4513_v32 = vadd.f32 %v4509_v0, %v4488_v10  ;;  %v4502_v21 = vmul.f32 %v4494_v47, %v4494_v47  ;;  %v4498_v14 = vadd.f32 %v4497_v48, %v4418_v49 }
0x1fb4   :  { %8649 = vtanh.f32 %v4516_v44  ;;  %v4517_v23 = vmul.f32 0.7978846, %v4513_v32  ;;  %v4506_v45 = vmul.f32 %v4502_v21, %v4494_v47  ;;  %v4503_v2 = vmul.f32 %v4498_v14, %v4498_v14 }
0x1fb6   :  { %8651 = vtanh.f32 %v4517_v23  ;;  %v4510_v42 = vmul.f32 0.044715, %v4506_v45  ;;  %v4507_v59 = vmul.f32 %v4503_v2, %v4498_v14 }
0x1fb8   :  { %v4514_v30 = vadd.f32 %v4510_v42, %v4494_v47  ;;  %v4511_v53 = vmul.f32 0.044715, %v4507_v59 }
0x1fba   :  { %v4518_v25 = vmul.f32 0.7978846, %v4514_v30  ;;  %v4515_v28 = vadd.f32 %v4511_v53, %v4498_v14 }
0x1fbc   :  { %8653 = vtanh.f32 %v4518_v25  ;;  %v4519_v51 = vmul.f32 0.7978846, %v4515_v28 }
0x1fbe   :  { %v8650_v17 = vpop.eup %8649  ;;  %8655 = vtanh.f32 %v4519_v51 }
0x1fbf   :  { %v4524_v55 = vadd.f32 1.0, %v8650_v17 }
0x1fc0   :  { %v8652_v39 = vpop.eup %8651 }
0x1fc1   :  { %v4525_v3 = vadd.f32 1.0, %v8652_v39  ;;  %v4528_v1 = vmul.f32 0.5, %v4524_v55 }
0x1fc3   :  { %v4529_v46 = vmul.f32 0.5, %v4525_v3  ;;  %v4532_v38 = vmul.f32 %v4528_v1, %v4484_v37  ;;  %v4545_v37 = vrot.slane %v9533_v18, %v9145_v9 }
0x1fc5   :  { %v4533_v40 = vmul.f32 %v4529_v46, %v4488_v10  ;;  %v4536_v60 = vmul.f32 %v4532_v38, %v4482_v33  ;;  %v8477_v38 = vld [vmem:[%s10125_s13 + $0x10] sm:$0xff]  }
0x1fc6   :  { %v8654_v6 = vpop.eup %8653  ;;  %7880 = vmatprep.subr.bf16.mxu1 %v8477_v38 }
0x1fc7   :  { %v4526_v41 = vadd.f32 1.0, %v8654_v6  ;;  %v4537_v5 = vmul.f32 %v4533_v40, %v4486_v52  ;;  %7881 = vmatpush3.bf16.msra.mxu1 %v8477_v38  ;;  %v8478_v52 = vld [vmem:[%s10125_s13 + $0x18] sm:$0xff]  }
0x1fc8   :  { %v8656_v11 = vpop.eup %8655  ;;  %7882 = vmatprep.subr.bf16.mxu1 %v8478_v52 }
0x1fc9   :  { %v4530_v29 = vmul.f32 0.5, %v4526_v41  ;;  %v4527_v49 = vadd.f32 1.0, %v8656_v11  ;;  %v4540_v13 = vpack.c.bf16 %v4537_v5, %v4536_v60 }
0x1fcb   :  { %v4534_v57 = vmul.f32 %v4530_v29, %v4494_v47  ;;  %v4531_v43 = vmul.f32 0.5, %v4527_v49  ;;  %7876 = vmatprep.mubr.bf16.mxu0 %v4540_v13  ;;  %7883 = vmatpush3.bf16.msra.mxu1 %v8478_v52 }
0x1fcd   :  { %v4535_v26 = vmul.f32 %v4531_v43, %v4498_v14  ;;  %v4538_v36 = vmul.f32 %v4534_v57, %v4492_v34 }
0x1fcf   :  { %v4539_v4 = vmul.f32 %v4535_v26, %v4496_v62  ;;  %v9774_v62 = vld [vmem:[%s10126_s17 + $0x8] sm:$0x3f] }
0x1fd0   :  { %v4704_v26 = vrot.slane %v9774_v62, %v8943_v54 }
0x1fd1   :  { %v4541_v12 = vpack.c.bf16 %v4539_v4, %v4538_v36 }
0x1fd3   :  { %7877 = vmatmul.mubr.bf16.vlgmr.msra.gmra.mrb[40].mxu0 %v4541_v12 }
0x20a6   :  { %v7878_v8 = vpop.f32.mrb[40].mxu0 }
0x20a7   :  { %v4628_v10 = vpop.f32.mrb[41].mxu0  ;;  %v4637_v63 = vadd.f32 %v7878_v8, %v4545_v37  ;;  %v4712_v8 = vrot.slane %v9774_v62, %v8951_v56 }
0x20a8   :  { %v4629_v61 = vadd.f32 %v4628_v10, %v4545_v37  ;;  %v7879_v0 = vpop.f32.mrb[42].mxu0 }
0x20a9   :  { %v4631_v48 = vpop.f32.mrb[43].mxu0  ;;  %v4640_v47 = vadd.f32 %v7879_v0, %v4545_v37  ;;  %v9741_v58 = vadd.f32 %v4637_v63, %v9663_v19 }
0x20aa   :  { %v9738_v16 = vadd.f32 %v4629_v61, %v9660_v35  ;;  %v4632_v44 = vadd.f32 %v4631_v48, %v4545_v37 }
0x20ab   :  { %v9749_v21 = vadd.f32 %v4640_v47, %v9671_v24  ;;  %v4655_v35 = vsel %vm141_vm3, %v9741_v58, 0.0 }
0x20ac   :  { %v9744_v32 = vadd.f32 %v4632_v44, %v9666_v50  ;;  %v4649_v18 = vsel %vm141_vm3, %v9738_v16, 0.0 }
0x20ad   :  { %4650 = vadd.xlane.f32.xlu1 %v4649_v18  ;;  %v4658_v19 = vsel %vm141_vm3, %v9749_v21, 0.0 }
0x20ae   :  { %v4652_v14 = vsel %vm141_vm3, %v9744_v32, 0.0 }
0x20af   :  { %4653 = vadd.xlane.f32.xlu0 %v4652_v14 }
0x20b1   :  { %4656 = vadd.xlane.f32.xlu1 %v4655_v35 }
0x20b3   :  { %4659 = vadd.xlane.f32.xlu0 %v4658_v19 }
0x213a   :  { %v4651_v50 = vpop.xlane.xlu1 %4650 }
0x213b   :  { %v4661_v23 = vmul.f32 0.03125, %v4651_v50 }
0x213c   :  { %v4654_v45 = vpop.xlane.xlu0 %4653 }
0x213d   :  { %v4665_v2 = vsub.f32 %v9738_v16, %v4661_v23  ;;  %v4662_v42 = vmul.f32 0.03125, %v4654_v45 }
0x213e   :  { %v4657_v24 = vpop.xlane.xlu1 %4656 }
0x213f   :  { %v4666_v59 = vsub.f32 %v9744_v32, %v4662_v42  ;;  %v4663_v30 = vmul.f32 0.03125, %v4657_v24  ;;  %v4669_v53 = vmul.f32 %v4665_v2, %v4665_v2 }
0x2140   :  { %v4660_v25 = vpop.xlane.xlu0 %4659 }
0x2141   :  { %v4667_v28 = vsub.f32 %v9741_v58, %v4663_v30  ;;  %v4664_v51 = vmul.f32 0.03125, %v4660_v25  ;;  %v4673_v17 = vsel %vm141_vm3, %v4669_v53, 0.0  ;;  %v4670_v31 = vmul.f32 %v4666_v59, %v4666_v59 }
0x2142   :  { %4674 = vadd.xlane.f32.xlu1 %v4673_v17 }
0x2143   :  { %v4668_v55 = vsub.f32 %v9749_v21, %v4664_v51  ;;  %v4676_v39 = vsel %vm141_vm3, %v4670_v31, 0.0  ;;  %v4671_v3 = vmul.f32 %v4667_v28, %v4667_v28 }
0x2144   :  { %4677 = vadd.xlane.f32.xlu0 %v4676_v39 }
0x2145   :  { %v4679_v1 = vsel %vm141_vm3, %v4671_v3, 0.0  ;;  %v4672_v33 = vmul.f32 %v4668_v55, %v4668_v55 }
0x2146   :  { %4680 = vadd.xlane.f32.xlu1 %v4679_v1 }
0x2147   :  { %v4682_v46 = vsel %vm141_vm3, %v4672_v33, 0.0 }
0x2148   :  { %4683 = vadd.xlane.f32.xlu0 %v4682_v46 }
0x21cf   :  { %v4675_v40 = vpop.xlane.xlu1 %4674 }
0x21d0   :  { %v4685_v60 = vmul.f32 0.03125, %v4675_v40 }
0x21d1   :  { %v4678_v6 = vpop.xlane.xlu0 %4677 }
0x21d2   :  { %v4689_v41 = vadd.f32 1e-05, %v4685_v60  ;;  %v4686_v5 = vmul.f32 0.03125, %v4678_v6 }
0x21d3   :  { %v4681_v11 = vpop.xlane.xlu1 %4680 }
0x21d4   :  { %8657 = vrsqrt.f32 %v4689_v41  ;;  %v4690_v29 = vadd.f32 1e-05, %v4686_v5  ;;  %v4687_v49 = vmul.f32 0.03125, %v4681_v11 }
0x21d5   :  { %v4684_v13 = vpop.xlane.xlu0 %4683 }
0x21d6   :  { %8659 = vrsqrt.f32 %v4690_v29  ;;  %v4691_v34 = vadd.f32 1e-05, %v4687_v49  ;;  %v4688_v57 = vmul.f32 0.03125, %v4684_v13 }
0x21d8   :  { %8661 = vrsqrt.f32 %v4691_v34  ;;  %v4692_v43 = vadd.f32 1e-05, %v4688_v57 }
0x21da   :  { %8663 = vrsqrt.f32 %v4692_v43 }
0x21de   :  { %v8658_v36 = vpop.eup %8657 }
0x21df   :  { %v4697_v4 = vmul.f32 %v8658_v36, %v4665_v2 }
0x21e0   :  { %v8660_v12 = vpop.eup %8659 }
0x21e1   :  { %v4698_v37 = vmul.f32 %v8660_v12, %v4666_v59  ;;  %v4705_v10 = vmul.f32 %v4704_v26, %v4697_v4 }
0x21e2   :  { %v8662_v63 = vpop.eup %8661 }
0x21e3   :  { %v4699_v61 = vmul.f32 %v8662_v63, %v4667_v28  ;;  %v4706_v0 = vmul.f32 %v4704_v26, %v4698_v37  ;;  %v4713_v18 = vadd.f32 %v4712_v8, %v4705_v10 }
0x21e4   :  { %v8664_v48 = vpop.eup %8663 }
0x21e5   :  { %v4707_v47 = vmul.f32 %v4704_v26, %v4699_v61  ;;  %v4700_v44 = vmul.f32 %v8664_v48, %v4668_v55  ;;  %v4714_v14 = vadd.f32 %v4712_v8, %v4706_v0 }
0x21e7   :  { %v4708_v35 = vmul.f32 %v4704_v26, %v4700_v44  ;;  %v4717_v19 = vpack.c.bf16 %v4714_v14, %v4713_v18  ;;  %v4715_v50 = vadd.f32 %v4712_v8, %v4707_v47 }
0x21e9   :  { %v4716_v23 = vadd.f32 %v4712_v8, %v4708_v35  ;;  %7884 = vmatprep.mubr.msk.bf16.mxu1 %vm141_vm3, %v4717_v19 }
0x21eb   :  { %v4718_v45 = vpack.c.bf16 %v4716_v23, %v4715_v50 }
0x21ed   :  { %7885 = vmatmul.mubr.msk.bf16.vlgmr.msra.gmra.mrb[76].mxu1 %vm141_vm3, %v4718_v45 }
0x22c0   :  { %v9782_v2 = vpop.f32.mrb[76].mxu1 }
0x22c1   :  { %v9784_v42 = vpop.f32.mrb[77].mxu1 }
0x22c2   :  { %v9786_v24 = vpop.f32.mrb[78].mxu1  ;;  %7892 = vmatprep.mubr.msk.f32.mxu1 %vm619_vm7, %v9784_v42 }
0x22c3   :  { %v9790_v59 = vpop.f32.mrb[79].mxu1  ;;  %v9794_v30 = vpack.i.bf16 %v9786_v24, %v9782_v2 }
0x22c4   :  { %v9798_v53 = vpack.i.bf16 %v9790_v59, %v9784_v42 }
0x22c5   :  { %8345 = vrot.lane.b32.xlu0 %v9794_v30, %s8749_s3 }
0x22c6   :  { %8340 = vrot.lane.b32.xlu1 %v9798_v53, %s8749_s3 }
0x2337   :  { %v8346_v25 = vpop.permute.xlu0 %8345 }
0x2338   :  { %v8341_v28 = vpop.permute.xlu1 %8340  ;;  %v8348_v51 = vunpack.i.h.bf16 %v8346_v25  ;;  %v8347_v17 = vunpack.i.l.bf16 %v8346_v25 }
0x2339   :  { %v8343_v31 = vunpack.i.h.bf16 %v8341_v28  ;;  %v8342_v55 = vunpack.i.l.bf16 %v8341_v28 }
0x233a   :  { %v8130_v3 = vpack.c.bf16 %v8348_v51, %v8347_v17 }
0x233b   :  { %v8124_v39 = vpack.c.bf16 %v8343_v31, %v8342_v55 }
0x233d   :  { %8126 = vmatprep.subr.msk.bf16.mxu1 %vm9214_vm8, %v8124_v39 }
0x233e   :  { %8129 = vmatpush3.bf16.xpose.msk.msra.mxu1 %vm9214_vm8, %v8124_v39 }
0x233f   :  { %8132 = vmatprep.subr.msk.bf16.mxu1 %vm9214_vm8, %v8130_v3 }
0x2345   :  { %7893 = vmatmul.mubr.msk.f32.vlgmr.msra.gmra.mrb[80].mxu1 %vm619_vm7, %v9790_v59 }
0x2346   :  { %8135 = vmatpush3.bf16.xpose.msk.msra.mxu1 %vm9214_vm8, %v8130_v3  ;;  %7899 = vmatprep.mubr.msk.f32.mxu1 %vm619_vm7, %v9782_v2 }
0x234d   :  { %7900 = vmatmul.mubr.msk.f32.vlgmr.msra.gmra.mrb[82].mxu1 %vm619_vm7, %v9786_v24 }
0x2418   :  { %v7894_v1 = vpop.f32.mrb[80].mxu1 }
0x2419   :  { %v4876_v33 = vpop.f32.mrb[81].mxu1  ;;  %v4975_v10 = vmul.f32 0.35355338, %v7894_v1 }
0x241a   :  { %v4974_v8 = vmul.f32 0.35355338, %v4876_v33 }
0x241b   :  { %v4981_v61 = vsel %vm446_vm6, %v4975_v10, -inf }
0x241c   :  { %v4978_v63 = vsel %vm446_vm6, %v4974_v8, -inf }
0x2420   :  { %v7901_v46 = vpop.f32.mrb[82].mxu1 }
0x2421   :  { %v4977_v38 = vmul.f32 0.35355338, %v7901_v46  ;;  %v4965_v52 = vpop.f32.mrb[83].mxu1 }
0x2422   :  { %v4976_v40 = vmul.f32 0.35355338, %v4965_v52 }
0x2423   :  { %v4987_v60 = vsel %vm446_vm6, %v4977_v38, -inf }
0x2424   :  { %4988 = vmax.xlane.f32.xlu0 %v4987_v60  ;;  %v4984_v6 = vsel %vm446_vm6, %v4976_v40, -inf }
0x2425   :  { %4985 = vmax.xlane.f32.xlu1 %v4984_v6 }
0x2436   :  { %8350 = vrot.lane.b32.xlu1 %v9794_v30, %s8753_s28 }
0x243a   :  { %5289 = vrot.lane.b32.xlu1 %v9782_v2, %s8754_s29 }
0x24b1   :  { %v4989_v41 = vpop.xlane.xlu0 %4988 }
0x24b2   :  { %v4993_v5 = vsub.f32 %v4977_v38, %v4989_v41  ;;  %v4986_v11 = vpop.xlane.xlu1 %4985 }
0x24b3   :  { %v4992_v29 = vsub.f32 %v4976_v40, %v4986_v11 }
0x24b4   :  { %v5000_v49 = vmul.f32 1.442695, %v4993_v5 }
0x24b5   :  { %v4998_v13 = vmul.f32 1.442695, %v4992_v29 }
0x24b6   :  { %8665 = vpow2.f32 %v5000_v49  ;;  %v8351_v34 = vpop.permute.xlu1 %8350 }
0x24b7   :  { %8667 = vpow2.f32 %v4998_v13  ;;  %v8353_v57 = vunpack.i.h.bf16 %v8351_v34  ;;  %v8352_v43 = vunpack.i.l.bf16 %v8351_v34 }
0x24b9   :  { %v8140_v26 = vpack.c.bf16 %v8353_v57, %v8352_v43 }
0x24ba   :  { %v5290_v0 = vpop.permute.xlu1 %5289 }
0x24bb   :  { %8141 = vmatprep.subr.bf16.mxu1 %v8140_v26 }
0x24bc   :  { %8143 = vmatpush3.bf16.msra.mxu1 %v8140_v26 }
0x24c0   :  { %v8666_v36 = vpop.eup %8665 }
0x24c1   :  { %v8668_v4 = vpop.eup %8667  ;;  %v5011_v12 = vsel %vm446_vm6, %v8666_v36, 0.0 }
0x24c2   :  { %5012 = vadd.xlane.f32.xlu0 %v5011_v12  ;;  %v5008_v37 = vsel %vm446_vm6, %v8668_v4, 0.0 }
0x24c3   :  { %5009 = vadd.xlane.f32.xlu1 %v5008_v37 }
0x24d4   :  { %5291 = vrot.lane.b32.xlu1 %v9786_v24, %s8754_s29 }
0x24d8   :  { %8355 = vrot.lane.b32.xlu0 %v9794_v30, %s8755_s30 }
0x24f7   :  { %4979 = vmax.xlane.f32.xlu0 %v4978_v63 }
0x24f8   :  { %4982 = vmax.xlane.f32.xlu1 %v4981_v61 }
0x2509   :  { %8360 = vrot.lane.b32.xlu1 %v9798_v53, %s8753_s28 }
0x250d   :  { %5198 = vrot.lane.b32.xlu1 %v9784_v42, %s8754_s29 }
0x2511   :  { %5200 = vrot.lane.b32.xlu1 %v9790_v59, %s8754_s29  ;;  %s10149_s29 = smov 104  }
0x254f   :  { %v5013_v48 = vpop.xlane.xlu0 %5012 }
0x2550   :  { %8669 = vrcp.f32 %v5013_v48  ;;  %v5010_v47 = vpop.xlane.xlu1 %5009 }
0x2551   :  { %8671 = vrcp.f32 %v5010_v47 }
0x2553   :  { %v8356_v44 = vpop.permute.xlu0 %8355 }
0x2554   :  { %v8358_v18 = vunpack.i.h.bf16 %v8356_v44  ;;  %v8357_v14 = vunpack.i.l.bf16 %v8356_v44  ;;  %v5292_v25 = vpop.permute.xlu1 %5291 }
0x2556   :  { %v8150_v35 = vpack.c.bf16 %v8358_v18, %v8357_v14 }
0x2558   :  { %8152 = vmatprep.subr.msk.bf16.mxu1 %vm9214_vm8, %v8150_v35 }
0x255a   :  { %v8670_v19 = vpop.eup %8669 }
0x255b   :  { %v8672_v50 = vpop.eup %8671  ;;  %v5021_v45 = vmul.f32 %v8670_v19, %v8666_v36 }
0x255c   :  { %v5020_v23 = vmul.f32 %v8672_v50, %v8668_v4 }
0x255e   :  { %7913 = vmatprep.mubr.msk.f32.mxu1 %vm446_vm6, %v5020_v23 }
0x255f   :  { %7914 = vmatmul.mubr.msk.f32.vlgmr.msra.gmra.mrb[84].mxu1 %vm446_vm6, %v5021_v45 }
0x2560   :  { %8155 = vmatpush3.bf16.xpose.msk.msra.mxu1 %vm9214_vm8, %v8150_v35  ;;  %7927 = vmatprep.mubr.msk.f32.mxu1 %vm619_vm7, %v5290_v0 }
0x2567   :  { %7928 = vmatmul.mubr.msk.f32.vlgmr.msra.gmra.mrb[86].mxu1 %vm619_vm7, %v5292_v25 }
0x2584   :  { %v4980_v28 = vpop.xlane.xlu0 %4979 }
0x2585   :  { %v4990_v51 = vsub.f32 %v4974_v8, %v4980_v28  ;;  %v4983_v17 = vpop.xlane.xlu1 %4982 }
0x2586   :  { %v4991_v31 = vsub.f32 %v4975_v10, %v4983_v17 }
0x2587   :  { %v4994_v55 = vmul.f32 1.442695, %v4990_v51 }
0x2588   :  { %v4996_v39 = vmul.f32 1.442695, %v4991_v31 }
0x2589   :  { %8673 = vpow2.f32 %v4994_v55  ;;  %v8361_v3 = vpop.permute.xlu1 %8360 }
0x258a   :  { %v8363_v1 = vunpack.i.h.bf16 %v8361_v3  ;;  %v8362_v33 = vunpack.i.l.bf16 %v8361_v3  ;;  %8675 = vpow2.f32 %v4996_v39 }
0x258c   :  { %v8136_v46 = vpack.c.bf16 %v8363_v1, %v8362_v33 }
0x258d   :  { %v5199_v4 = vpop.permute.xlu1 %5198 }
0x258e   :  { %8137 = vmatprep.subr.bf16.mxu0 %v8136_v46 }
0x258f   :  { %8139 = vmatpush3.bf16.msra.mxu0 %v8136_v46 }
0x2591   :  { %v5201_v8 = vpop.permute.xlu1 %5200 }
0x2593   :  { %v8674_v38 = vpop.eup %8673 }
0x2594   :  { %v5002_v52 = vsel %vm446_vm6, %v8674_v38, 0.0  ;;  %v8676_v40 = vpop.eup %8675 }
0x2595   :  { %5003 = vadd.xlane.f32.xlu0 %v5002_v52  ;;  %v5005_v60 = vsel %vm446_vm6, %v8676_v40, 0.0 }
0x2599   :  { %5006 = vadd.xlane.f32.xlu0 %v5005_v60 }
0x25af   :  { %8365 = vrot.lane.b32.xlu0 %v9798_v53, %s8755_s30 }
0x2622   :  { %v5004_v6 = vpop.xlane.xlu0 %5003 }
0x2623   :  { %8677 = vrcp.f32 %v5004_v6 }
0x2626   :  { %v5007_v41 = vpop.xlane.xlu0 %5006 }
0x2627   :  { %8679 = vrcp.f32 %v5007_v41 }
0x262a   :  { %v8366_v5 = vpop.permute.xlu0 %8365 }
0x262b   :  { %v8368_v11 = vunpack.i.h.bf16 %v8366_v5  ;;  %v8367_v29 = vunpack.i.l.bf16 %v8366_v5 }
0x262d   :  { %v8678_v49 = vpop.eup %8677  ;;  %v8144_v13 = vpack.c.bf16 %v8368_v11, %v8367_v29 }
0x262e   :  { %v5018_v34 = vmul.f32 %v8678_v49, %v8674_v38 }
0x262f   :  { %8146 = vmatprep.subr.msk.bf16.mxu0 %vm9214_vm8, %v8144_v13 }
0x2630   :  { %7906 = vmatprep.mubr.msk.f32.mxu0 %vm446_vm6, %v5018_v34 }
0x2631   :  { %v8680_v57 = vpop.eup %8679 }
0x2632   :  { %v5019_v43 = vmul.f32 %v8680_v57, %v8676_v40  ;;  %v9853_v26 = vpop.f32.mrb[84].mxu1 }
0x2633   :  { %v9855_v36 = vpop.f32.mrb[85].mxu1 }
0x2634   :  { %v5197_v12 = vpack.c.bf16 %v9853_v26, %v9855_v36  ;;  %7907 = vmatmul.mubr.msk.f32.vlgmr.msra.gmra.mrb[44].mxu0 %vm446_vm6, %v5019_v43 }
0x2635   :  { %8149 = vmatpush3.bf16.xpose.msk.msra.mxu0 %vm9214_vm8, %v8144_v13  ;;  %7920 = vmatprep.mubr.msk.f32.mxu0 %vm619_vm7, %v5199_v4 }
0x263a   :  { %v7929_v37 = vpop.f32.mrb[86].mxu1 }
0x263b   :  { %v5383_v10 = vmul.f32 0.35355338, %v7929_v37  ;;  %v5371_v63 = vpop.f32.mrb[87].mxu1 }
0x263c   :  { %v5382_v61 = vmul.f32 0.35355338, %v5371_v63  ;;  %7921 = vmatmul.mubr.msk.f32.vlgmr.msra.gmra.mrb[46].mxu0 %vm619_vm7, %v5201_v8 }
0x263d   :  { %v5393_v0 = vsel %vm446_vm6, %v5383_v10, -inf }
0x263e   :  { %5394 = vmax.xlane.f32.xlu1 %v5393_v0  ;;  %v5390_v48 = vsel %vm446_vm6, %v5382_v61, -inf }
0x263f   :  { %5391 = vmax.xlane.f32.xlu0 %v5390_v48 }
0x264f   :  { %8370 = vrot.lane.b32.xlu1 %v9794_v30, %s8756_s20 }
0x2653   :  { %8380 = vrot.lane.b32.xlu1 %v9794_v30, %s8757_s11 }
0x2657   :  { %5720 = vrot.lane.b32.xlu1 %v9784_v42, %s8751_s22 }
0x265b   :  { %5811 = vrot.lane.b32.xlu1 %v9782_v2, %s8751_s22 }
0x26cb   :  { %v5395_v47 = vpop.xlane.xlu1 %5394 }
0x26cc   :  { %v5399_v44 = vsub.f32 %v5383_v10, %v5395_v47  ;;  %v5392_v18 = vpop.xlane.xlu0 %5391 }
0x26cd   :  { %v5398_v14 = vsub.f32 %v5382_v61, %v5392_v18 }
0x26ce   :  { %v5406_v35 = vmul.f32 1.442695, %v5399_v44 }
0x26cf   :  { %v5404_v19 = vmul.f32 1.442695, %v5398_v14  ;;  %v8371_v50 = vpop.permute.xlu1 %8370 }
0x26d0   :  { %8681 = vpow2.f32 %v5406_v35  ;;  %v8373_v23 = vunpack.i.h.bf16 %v8371_v50  ;;  %v8372_v45 = vunpack.i.l.bf16 %v8371_v50 }
0x26d1   :  { %8683 = vpow2.f32 %v5404_v19 }
0x26d2   :  { %v8160_v25 = vpack.c.bf16 %v8373_v23, %v8372_v45 }
0x26d3   :  { %v8381_v49 = vpop.permute.xlu1 %8380 }
0x26d4   :  { %8161 = vmatprep.subr.bf16.mxu1 %v8160_v25  ;;  %v8383_v57 = vunpack.i.h.bf16 %v8381_v49  ;;  %v8382_v43 = vunpack.i.l.bf16 %v8381_v49 }
0x26d5   :  { %8163 = vmatpush3.bf16.msra.mxu1 %v8160_v25 }
0x26d6   :  { %v8170_v8 = vpack.c.bf16 %v8383_v57, %v8382_v43 }
0x26d7   :  { %v5721_v10 = vpop.permute.xlu1 %5720 }
0x26da   :  { %v8682_v28 = vpop.eup %8681 }
0x26db   :  { %v5417_v51 = vsel %vm446_vm6, %v8682_v28, 0.0  ;;  %v8684_v17 = vpop.eup %8683  ;;  %v5812_v61 = vpop.permute.xlu1 %5811 }
0x26dc   :  { %5418 = vadd.xlane.f32.xlu0 %v5417_v51  ;;  %v5414_v31 = vsel %vm446_vm6, %v8684_v17, 0.0 }
0x26e0   :  { %5415 = vadd.xlane.f32.xlu0 %v5414_v31 }
0x26f6   :  { %8375 = vrot.lane.b32.xlu0 %v9798_v53, %s8757_s11  ;;  %s10150_s11 = smov 40  }
0x26fa   :  { %5722 = vrot.lane.b32.xlu0 %v9790_v59, %s8751_s22 }
0x26fe   :  { %5813 = vrot.lane.b32.xlu0 %v9786_v24, %s8751_s22 }
0x2707   :  { %v9882_v55 = vpop.f32.mrb[44].mxu0 }
0x2708   :  { %v9884_v39 = vpop.f32.mrb[45].mxu0 }
0x2709   :  { %v5196_v3 = vpack.c.bf16 %v9882_v55, %v9884_v39 }
0x270f   :  { %v7922_v1 = vpop.f32.mrb[46].mxu0 }
0x2710   :  { %v5280_v33 = vpop.f32.mrb[47].mxu0  ;;  %v5381_v52 = vmul.f32 0.35355338, %v7922_v1 }
0x2711   :  { %v5380_v46 = vmul.f32 0.35355338, %v5280_v33 }
0x2712   :  { %v5387_v40 = vsel %vm446_vm6, %v5381_v52, -inf }
0x2713   :  { %v5384_v38 = vsel %vm446_vm6, %v5380_v46, -inf }
0x2714   :  { %5385 = vmax.xlane.f32.xlu1 %v5384_v38 }
0x271d   :  { %5388 = vmax.xlane.f32.xlu0 %v5387_v40 }
0x2769   :  { %v5419_v60 = vpop.xlane.xlu0 %5418 }
0x276a   :  { %8685 = vrcp.f32 %v5419_v60 }
0x276d   :  { %v5416_v6 = vpop.xlane.xlu0 %5415 }
0x276e   :  { %8687 = vrcp.f32 %v5416_v6 }
0x2771   :  { %v8376_v41 = vpop.permute.xlu0 %8375 }
0x2772   :  { %v8378_v5 = vunpack.i.h.bf16 %v8376_v41  ;;  %v8377_v11 = vunpack.i.l.bf16 %v8376_v41 }
0x2774   :  { %v8164_v29 = vpack.c.bf16 %v8378_v5, %v8377_v11  ;;  %v8686_v13 = vpop.eup %8685 }
0x2775   :  { %v5427_v37 = vmul.f32 %v8686_v13, %v8682_v28  ;;  %v5723_v63 = vpop.permute.xlu0 %5722 }
0x2776   :  { %8166 = vmatprep.subr.msk.bf16.mxu1 %vm9214_vm8, %v8164_v29 }
0x2778   :  { %v8688_v34 = vpop.eup %8687 }
0x2779   :  { %v5426_v4 = vmul.f32 %v8688_v34, %v8684_v17  ;;  %v5814_v0 = vpop.permute.xlu0 %5813 }
0x277b   :  { %7941 = vmatprep.mubr.msk.f32.mxu1 %vm446_vm6, %v5426_v4 }
0x277c   :  { %7942 = vmatmul.mubr.msk.f32.vlgmr.msra.gmra.mrb[88].mxu1 %vm446_vm6, %v5427_v37 }
0x277d   :  { %8169 = vmatpush3.bf16.xpose.msk.msra.mxu1 %vm9214_vm8, %v8164_v29  ;;  %7960 = vmatprep.mubr.msk.f32.mxu1 %vm619_vm7, %v5721_v10  ;;  %v7225_v10 = vld [vmem:[%s10127_s14 + $0x14] sm:$0xf] }
0x277e   :  { %8172 = vmatprep.subr.msk.bf16.mxu1 %vm9214_vm8, %v8170_v8 }
0x2784   :  { %7961 = vmatmul.mubr.msk.f32.vlgmr.msra.gmra.mrb[90].mxu1 %vm619_vm7, %v5723_v63  ;;  %v5611_v63 = vsel %vm95_vm0, %v7225_v10, 0 }
0x2785   :  { %8175 = vmatpush3.bf16.xpose.msk.msra.mxu1 %vm9214_vm8, %v8170_v8  ;;  %7967 = vmatprep.mubr.msk.f32.mxu1 %vm619_vm7, %v5812_v61  ;;  %v7224_v61 = vld [vmem:[%s10127_s14 + $0x10] sm:$0xf] }
0x278c   :  { %7968 = vmatmul.mubr.msk.f32.vlgmr.msra.gmra.mrb[92].mxu1 %vm619_vm7, %v5814_v0 }
0x27a1   :  { %v5386_v48 = vpop.xlane.xlu1 %5385 }
0x27a2   :  { %v5396_v47 = vsub.f32 %v5380_v46, %v5386_v48 }
0x27a4   :  { %v5400_v44 = vmul.f32 1.442695, %v5396_v47 }
0x27a6   :  { %8689 = vpow2.f32 %v5400_v44 }
0x27aa   :  { %v5389_v18 = vpop.xlane.xlu0 %5388 }
0x27ab   :  { %v5397_v14 = vsub.f32 %v5381_v52, %v5389_v18 }
0x27ad   :  { %v5402_v35 = vmul.f32 1.442695, %v5397_v14 }
0x27af   :  { %8691 = vpow2.f32 %v5402_v35 }
0x27b0   :  { %v8690_v19 = vpop.eup %8689 }
0x27b1   :  { %v5408_v50 = vsel %vm446_vm6, %v8690_v19, 0.0 }
0x27b2   :  { %5409 = vadd.xlane.f32.xlu0 %v5408_v50 }
0x27b9   :  { %v8692_v23 = vpop.eup %8691 }
0x27ba   :  { %v5411_v45 = vsel %vm446_vm6, %v8692_v23, 0.0 }
0x27bb   :  { %5412 = vadd.xlane.f32.xlu1 %v5411_v45 }
0x27c8   :  { %8385 = vrot.lane.b32.xlu0 %v9798_v53, %s8756_s20 }
0x283f   :  { %v5410_v25 = vpop.xlane.xlu0 %5409 }
0x2840   :  { %8693 = vrcp.f32 %v5410_v25 }
0x2843   :  { %v8386_v28 = vpop.permute.xlu0 %8385 }
0x2844   :  { %v8388_v51 = vunpack.i.h.bf16 %v8386_v28  ;;  %v8387_v17 = vunpack.i.l.bf16 %v8386_v28 }
0x2846   :  { %v8156_v31 = vpack.c.bf16 %v8388_v51, %v8387_v17 }
0x2848   :  { %v5413_v1 = vpop.xlane.xlu1 %5412  ;;  %8157 = vmatprep.subr.bf16.mxu0 %v8156_v31 }
0x2849   :  { %8695 = vrcp.f32 %v5413_v1  ;;  %8159 = vmatpush3.bf16.msra.mxu0 %v8156_v31 }
0x284a   :  { %v8694_v33 = vpop.eup %8693  ;;  %8240 = vmatprep.subr.msk.bf16.mxu0 %vm95_vm0, %v7225_v10 }
0x284b   :  { %v5424_v46 = vmul.f32 %v8694_v33, %v8690_v19 }
0x284d   :  { %7934 = vmatprep.mubr.msk.f32.mxu0 %vm446_vm6, %v5424_v46 }
0x284f   :  { %v9909_v38 = vpop.f32.mrb[88].mxu1 }
0x2850   :  { %v9911_v52 = vpop.f32.mrb[89].mxu1 }
0x2851   :  { %v5603_v40 = vpack.c.bf16 %v9909_v38, %v9911_v52 }
0x2853   :  { %v8696_v60 = vpop.eup %8695 }
0x2854   :  { %v5425_v6 = vmul.f32 %v8696_v60, %v8692_v23 }
0x2856   :  { %7935 = vmatmul.mubr.msk.f32.vlgmr.msra.gmra.mrb[48].mxu0 %vm446_vm6, %v5425_v6 }
0x2857   :  { %v7962_v41 = vpop.f32.mrb[90].mxu1  ;;  %7945 = vmatpush3.bf16.msra.mxu0 %v5611_v63 }
0x2858   :  { %v5903_v5 = vmul.f32 0.35355338, %v7962_v41  ;;  %v5802_v11 = vpop.f32.mrb[91].mxu1  ;;  %8241 = vmatprep.subr.msk.bf16.mxu0 %vm95_vm0, %v7224_v61 }
0x2859   :  { %v5902_v29 = vmul.f32 0.35355338, %v5802_v11 }
0x285a   :  { %v5909_v49 = vsel %vm446_vm6, %v5903_v5, -inf }
0x285b   :  { %5910 = vmax.xlane.f32.xlu1 %v5909_v49  ;;  %v5906_v13 = vsel %vm446_vm6, %v5902_v29, -inf }
0x285f   :  { %5907 = vmax.xlane.f32.xlu1 %v5906_v13  ;;  %v7969_v34 = vpop.f32.mrb[92].mxu1  ;;  %v5669_v13 = vsel %vm95_vm0, %v7224_v61, 0 }
0x2860   :  { %v5893_v57 = vpop.f32.mrb[93].mxu1  ;;  %v5905_v4 = vmul.f32 0.35355338, %v7969_v34 }
0x2861   :  { %v5904_v43 = vmul.f32 0.35355338, %v5893_v57 }
0x2862   :  { %v5915_v8 = vsel %vm446_vm6, %v5905_v4, -inf }
0x2863   :  { %v5912_v37 = vsel %vm446_vm6, %v5904_v43, -inf }
0x2864   :  { %5913 = vmax.xlane.f32.xlu1 %v5912_v37 }
0x2868   :  { %5916 = vmax.xlane.f32.xlu1 %v5915_v8 }
0x2879   :  { %8390 = vrot.lane.b32.xlu1 %v9798_v53, %s8758_s24 }
0x28e8   :  { %v5911_v0 = vpop.xlane.xlu1 %5910 }
0x28e9   :  { %v5919_v48 = vsub.f32 %v5903_v5, %v5911_v0 }
0x28eb   :  { %v5924_v47 = vmul.f32 1.442695, %v5919_v48 }
0x28ec   :  { %v5908_v44 = vpop.xlane.xlu1 %5907 }
0x28ed   :  { %8697 = vpow2.f32 %v5924_v47  ;;  %v5918_v18 = vsub.f32 %v5902_v29, %v5908_v44 }
0x28ef   :  { %v5922_v14 = vmul.f32 1.442695, %v5918_v18 }
0x28f1   :  { %8699 = vpow2.f32 %v5922_v14  ;;  %v5914_v35 = vpop.xlane.xlu1 %5913 }
0x28f2   :  { %v5920_v19 = vsub.f32 %v5904_v43, %v5914_v35 }
0x28f4   :  { %v5926_v25 = vmul.f32 1.442695, %v5920_v19 }
0x28f5   :  { %v5917_v50 = vpop.xlane.xlu1 %5916 }
0x28f6   :  { %v5921_v23 = vsub.f32 %v5905_v4, %v5917_v50 }
0x28f7   :  { %v8698_v45 = vpop.eup %8697 }
0x28f8   :  { %v5928_v28 = vmul.f32 1.442695, %v5921_v23  ;;  %v5933_v51 = vsel %vm446_vm6, %v8698_v45, 0.0 }
0x28f9   :  { %5934 = vadd.xlane.f32.xlu0 %v5933_v51  ;;  %v8391_v6 = vpop.permute.xlu1 %8390 }
0x28fa   :  { %8701 = vpow2.f32 %v5928_v28  ;;  %v8393_v5 = vunpack.i.h.bf16 %v8391_v6  ;;  %v8392_v11 = vunpack.i.l.bf16 %v8391_v6 }
0x28fb   :  { %v8700_v17 = vpop.eup %8699  ;;  %8703 = vpow2.f32 %v5926_v25 }
0x28fc   :  { %v5930_v31 = vsel %vm446_vm6, %v8700_v17, 0.0  ;;  %v8176_v34 = vpack.c.bf16 %v8393_v5, %v8392_v11 }
0x28fd   :  { %5931 = vadd.xlane.f32.xlu1 %v5930_v31 }
0x2904   :  { %v9933_v1 = vpop.eup %8701 }
0x2905   :  { %v5939_v33 = vsel %vm446_vm6, %v9933_v1, 0.0  ;;  %v8704_v46 = vpop.eup %8703 }
0x2906   :  { %5940 = vadd.xlane.f32.xlu1 %v5939_v33  ;;  %v5936_v60 = vsel %vm446_vm6, %v8704_v46, 0.0 }
0x290a   :  { %5937 = vadd.xlane.f32.xlu1 %v5936_v60 }
0x290f   :  { %8405 = vrot.lane.b32.xlu0 %v9794_v30, %s8759_s25 }
0x291b   :  { %8395 = vrot.lane.b32.xlu1 %v9794_v30, %s8758_s24 }
0x291f   :  { %8400 = vrot.lane.b32.xlu1 %v9798_v53, %s8759_s25 }
0x2923   :  { %6188 = vrot.lane.b32.xlu1 %v9784_v42, %s10149_s29 }
0x2927   :  { %6190 = vrot.lane.b32.xlu1 %v9790_v59, %s10149_s29 }
0x2929   :  { %v7936_v41 = vpop.f32.mrb[48].mxu0 }
0x292a   :  { %v5506_v29 = vpop.f32.mrb[49].mxu0 }
0x292b   :  { %v5602_v49 = vpack.c.bf16 %v7936_v41, %v5506_v29  ;;  %6279 = vrot.lane.b32.xlu1 %v9782_v2, %s10149_s29  ;;  %v7226_v2 = vld [vmem:[%s10127_s14 + $0x18] sm:$0xf] }
0x292c   :  { %v6133_v26 = vsel %vm95_vm0, %v7226_v2, 0 }
0x292d   :  { %7946 = vmatprep.mubr.msk.bf16.mxu0 %vm619_vm7, %v5602_v49 }
0x292e   :  { %7947 = vmatmul.mubr.msk.bf16.vlgmr.msra.gmra.mrb[52].mxu0 %vm619_vm7, %v5603_v40 }
0x292f   :  { %7951 = vmatpush3.bf16.msra.mxu0 %v5669_v13  ;;  %6281 = vrot.lane.b32.xlu1 %v9786_v24, %s10149_s29 }
0x2930   :  { %7952 = vmatprep.mubr.msk.bf16.mxu0 %vm619_vm7, %v5196_v3  ;;  %8177 = vmatprep.subr.bf16.mxu0 %v8176_v34 }
0x293a   :  { %7953 = vmatmul.mubr.msk.bf16.vlgmr.msra.gmra.mrb[52].mxu0 %vm619_vm7, %v5197_v12 }
0x293b   :  { %8179 = vmatpush3.bf16.msra.mxu0 %v8176_v34 }
0x293c   :  { %8242 = vmatprep.subr.msk.bf16.mxu0 %vm95_vm0, %v7226_v2 }
0x2986   :  { %v5935_v42 = vpop.xlane.xlu0 %5934 }
0x2987   :  { %8705 = vrcp.f32 %v5935_v42 }
0x298a   :  { %v5932_v24 = vpop.xlane.xlu1 %5931  ;;  %v8406_v59 = vpop.permute.xlu0 %8405 }
0x298b   :  { %8707 = vrcp.f32 %v5932_v24  ;;  %v8408_v38 = vunpack.i.h.bf16 %v8406_v59  ;;  %v8407_v52 = vunpack.i.l.bf16 %v8406_v59 }
0x298d   :  { %v8190_v36 = vpack.c.bf16 %v8408_v38, %v8407_v52 }
0x2991   :  { %v8706_v39 = vpop.eup %8705 }
0x2992   :  { %v5947_v57 = vmul.f32 %v8706_v39, %v8698_v45 }
0x2993   :  { %v5941_v55 = vpop.xlane.xlu1 %5940 }
0x2994   :  { %8709 = vrcp.f32 %v5941_v55 }
0x2995   :  { %v8708_v3 = vpop.eup %8707 }
0x2996   :  { %v5946_v40 = vmul.f32 %v8708_v3, %v8700_v17 }
0x2997   :  { %v5938_v43 = vpop.xlane.xlu1 %5937 }
0x2998   :  { %8711 = vrcp.f32 %v5938_v43  ;;  %7974 = vmatprep.mubr.msk.f32.mxu0 %vm446_vm6, %v5946_v40 }
0x2999   :  { %7975 = vmatmul.mubr.msk.f32.vlgmr.msra.gmra.mrb[50].mxu0 %vm446_vm6, %v5947_v57 }
0x299a   :  { %7985 = vmatpush3.bf16.msra.mxu0 %v6133_v26 }
0x299b   :  { %8192 = vmatprep.subr.msk.bf16.mxu0 %vm9214_vm8, %v8190_v36  ;;  %v8396_v12 = vpop.permute.xlu1 %8395 }
0x299c   :  { %v8398_v4 = vunpack.i.h.bf16 %v8396_v12  ;;  %v8397_v37 = vunpack.i.l.bf16 %v8396_v12 }
0x299e   :  { %v8180_v8 = vpack.c.bf16 %v8398_v4, %v8397_v37  ;;  %v8710_v0 = vpop.eup %8709 }
0x299f   :  { %v8401_v10 = vpop.permute.xlu1 %8400  ;;  %v5949_v18 = vmul.f32 %v8710_v0, %v9933_v1 }
0x29a0   :  { %v8403_v63 = vunpack.i.h.bf16 %v8401_v10  ;;  %v8402_v61 = vunpack.i.l.bf16 %v8401_v10  ;;  %8181 = vmatprep.subr.bf16.mxu1 %v8180_v8 }
0x29a1   :  { %8183 = vmatpush3.bf16.msra.mxu1 %v8180_v8 }
0x29a2   :  { %v8712_v48 = vpop.eup %8711  ;;  %v8184_v47 = vpack.c.bf16 %v8403_v63, %v8402_v61 }
0x29a3   :  { %v5948_v44 = vmul.f32 %v8712_v48, %v8704_v46  ;;  %v6189_v14 = vpop.permute.xlu1 %6188 }
0x29a4   :  { %8186 = vmatprep.subr.msk.bf16.mxu1 %vm9214_vm8, %v8184_v47 }
0x29a5   :  { %7981 = vmatprep.mubr.msk.f32.mxu1 %vm446_vm6, %v5948_v44 }
0x29a6   :  { %7982 = vmatmul.mubr.msk.f32.vlgmr.msra.gmra.mrb[94].mxu1 %vm446_vm6, %v5949_v18 }
0x29a7   :  { %7994 = vmatprep.mubr.msk.f32.mxu1 %vm619_vm7, %v6189_v14  ;;  %v6191_v35 = vpop.permute.xlu1 %6190 }
0x29aa   :  { %8189 = vmatpush3.bf16.xpose.msk.msra.mxu1 %vm9214_vm8, %v8184_v47 }
0x29ab   :  { %v6280_v51 = vpop.permute.xlu1 %6279 }
0x29af   :  { %v6282_v17 = vpop.permute.xlu1 %6281 }
0x29b1   :  { %7995 = vmatmul.mubr.msk.f32.vlgmr.msra.gmra.mrb[96].mxu1 %vm619_vm7, %v6191_v35 }
0x2a6c   :  { %v7976_v19 = vpop.f32.mrb[50].mxu0 }
0x2a6d   :  { %v6028_v50 = vpop.f32.mrb[51].mxu0 }
0x2a6e   :  { %v6124_v23 = vpack.c.bf16 %v7976_v19, %v6028_v50 }
0x2a70   :  { %7986 = vmatprep.mubr.msk.bf16.mxu0 %vm619_vm7, %v6124_v23 }
0x2a79   :  { %v7983_v45 = vpop.f32.mrb[94].mxu1 }
0x2a7a   :  { %v6115_v25 = vpop.f32.mrb[95].mxu1 }
0x2a7b   :  { %v6125_v28 = vpack.c.bf16 %v7983_v45, %v6115_v25 }
0x2a7d   :  { %7987 = vmatmul.mubr.msk.bf16.vlgmr.msra.gmra.mrb[52].mxu0 %vm619_vm7, %v6125_v28 }
0x2a7e   :  { %8195 = vmatpush3.bf16.xpose.msk.msra.mxu0 %vm9214_vm8, %v8190_v36  ;;  %8001 = vmatprep.mubr.msk.f32.mxu0 %vm619_vm7, %v6280_v51 }
0x2a84   :  { %v7996_v31 = vpop.f32.mrb[96].mxu1 }
0x2a85   :  { %v6371_v1 = vmul.f32 0.35355338, %v7996_v31  ;;  %v6270_v33 = vpop.f32.mrb[97].mxu1  ;;  %8002 = vmatmul.mubr.msk.f32.vlgmr.msra.gmra.mrb[56].mxu0 %vm619_vm7, %v6282_v17  ;;  %v7227_v31 = vld [vmem:[%s10127_s14 + $0x1c] sm:$0xf] }
0x2a86   :  { %v6370_v46 = vmul.f32 0.35355338, %v6270_v33 }
0x2a87   :  { %v6377_v60 = vsel %vm446_vm6, %v6371_v1, -inf }
0x2a88   :  { %6378 = vmax.xlane.f32.xlu0 %v6377_v60  ;;  %v6374_v6 = vsel %vm446_vm6, %v6370_v46, -inf }
0x2a89   :  { %6375 = vmax.xlane.f32.xlu1 %v6374_v6 }
0x2b15   :  { %v6379_v41 = vpop.xlane.xlu0 %6378 }
0x2b16   :  { %v6376_v5 = vpop.xlane.xlu1 %6375  ;;  %v6387_v11 = vsub.f32 %v6371_v1, %v6379_v41  ;;  %v6601_v1 = vsel %vm95_vm0, %v7227_v31, 0 }
0x2b17   :  { %v6386_v27 = vsub.f32 %v6370_v46, %v6376_v5 }
0x2b18   :  { %v6392_v29 = vmul.f32 1.442695, %v6387_v11  ;;  %v6659_v11 = vrot.slane %v9774_v62, %v9057_v15 }
0x2b19   :  { %v6390_v49 = vmul.f32 1.442695, %v6386_v27 }
0x2b1a   :  { %8713 = vpow2.f32 %v6392_v29 }
0x2b1b   :  { %8715 = vpow2.f32 %v6390_v49 }
0x2b24   :  { %v8714_v59 = vpop.eup %8713 }
0x2b25   :  { %v8716_v39 = vpop.eup %8715  ;;  %v6401_v3 = vsel %vm446_vm6, %v8714_v59, 0.0 }
0x2b26   :  { %v6398_v38 = vsel %vm446_vm6, %v8716_v39, 0.0 }
0x2b58   :  { %v8003_v13 = vpop.f32.mrb[56].mxu0 }
0x2b59   :  { %v6373_v34 = vmul.f32 0.35355338, %v8003_v13  ;;  %v6361_v2 = vpop.f32.mrb[57].mxu0 }
0x2b5a   :  { %v6372_v42 = vmul.f32 0.35355338, %v6361_v2 }
0x2b5b   :  { %v6383_v24 = vsel %vm446_vm6, %v6373_v34, -inf }
0x2b5c   :  { %6384 = vmax.xlane.f32.xlu1 %v6383_v24  ;;  %v6380_v55 = vsel %vm446_vm6, %v6372_v42, -inf }
0x2b5d   :  { %6381 = vmax.xlane.f32.xlu0 %v6380_v55 }
0x2b60   :  { %6402 = vadd.xlane.f32.xlu1 %v6401_v3 }
0x2b61   :  { %6399 = vadd.xlane.f32.xlu0 %v6398_v38 }
0x2be9   :  { %v6385_v52 = vpop.xlane.xlu1 %6384 }
0x2bea   :  { %v6389_v40 = vsub.f32 %v6373_v34, %v6385_v52  ;;  %v6382_v57 = vpop.xlane.xlu0 %6381 }
0x2beb   :  { %v6388_v43 = vsub.f32 %v6372_v42, %v6382_v57 }
0x2bec   :  { %v6396_v26 = vmul.f32 1.442695, %v6389_v40 }
0x2bed   :  { %v6394_v36 = vmul.f32 1.442695, %v6388_v43  ;;  %v6403_v0 = vpop.xlane.xlu1 %6402 }
0x2bee   :  { %8717 = vpow2.f32 %v6396_v26  ;;  %v6400_v12 = vpop.xlane.xlu0 %6399 }
0x2bef   :  { %8719 = vpow2.f32 %v6394_v36 }
0x2bf0   :  { %8721 = vrcp.f32 %v6400_v12 }
0x2bf1   :  { %8723 = vrcp.f32 %v6403_v0 }
0x2bf8   :  { %v8718_v4 = vpop.eup %8717 }
0x2bf9   :  { %v8720_v37 = vpop.eup %8719  ;;  %v6407_v8 = vsel %vm446_vm6, %v8718_v4, 0.0 }
0x2bfa   :  { %6408 = vadd.xlane.f32.xlu1 %v6407_v8  ;;  %v6404_v10 = vsel %vm446_vm6, %v8720_v37, 0.0  ;;  %v8722_v63 = vpop.eup %8721 }
0x2bfb   :  { %6405 = vadd.xlane.f32.xlu0 %v6404_v10  ;;  %v6414_v61 = vmul.f32 %v8722_v63, %v8716_v39  ;;  %v8724_v25 = vpop.eup %8723 }
0x2bfc   :  { %v6415_v28 = vmul.f32 %v8724_v25, %v8714_v59 }
0x2bfd   :  { %8008 = vmatprep.mubr.msk.f32.mxu1 %vm446_vm6, %v6414_v61 }
0x2c0b   :  { %8415 = vrot.lane.b32.xlu1 %v9794_v30, %s10150_s11 }
0x2c11   :  { %8410 = vrot.lane.b32.xlu0 %v9798_v53, %s10150_s11 }
0x2c87   :  { %v6409_v48 = vpop.xlane.xlu1 %6408 }
0x2c88   :  { %8725 = vrcp.f32 %v6409_v48  ;;  %v6406_v47 = vpop.xlane.xlu0 %6405 }
0x2c89   :  { %8727 = vrcp.f32 %v6406_v47 }
0x2c8b   :  { %v8416_v44 = vpop.permute.xlu1 %8415 }
0x2c8c   :  { %v8418_v18 = vunpack.i.h.bf16 %v8416_v44  ;;  %v8417_v14 = vunpack.i.l.bf16 %v8416_v44  ;;  %v8411_v35 = vpop.permute.xlu0 %8410 }
0x2c8d   :  { %v8413_v19 = vunpack.i.h.bf16 %v8411_v35  ;;  %v8412_v50 = vunpack.i.l.bf16 %v8411_v35  ;;  %v8484_v35 = vld [vmem:[%s10128_s15 + $0x34] ss:$8 sps:$4 sm:$0xff]  }
0x2c8e   :  { %v8200_v23 = vpack.c.bf16 %v8418_v18, %v8417_v14  ;;  %v8481_v18 = vld [vmem:[%s10128_s15 + $0x24] ss:$8 sps:$4 sm:$0xff]   ;;  %v8479_v14 = vld [vmem:[%s10128_s15 + $0x20] ss:$8 sps:$4 sm:$0xff]  }
0x2c8f   :  { %v8196_v45 = vpack.c.bf16 %v8413_v19, %v8412_v50  ;;  %v8482_v19 = vld [vmem:[%s10128_s15 + $0x30] ss:$8 sps:$4 sm:$0xff]  }
0x2c90   :  { %8201 = vmatprep.subr.bf16.mxu0 %v8200_v23 }
0x2c91   :  { %8197 = vmatprep.subr.bf16.mxu1 %v8196_v45  ;;  %8203 = vmatpush3.bf16.msra.mxu0 %v8200_v23 }
0x2c92   :  { %v8726_v30 = vpop.eup %8725  ;;  %8199 = vmatpush3.bf16.msra.mxu1 %v8196_v45  ;;  %8243 = vmatprep.subr.msk.bf16.mxu0 %vm95_vm0, %v7227_v31 }
0x2c93   :  { %v8728_v53 = vpop.eup %8727  ;;  %v6417_v17 = vmul.f32 %v8726_v30, %v8718_v4  ;;  %6799 = vmatprep.subr.bf16.mxu1 %v8481_v18 }
0x2c94   :  { %v6416_v51 = vmul.f32 %v8728_v53, %v8720_v37 }
0x2c95   :  { %8009 = vmatmul.mubr.msk.f32.vlgmr.msra.gmra.mrb[98].mxu1 %vm446_vm6, %v6415_v28 }
0x2c96   :  { %8015 = vmatprep.mubr.msk.f32.mxu0 %vm446_vm6, %v6416_v51  ;;  %6831 = vmatprep.mubr.bf16.mxu1 %v8752_v7 }
0x2c97   :  { %8016 = vmatmul.mubr.msk.f32.vlgmr.msra.gmra.mrb[58].mxu0 %vm446_vm6, %v6417_v17  ;;  %6800 = vmatpush1.bf16.msra.mxu1 %v8479_v14 }
0x2c98   :  { %8019 = vmatpush3.bf16.msra.mxu0 %v6601_v1  ;;  %6801 = vmatprep.subr.bf16.mxu1 %v8484_v35 }
0x2c9b   :  { %6802 = vmatpush1.bf16.msra.mxu1 %v8482_v19 }
0x2d68   :  { %v8010_v33 = vpop.f32.mrb[98].mxu1 }
0x2d69   :  { %v6496_v46 = vpop.f32.mrb[99].mxu1 }
0x2d6a   :  { %v6592_v60 = vpack.c.bf16 %v8010_v33, %v6496_v46  ;;  %v8017_v6 = vpop.f32.mrb[58].mxu0  ;;  %v10059_v46 = vld [vmem:[%s10126_s17 + $0x8] sm:$0x3f] }
0x2d6b   :  { %v6583_v41 = vpop.f32.mrb[59].mxu0 }
0x2d6c   :  { %v6593_v5 = vpack.c.bf16 %v8017_v6, %v6583_v41  ;;  %8020 = vmatprep.mubr.msk.bf16.mxu0 %vm619_vm7, %v6592_v60  ;;  %v6747_v60 = vrot.slane %v10059_v46, %v9103_v20 }
0x2d6e   :  { %8021 = vmatmul.mubr.msk.bf16.vlgmr.msra.gmra.mrb[52].mxu0 %vm619_vm7, %v6593_v5 }
0x2e41   :  { %v8022_v27 = vpop.f32.mrb[52].mxu0 }
0x2e42   :  { %v6637_v29 = vpop.f32.mrb[53].mxu0  ;;  %v6662_v42 = vadd.f32 %v8022_v27, %v6659_v11 }
0x2e43   :  { %v6660_v49 = vadd.f32 %v6659_v11, %v6637_v29  ;;  %v8023_v13 = vpop.f32.mrb[54].mxu0  ;;  %v6755_v29 = vrot.slane %v10059_v46, %v9108_v22  ;;  %v8485_v22 = vld [vmem:[%s10129_s16 + $0x40] sm:$0xff]  }
0x2e44   :  { %v6663_v34 = vadd.f32 %v8023_v13, %v6659_v11  ;;  %v6640_v2 = vpop.f32.mrb[55].mxu0  ;;  %v10028_v62 = vadd.f32 %v6662_v42, %v9741_v58  ;;  %8024 = vmatprep.subr.bf16.mxu0 %v8485_v22 }
0x2e45   :  { %v10017_v24 = vadd.f32 %v6660_v49, %v9738_v16  ;;  %v6661_v59 = vadd.f32 %v6659_v11, %v6640_v2  ;;  %8025 = vmatpush3.bf16.msra.mxu0 %v8485_v22 }
0x2e46   :  { %v10020_v55 = vadd.f32 %v6663_v34, %v9749_v21  ;;  %v6698_v21 = vsel %vm141_vm3, %v10028_v62, 0.0 }
0x2e47   :  { %v10023_v39 = vadd.f32 %v6661_v59, %v9744_v32  ;;  %v6692_v15 = vsel %vm141_vm3, %v10017_v24, 0.0 }
0x2e48   :  { %6693 = vadd.xlane.f32.xlu1 %v6692_v15  ;;  %v6701_v16 = vsel %vm141_vm3, %v10020_v55, 0.0 }
0x2e49   :  { %v6695_v3 = vsel %vm141_vm3, %v10023_v39, 0.0 }
0x2e4a   :  { %6696 = vadd.xlane.f32.xlu0 %v6695_v3 }
0x2e4c   :  { %6702 = vadd.xlane.f32.xlu1 %v6701_v16 }
0x2e4e   :  { %6699 = vadd.xlane.f32.xlu0 %v6698_v21 }
0x2ed5   :  { %v6694_v32 = vpop.xlane.xlu1 %6693 }
0x2ed6   :  { %v6704_v38 = vmul.f32 0.03125, %v6694_v32 }
0x2ed7   :  { %v6697_v52 = vpop.xlane.xlu0 %6696 }
0x2ed8   :  { %v6708_v40 = vsub.f32 %v10017_v24, %v6704_v38  ;;  %v6705_v57 = vmul.f32 0.03125, %v6697_v52  ;;  %v8486_v52 = vld [vmem:[%s10129_s16 + $0x48] sm:$0xff]  }
0x2ed9   :  { %v6703_v58 = vpop.xlane.xlu1 %6702  ;;  %8026 = vmatprep.subr.bf16.mxu0 %v8486_v52 }
0x2eda   :  { %v6709_v43 = vsub.f32 %v10023_v39, %v6705_v57  ;;  %v6707_v26 = vmul.f32 0.03125, %v6703_v58  ;;  %v6712_v36 = vmul.f32 %v6708_v40, %v6708_v40  ;;  %8027 = vmatpush3.bf16.msra.mxu0 %v8486_v52  ;;  %v8489_v57 = vld [vmem:[%s10129_s16 + $0x60] sm:$0xff]   ;;  %v8490_v58 = vld [vmem:[%s10129_s16 + $0x68] sm:$0xff]  }
0x2edb   :  { %v6700_v12 = vpop.xlane.xlu0 %6699 }
0x2edc   :  { %v6711_v4 = vsub.f32 %v10020_v55, %v6707_v26  ;;  %v6706_v37 = vmul.f32 0.03125, %v6700_v12  ;;  %v6716_v8 = vsel %vm141_vm3, %v6712_v36, 0.0  ;;  %v6713_v10 = vmul.f32 %v6709_v43, %v6709_v43  ;;  %v8492_v26 = vld [vmem:[%s10129_s16 + $0x78] sm:$0xff]   ;;  %v7288_v36 = vld [vmem:[%s10130_s18 + $0x2] sm:$0x3] }
0x2edd   :  { %6717 = vadd.xlane.f32.xlu0 %v6716_v8  ;;  %v6770_v12 = vrot.slane %v7288_v36, %v8951_v56 }
0x2ede   :  { %v6710_v63 = vsub.f32 %v10028_v62, %v6706_v37  ;;  %v6719_v61 = vsel %vm141_vm3, %v6713_v10, 0.0  ;;  %v6715_v0 = vmul.f32 %v6711_v4, %v6711_v4 }
0x2edf   :  { %6720 = vadd.xlane.f32.xlu1 %v6719_v61 }
0x2ee0   :  { %v6714_v48 = vmul.f32 %v6710_v63, %v6710_v63  ;;  %v6725_v47 = vsel %vm141_vm3, %v6715_v0, 0.0 }
0x2ee2   :  { %v6722_v44 = vsel %vm141_vm3, %v6714_v48, 0.0 }
0x2ee3   :  { %6726 = vadd.xlane.f32.xlu1 %v6725_v47  ;;  %6723 = vadd.xlane.f32.xlu0 %v6722_v44 }
0x2f6a   :  { %v6718_v50 = vpop.xlane.xlu0 %6717 }
0x2f6b   :  { %v6728_v23 = vmul.f32 0.03125, %v6718_v50 }
0x2f6c   :  { %v6721_v45 = vpop.xlane.xlu1 %6720 }
0x2f6d   :  { %v6732_v25 = vadd.f32 1e-05, %v6728_v23  ;;  %v6729_v30 = vmul.f32 0.03125, %v6721_v45 }
0x2f6f   :  { %8729 = vrsqrt.f32 %v6732_v25  ;;  %v6733_v53 = vadd.f32 1e-05, %v6729_v30 }
0x2f70   :  { %v6727_v28 = vpop.xlane.xlu1 %6726  ;;  %v6724_v51 = vpop.xlane.xlu0 %6723 }
0x2f71   :  { %8731 = vrsqrt.f32 %v6733_v53  ;;  %v6731_v17 = vmul.f32 0.03125, %v6727_v28  ;;  %v6730_v31 = vmul.f32 0.03125, %v6724_v51 }
0x2f73   :  { %v6735_v1 = vadd.f32 1e-05, %v6731_v17  ;;  %v6734_v33 = vadd.f32 1e-05, %v6730_v31 }
0x2f75   :  { %8733 = vrsqrt.f32 %v6735_v1 }
0x2f76   :  { %8735 = vrsqrt.f32 %v6734_v33 }
0x2f79   :  { %v8730_v6 = vpop.eup %8729 }
0x2f7a   :  { %v6740_v41 = vmul.f32 %v8730_v6, %v6708_v40  ;;  %v8488_v40 = vld [vmem:[%s10129_s16 + $0x58] sm:$0xff]  }
0x2f7b   :  { %v8732_v5 = vpop.eup %8731 }
0x2f7c   :  { %v6748_v11 = vmul.f32 %v6747_v60, %v6740_v41  ;;  %v6741_v27 = vmul.f32 %v8732_v5, %v6709_v43  ;;  %v8491_v43 = vld [vmem:[%s10129_s16 + $0x70] sm:$0xff]  }
0x2f7e   :  { %v6749_v49 = vmul.f32 %v6747_v60, %v6741_v27  ;;  %v6756_v42 = vadd.f32 %v6755_v29, %v6748_v11 }
0x2f7f   :  { %v8734_v13 = vpop.eup %8733 }
0x2f80   :  { %v8736_v34 = vpop.eup %8735  ;;  %v6743_v2 = vmul.f32 %v8734_v13, %v6711_v4  ;;  %v6757_v59 = vadd.f32 %v6755_v29, %v6749_v49 }
0x2f81   :  { %v6742_v15 = vmul.f32 %v8736_v34, %v6710_v63 }
0x2f82   :  { %v6760_v3 = vpack.c.bf16 %v6757_v59, %v6756_v42  ;;  %v6751_v16 = vmul.f32 %v6747_v60, %v6743_v2 }
0x2f83   :  { %v6750_v21 = vmul.f32 %v6747_v60, %v6742_v15 }
0x2f84   :  { %7309 = vmatmul.mubr.msk.bf16.vlgmr.msra.gmra.mrb[100].mxu1 %vm141_vm3, %v6760_v3  ;;  %v6759_v32 = vadd.f32 %v6755_v29, %v6751_v16 }
0x2f85   :  { %6841 = vmatprep.mubr.bf16.mxu1 %v8752_v7  ;;  %v6758_v20 = vadd.f32 %v6755_v29, %v6750_v21  ;;  %v8487_v7 = vld [vmem:[%s10129_s16 + $0x50] sm:$0xff]   ;;  %v6766_v29 = vrot.slane %v7288_v36, %v8943_v54 }
0x2f86   :  { %8028 = vmatprep.subr.bf16.mxu0 %v8487_v7 }
0x2f87   :  { %v6761_v38 = vpack.c.bf16 %v6759_v32, %v6758_v20  ;;  %8029 = vmatpush3.bf16.msra.mxu0 %v8487_v7 }
0x2f88   :  { %8030 = vmatprep.subr.bf16.mxu0 %v8488_v40 }
0x2f8b   :  { %8031 = vmatpush3.bf16.msra.mxu0 %v8488_v40 }
0x2f8c   :  { %7310 = vmatmul.mubr.msk.bf16.gmra.mrb[104].mxu1 %vm141_vm3, %v6761_v38  ;;  %8032 = vmatprep.subr.bf16.mxu0 %v8489_v57 }
0x2f8f   :  { %8033 = vmatpush3.bf16.msra.mxu0 %v8489_v57 }
0x2f90   :  { %8034 = vmatprep.subr.bf16.mxu0 %v8490_v58 }
0x2f93   :  { %8035 = vmatpush3.bf16.msra.mxu0 %v8490_v58 }
0x2f94   :  { %8036 = vmatprep.subr.bf16.mxu0 %v8491_v43 }
0x2f97   :  { %8037 = vmatpush3.bf16.msra.mxu0 %v8491_v43 }
0x2f98   :  { %8038 = vmatprep.subr.bf16.mxu0 %v8492_v26 }
0x2f9b   :  { %8039 = vmatpush3.bf16.msra.mxu0 %v8492_v26 }
0x3057   :  { %v6833_v4 = vpop.f32.mrb[100].mxu1 }
0x3058   :  { %v6835_v37 = vpop.f32.mrb[101].mxu1  ;;  %v6834_v42 = vadd.f32 %v6833_v4, %v6766_v29 }
0x3059   :  { %v6836_v8 = vadd.f32 %v6835_v37, %v6770_v12  ;;  %v6837_v10 = vpop.f32.mrb[102].mxu1  ;;  %v6897_v37 = vrot.slane %v10059_v46, %v9145_v9 }
0x305a   :  { %v6839_v63 = vpop.f32.mrb[103].mxu1  ;;  %v6838_v3 = vadd.f32 %v6837_v10, %v6766_v29 }
0x305b   :  { %v6852_v61 = vmul.f32 %v6836_v8, %v6836_v8  ;;  %v6840_v0 = vadd.f32 %v6839_v63, %v6770_v12 }
0x305d   :  { %v6856_v48 = vmul.f32 %v6852_v61, %v6836_v8  ;;  %v6853_v47 = vmul.f32 %v6840_v0, %v6840_v0 }
0x305f   :  { %v6860_v44 = vmul.f32 0.044715, %v6856_v48  ;;  %v6857_v18 = vmul.f32 %v6853_v47, %v6840_v0  ;;  %v6843_v14 = vpop.f32.mrb[104].mxu1 }
0x3060   :  { %v6845_v35 = vpop.f32.mrb[105].mxu1  ;;  %v6844_v57 = vadd.f32 %v6843_v14, %v6766_v29 }
0x3061   :  { %v6864_v19 = vadd.f32 %v6860_v44, %v6836_v8  ;;  %v6861_v50 = vmul.f32 0.044715, %v6857_v18  ;;  %v6846_v23 = vadd.f32 %v6845_v35, %v6770_v12  ;;  %v6847_v45 = vpop.f32.mrb[106].mxu1 }
0x3062   :  { %v6849_v25 = vpop.f32.mrb[107].mxu1  ;;  %v6848_v43 = vadd.f32 %v6847_v45, %v6766_v29 }
0x3063   :  { %v6868_v30 = vmul.f32 0.7978846, %v6864_v19  ;;  %v6865_v56 = vadd.f32 %v6861_v50, %v6840_v0  ;;  %v6854_v53 = vmul.f32 %v6846_v23, %v6846_v23  ;;  %v6850_v28 = vadd.f32 %v6849_v25, %v6770_v12 }
0x3065   :  { %8737 = vtanh.f32 %v6868_v30  ;;  %v6869_v51 = vmul.f32 0.7978846, %v6865_v56  ;;  %v6858_v17 = vmul.f32 %v6854_v53, %v6846_v23  ;;  %v6855_v31 = vmul.f32 %v6850_v28, %v6850_v28 }
0x3067   :  { %8739 = vtanh.f32 %v6869_v51  ;;  %v6862_v1 = vmul.f32 0.044715, %v6858_v17  ;;  %v6859_v33 = vmul.f32 %v6855_v31, %v6850_v28 }
0x3069   :  { %v6866_v60 = vadd.f32 %v6862_v1, %v6846_v23  ;;  %v6863_v6 = vmul.f32 0.044715, %v6859_v33 }
0x306b   :  { %v6870_v41 = vmul.f32 0.7978846, %v6866_v60  ;;  %v6867_v5 = vadd.f32 %v6863_v6, %v6850_v28 }
0x306d   :  { %8741 = vtanh.f32 %v6870_v41  ;;  %v6871_v11 = vmul.f32 0.7978846, %v6867_v5 }
0x306f   :  { %v8738_v27 = vpop.eup %8737  ;;  %8743 = vtanh.f32 %v6871_v11 }
0x3070   :  { %v6876_v49 = vadd.f32 1.0, %v8738_v27 }
0x3071   :  { %v8740_v13 = vpop.eup %8739 }
0x3072   :  { %v6877_v34 = vadd.f32 1.0, %v8740_v13  ;;  %v6880_v2 = vmul.f32 0.5, %v6876_v49 }
0x3074   :  { %v6881_v59 = vmul.f32 0.5, %v6877_v34  ;;  %v6884_v15 = vmul.f32 %v6880_v2, %v6836_v8 }
0x3076   :  { %v6885_v16 = vmul.f32 %v6881_v59, %v6840_v0  ;;  %v6888_v21 = vmul.f32 %v6884_v15, %v6834_v42 }
0x3077   :  { %v8742_v20 = vpop.eup %8741 }
0x3078   :  { %v6878_v32 = vadd.f32 1.0, %v8742_v20  ;;  %v6889_v38 = vmul.f32 %v6885_v16, %v6838_v3 }
0x3079   :  { %v8744_v22 = vpop.eup %8743 }
0x307a   :  { %v6882_v52 = vmul.f32 0.5, %v6878_v32  ;;  %v6879_v7 = vadd.f32 1.0, %v8744_v22  ;;  %v6892_v40 = vpack.c.bf16 %v6889_v38, %v6888_v21 }
0x307c   :  { %v6886_v58 = vmul.f32 %v6882_v52, %v6846_v23  ;;  %v6883_v54 = vmul.f32 0.5, %v6879_v7  ;;  %8040 = vmatprep.mubr.bf16.mxu0 %v6892_v40 }
0x307e   :  { %v6887_v26 = vmul.f32 %v6883_v54, %v6850_v28  ;;  %v6890_v36 = vmul.f32 %v6886_v58, %v6844_v57 }
0x3080   :  { %v6891_v12 = vmul.f32 %v6887_v26, %v6848_v43 }
0x3082   :  { %v6893_v4 = vpack.c.bf16 %v6891_v12, %v6890_v36 }
0x3084   :  { %8041 = vmatmul.mubr.bf16.vlgmr.msra.gmra.mrb[60].mxu0 %v6893_v4 }
0x3157   :  { %v8042_v8 = vpop.f32.mrb[60].mxu0 }
0x3158   :  { %v6989_v10 = vadd.f32 %v8042_v8, %v6897_v37  ;;  %v6980_v63 = vpop.f32.mrb[61].mxu0 }
0x3159   :  { %v6981_v61 = vadd.f32 %v6980_v63, %v6897_v37  ;;  %v8043_v0 = vpop.f32.mrb[62].mxu0 }
0x315a   :  { %v6997_v48 = vadd.f32 %v6989_v10, %v10028_v62  ;;  %v6992_v47 = vadd.f32 %v8043_v0, %v6897_v37  ;;  %v6983_v44 = vpop.f32.mrb[63].mxu0 }
0x315b   :  { %v6995_v18 = vadd.f32 %v6981_v61, %v10017_v24  ;;  %v6984_v14 = vadd.f32 %v6983_v44, %v6897_v37 }
0x315c   :  { %v6998_v35 = vadd.f32 %v6992_v47, %v10020_v55  ;;  %v7008_v50 = vsel %vm141_vm3, %v6997_v48, 0.0 }
0x315d   :  { %v6996_v19 = vadd.f32 %v6984_v14, %v10023_v39  ;;  %v6999_v46 = vsel %vm141_vm3, %v6995_v18, 0.0 }
0x315e   :  { %v7009_v9 = vsel %vm141_vm3, %v6998_v35, 0.0 }
0x315f   :  { %v7010_v23 = vadd.f32 %v7009_v9, %v7008_v50  ;;  %v7000_v45 = vsel %vm141_vm3, %v6996_v19, 0.0 }
0x3160   :  { %v7001_v25 = vadd.f32 %v7000_v45, %v6999_v46 }
0x3161   :  { %v7011_v62 = vrot.slane %v7010_v23, 4 }
0x3162   :  { %v7002_v30 = vrot.slane %v7001_v25, 4 }
0x3163   :  { %v7012_v56 = vadd.f32 %v7011_v62, %v7010_v23 }
0x3164   :  { %v7003_v53 = vadd.f32 %v7002_v30, %v7001_v25 }
0x3165   :  { %v7013_v24 = vrot.slane %v7012_v56, 2 }
0x3166   :  { %v7004_v28 = vrot.slane %v7003_v53, 2 }
0x3167   :  { %v7014_v51 = vadd.f32 %v7013_v24, %v7012_v56 }
0x3168   :  { %v7005_v55 = vadd.f32 %v7004_v28, %v7003_v53 }
0x3169   :  { %v7015_v17 = vrot.slane %v7014_v51, 1 }
0x316a   :  { %v7006_v39 = vrot.slane %v7005_v55, 1 }
0x316b   :  { %v7016_v31 = vadd.f32 %v7015_v17, %v7014_v51 }
0x316c   :  { %v7007_v1 = vadd.f32 %v7006_v39, %v7005_v55 }
0x316e   :  { %v7019_v33 = vsel %vm3597_vm9, %v7016_v31, %v7007_v1 }
0x316f   :  { %7319 = vst.msk [vmem:[%s10131_s19 + $0x2] sm:$0x3] %vm3600_vm10, %v7019_v33 }

</bundles_post_ra>
